<compile_context>
chip_gen: v7x
topology: tpu7x:2x2x1
jax: 0.10.0
libtpu: 0.0.40
codegen_flags: <defaults>
</compile_context>

<pallas_src>
import math

import jax
import jax.numpy as jnp
from jax import lax
from jax.experimental import pallas as pl
from jax.experimental.pallas import tpu as pltpu

MASK_VALUE = -1e30     # large finite value; avoids -inf/NaN-prone intermediates
LN_EPS = 1e-5


# ---------------------------------------------------------------------------
# In-kernel helpers
# ---------------------------------------------------------------------------
def _layernorm(x, w, b):
    mu = jnp.mean(x, axis=-1, keepdims=True)
    var = jnp.mean((x - mu) ** 2, axis=-1, keepdims=True)
    return (x - mu) * lax.rsqrt(var + LN_EPS) * w + b


def _mm(a_bf16, w_bf16):
    """Dense 2D matmul on the MXU: bf16 operands, f32 accumulation."""
    return lax.dot_general(a_bf16, w_bf16, (((1,), (0,)), ((), ())),
                           preferred_element_type=jnp.float32)


def _split_heads(x2, b, s, heads, dh):
    """(b*s, heads*dh) f32 -> (heads*b, s, dh) bf16 (head-major leading batch)."""
    x3 = x2.reshape(b, s, heads * dh).astype(jnp.bfloat16)
    return jnp.concatenate(
        [x3[:, :, h * dh:(h + 1) * dh] for h in range(heads)], axis=0)


def _merge_heads(o3, b, s, heads, dh):
    """(heads*b, s, dh) f32 -> (b*s, heads*dh) f32 (lane concat over heads)."""
    o4 = o3.reshape(heads, b, s, dh)
    o2 = jnp.concatenate([o4[h] for h in range(heads)], axis=-1)   # (b, s, d)
    return o2.reshape(b * s, heads * dh)


def _attention(q2, k2, v2, bias, invalid, heads, b, nq, nk):
    """Multi-head attention core (pre output-projection).

    q2: (b*nq, d) f32, k2/v2: (b*nk, d) f32.
    bias: optional (heads, nq, nk) additive bias; invalid: (b, nq, nk) bool.
    Returns (b*nq, d) f32.
    """
    d = q2.shape[-1]
    dh = d // heads
    scale = dh ** -0.5

    q3 = _split_heads(q2, b, nq, heads, dh)        # (heads*b, nq, dh) bf16
    k3 = _split_heads(k2, b, nk, heads, dh)
    v3 = _split_heads(v2, b, nk, heads, dh)

    dots = lax.dot_general(q3, k3, (((2,), (2,)), ((0,), (0,))),
                           preferred_element_type=jnp.float32)
    dots = dots.reshape(heads, b, nq, nk) * scale
    if bias is not None:
        dots = dots + bias[:, None]                # broadcast over batch
    dots = jnp.where(invalid[None], MASK_VALUE, dots)

    dots = dots - jnp.max(dots, axis=-1, keepdims=True)
    p = jnp.exp(dots)
    p = p * pl.reciprocal(jnp.sum(p, axis=-1, keepdims=True), approx=False)

    p3 = p.reshape(heads * b, nq, nk).astype(jnp.bfloat16)
    o3 = lax.dot_general(p3, v3, (((2,), (1,)), ((0,), (0,))),
                         preferred_element_type=jnp.float32)   # (heads*b, nq, dh)
    return _merge_heads(o3, b, nq, heads, dh)


# ---------------------------------------------------------------------------
# Fused decoder-layer kernel: self-attn -> cross-attn -> feed-forward
# ---------------------------------------------------------------------------
def _make_layer_kernel(*, heads, block_b, n, m, cross_uses_context):
    def kernel(*refs):
        if cross_uses_context:
            (x_ref, ctx_ref, bias_ref, qmc_ref, qmr_ref, kmr_ref,
             *w, o_ref) = refs
        else:
            (x_ref, bias_ref, qmc_ref, qmr_ref, kmr_ref, *w, o_ref) = refs
            ctx_ref = None
        (s_lnw, s_lnb, s_wqkv, s_bqkv, s_wo, s_bo,
         c_lnw, c_lnb, c_wq, c_bq, c_wkv, c_bkv, c_wo, c_bo,
         f_lnw, f_lnb, f_w1, f_b1, f_w2, f_b2) = w

        bb = block_b
        d = x_ref.shape[-1]
        x = x_ref[...].reshape(bb * n, d)          # residual stream, f32

        qmc = qmc_ref[...]                         # (bb, n, 1) query mask
        qmr = qmr_ref[...]                         # (bb, 1, n) query mask
        kmr = kmr_ref[...]                         # (bb, 1, m) kv mask

        # Masks built in-kernel (no O(n*m) HBM traffic).
        row = lax.broadcasted_iota(jnp.int32, (n, n), 0)
        col = lax.broadcasted_iota(jnp.int32, (n, n), 1)
        self_invalid = jnp.logical_or((col > row)[None],
                                      (qmc * qmr) < 0.5)       # (bb, n, n)
        cross_invalid = (qmc * kmr) < 0.5                      # (bb, n, m)

        # ---- self attention (causal, T5 relative-position bias) -------------
        xn = _layernorm(x, s_lnw[...], s_lnb[...]).astype(jnp.bfloat16)
        qkv = _mm(xn, s_wqkv[...]) + s_bqkv[...]               # (bb*n, 3d) f32
        sa = _attention(qkv[:, :d], qkv[:, d:2 * d], qkv[:, 2 * d:],
                        bias_ref[...].astype(jnp.float32), self_invalid,
                        heads, bb, n, n)
        x = x + _mm(sa.astype(jnp.bfloat16), s_wo[...]) + s_bo[...]

        # ---- cross attention -------------------------------------------------
        xn2 = _layernorm(x, c_lnw[...], c_lnb[...]).astype(jnp.bfloat16)
        if cross_uses_context:
            kv_src = ctx_ref[...].reshape(bb * m, d).astype(jnp.bfloat16)
        else:
            kv_src = xn2                                        # m == n here
        q2 = _mm(xn2, c_wq[...]) + c_bq[...]
        kv = _mm(kv_src, c_wkv[...]) + c_bkv[...]               # (bb*m, 2d)
        ca = _attention(q2, kv[:, :d], kv[:, d:], None, cross_invalid,
                        heads, bb, n, m)
        x = x + _mm(ca.astype(jnp.bfloat16), c_wo[...]) + c_bo[...]

        # ---- feed forward: Linear -> GELU(exact erf) -> Linear ---------------
        xn3 = _layernorm(x, f_lnw[...], f_lnb[...]).astype(jnp.bfloat16)
        h = _mm(xn3, f_w1[...]) + f_b1[...]
        h = 0.5 * h * (1.0 + lax.erf(h * (1.0 / math.sqrt(2.0))))
        x = x + _mm(h.astype(jnp.bfloat16), f_w2[...]) + f_b2[...]

        o_ref[...] = x.reshape(bb, n, d).astype(o_ref.dtype)

    return kernel


# ---------------------------------------------------------------------------
# VMEM budget / batch-tile selection (generation aware)
# ---------------------------------------------------------------------------
def _vmem_limit_bytes():
    default_cap = 64 * 1024 * 1024
    try:
        cap = int(getattr(pltpu.get_tpu_info(), "vmem_capacity_bytes",
                          default_cap))
    except Exception:
        cap = default_cap
    # ~8 MiB headroom for compiler-internal scratch; cap at 112 MiB on the
    # 128 MiB parts (v5e/v6e), ~56 MiB on v7x's 64 MiB.
    return max(32 * 1024 * 1024, min(cap - 8 * 1024 * 1024, 112 * 1024 * 1024))


def _pick_block_b(B, n, m, d, dff, heads, vmem_limit):
    """Batch tile so Bb*n fills the MXU M dim while activations fit VMEM."""
    target_rows = 256                 # MXU M-dim fill target (v6e/v7x width)
    act_budget = max(vmem_limit // 3, 1 << 20)

    def act_bytes(bb):
        # rough f32 per-step activation footprint (residual/QKV/scores/FF)
        return 4 * bb * (6 * n * d + 2 * m * d + 3 * heads * n * m + 2 * n * dff)

    divisors = [bb for bb in range(1, B + 1) if B % bb == 0]
    feasible = [bb for bb in divisors if act_bytes(bb) <= act_budget] or [1]
    for bb in feasible:               # smallest tile that already fills M
        if bb * n >= target_rows:
            return bb
    # otherwise the largest feasible tile that still leaves >= 2 grid steps
    # (keeps both v7x TensorCores busy), falling back to the largest feasible.
    sub = [bb for bb in feasible if B // bb >= 2]
    return (sub or feasible)[-1]


# ---------------------------------------------------------------------------
# pallas_call wrapper (grid over batch tiles, one call per layer)
# ---------------------------------------------------------------------------
def _decoder_layer(x, ctx, pos_bias, qmc, qmr, kmr, layer_p, *, heads,
                   cross_uses_context, block_b, vmem_limit_bytes):
    B, n, d = x.shape
    m = kmr.shape[-1]
    grid = (B // block_b,)

    def per_batch(tail):
        r = len(tail)
        return pl.BlockSpec((block_b,) + tail,
                            lambda b, _r=r: (b,) + (0,) * _r)

    # Grid-invariant operands: whole array resident in VMEM, single-buffered.
    def vmem_full():
        return pl.BlockSpec(memory_space=pltpu.MemorySpace.VMEM)

    sa, ca, ff = layer_p["self_attn"], layer_p["cross_attn"], layer_p["ff"]

    in_specs = [per_batch((n, d))]
    args = [x]
    if cross_uses_context:
        in_specs.append(per_batch((m, d)))
        args.append(ctx)
    in_specs += [vmem_full(),                         # relative-position bias
                 per_batch((n, 1)), per_batch((1, n)), per_batch((1, m))]
    args += [pos_bias, qmc, qmr, kmr]

    weights = [sa["ln_w"], sa["ln_b"], sa["w_qkv"], sa["b_qkv"],
               sa["wo"], sa["bo"],
               ca["ln_w"], ca["ln_b"], ca["wq"], ca["bq"],
               ca["wkv"], ca["bkv"], ca["wo"], ca["bo"],
               ff["ln_w"], ff["ln_b"], ff["w1"], ff["b1"], ff["w2"], ff["b2"]]
    in_specs += [vmem_full() for _ in weights]
    args += weights

    kernel = _make_layer_kernel(heads=heads, block_b=block_b, n=n, m=m,
                                cross_uses_context=cross_uses_context)
    return pl.pallas_call(
        kernel,
        out_shape=jax.ShapeDtypeStruct((B, n, d), x.dtype),
        grid=grid,
        in_specs=in_specs,
        out_specs=per_batch((n, d)),
        compiler_params=pltpu.CompilerParams(
            dimension_semantics=("parallel",),
            vmem_limit_bytes=vmem_limit_bytes),
    )(*args)


# ---------------------------------------------------------------------------
# T5 relative position bias (causal=True), cheap glue in plain JAX
# ---------------------------------------------------------------------------
def relative_position_bias(emb_weight, qlen, klen, *, num_buckets=32,
                           max_distance=128):
    q_pos = jnp.arange(qlen, dtype=jnp.int32)
    k_pos = jnp.arange(klen, dtype=jnp.int32)
    rel_pos = k_pos[None, :] - q_pos[:, None]
    nb = num_buckets // 2                     # causal=True halves the buckets
    neg = -rel_pos
    ret = (neg < 0).astype(jnp.int32) * nb
    neg = jnp.abs(neg)
    max_exact = nb // 2
    is_small = neg < max_exact
    val_if_large = max_exact + (
        jnp.log(jnp.maximum(neg, 1).astype(jnp.float32) / max_exact)
        / math.log(max_distance / max_exact) * (nb - max_exact)
    ).astype(jnp.int32)
    val_if_large = jnp.minimum(val_if_large, nb - 1)
    ret = ret + jnp.where(is_small, neg, val_if_large)
    values = emb_weight[ret]                  # (qlen, klen, heads)
    return jnp.transpose(values, (2, 0, 1))   # (heads, qlen, klen)


# ---------------------------------------------------------------------------
# Parameter init (deterministic, synthetic).  Dense (d, d_out) weight layouts
# stored in bf16; the self-attention QKV projection is fused into (d, 3d).
# ---------------------------------------------------------------------------
def init_decoder_params(key, dim, depth, heads, mult=4, num_buckets=32):
    assert dim % heads == 0, "dim must be divisible by heads"
    dff = dim * mult

    def linear(k, din, dout):
        kw, kb = jax.random.split(k)
        lim = 1.0 / math.sqrt(din)
        w = jax.random.uniform(kw, (din, dout), jnp.float32, -lim, lim)
        b = jax.random.uniform(kb, (dout,), jnp.float32, -lim, lim)
        return w, b

    def attn_params(k, fuse_qkv):
        k1, k2, k3 = jax.random.split(k, 3)
        wq, bq = linear(k1, dim, dim)
        wkv, bkv = linear(k2, dim, 2 * dim)      # fused to_kv: [k | v] columns
        wo, bo = linear(k3, dim, dim)
        p = dict(ln_w=jnp.ones((1, dim), jnp.float32),
                 ln_b=jnp.zeros((1, dim), jnp.float32),
                 wo=wo.astype(jnp.bfloat16), bo=bo.reshape(1, dim))
        if fuse_qkv:
            p["w_qkv"] = jnp.concatenate([wq, wkv], axis=1).astype(jnp.bfloat16)
            p["b_qkv"] = jnp.concatenate([bq, bkv]).reshape(1, 3 * dim)
        else:
            p["wq"] = wq.astype(jnp.bfloat16)
            p["bq"] = bq.reshape(1, dim)
            p["wkv"] = wkv.astype(jnp.bfloat16)
            p["bkv"] = bkv.reshape(1, 2 * dim)
        return p

    def ff_params(k):
        k1, k2 = jax.random.split(k)
        w1, b1 = linear(k1, dim, dff)
        w2, b2 = linear(k2, dff, dim)
        return dict(ln_w=jnp.ones((1, dim), jnp.float32),
                    ln_b=jnp.zeros((1, dim), jnp.float32),
                    w1=w1.astype(jnp.bfloat16), b1=b1.reshape(1, dff),
                    w2=w2.astype(jnp.bfloat16), b2=b2.reshape(1, dim))

    keys = jax.random.split(key, depth + 1)
    layers = []
    for i in range(depth):
        ka, kc, kf = jax.random.split(keys[1 + i], 3)
        layers.append(dict(self_attn=attn_params(ka, fuse_qkv=True),
                           cross_attn=attn_params(kc, fuse_qkv=False),
                           ff=ff_params(kf)))
    rel_emb = jax.random.normal(keys[0], (num_buckets, heads), jnp.float32)
    return dict(rel_emb=rel_emb, layers=layers, heads=heads, dff=dff)


# ---------------------------------------------------------------------------
# Decoder forward
# ---------------------------------------------------------------------------
def decoder_forward(params, x, context=None, src_mask=None, tgt_mask=None,
                    block_b=None):
    B, n, d = x.shape
    heads = params["heads"]
    cross_uses_context = context is not None
    m = context.shape[1] if cross_uses_context else n

    pos_bias = relative_position_bias(params["rel_emb"], n, n,
                                      num_buckets=32,
                                      max_distance=128).astype(jnp.bfloat16)

    # Sequence masks are passed as O(n)/O(m) vectors; the (n, m) masks are
    # rebuilt in-kernel.  All-ones defaults match "no mask given" semantics.
    qm = (jnp.ones((B, n), jnp.float32) if src_mask is None
          else src_mask.astype(jnp.float32))
    if cross_uses_context:
        km = (jnp.ones((B, m), jnp.float32) if tgt_mask is None
              else tgt_mask.astype(jnp.float32))
    else:
        km = qm if tgt_mask is None else tgt_mask.astype(jnp.float32)

    qmc = qm[:, :, None]        # (B, n, 1)
    qmr = qm[:, None, :]        # (B, 1, n)
    kmr = km[:, None, :]        # (B, 1, m)

    vmem_limit = _vmem_limit_bytes()
    if block_b is None:
        block_b = _pick_block_b(B, n, m, d, params["dff"], heads, vmem_limit)

    # TODO(synk): overlap next-layer weight DMA with current-layer compute via
    #             cross-pallas_call DMA futures; layers are sequential calls.
    for layer in params["layers"]:
        x = _decoder_layer(x, context, pos_bias, qmc, qmr, kmr, layer,
                           heads=heads,
                           cross_uses_context=cross_uses_context,
                           block_b=block_b,
                           vmem_limit_bytes=vmem_limit)
    return x


# ---------------------------------------------------------------------------
if __name__ == "__main__":
    key = jax.random.PRNGKey(0)
    kp, kx, kc = jax.random.split(key, 3)

    # Small, lane-dense toy config (dim a multiple of 128, n a multiple of 8).
    dim, depth, heads = 128, 2, 8
    B, n, m = 2, 8, 8

    params = init_decoder_params(kp, dim, depth, heads)
    x = jax.random.normal(kx, (B, n, dim), jnp.float32)
    context = jax.random.normal(kc, (B, m, dim), jnp.float32)

    out = decoder_forward(params, x, context)
    out = jax.block_until_ready(out)

    assert out.shape == (B, n, dim)
    assert bool(jnp.all(jnp.isfinite(out)))
    print("KERNEL_OK")
</pallas_src>

<mosaic_0001>
module attributes {stable_mosaic.version = 11 : i64} {
  func.func @kernel(%arg0: i32, %arg1: memref<1x8x128xf32, #tpu.memory_space<vmem>>, %arg2: memref<1x8x128xf32, #tpu.memory_space<vmem>>, %arg3: memref<8x8x8xbf16, #tpu.memory_space<vmem>>, %arg4: memref<1x8x1xf32, #tpu.memory_space<vmem>>, %arg5: memref<1x1x8xf32, #tpu.memory_space<vmem>>, %arg6: memref<1x1x8xf32, #tpu.memory_space<vmem>>, %arg7: memref<1x128xf32, #tpu.memory_space<vmem>>, %arg8: memref<1x128xf32, #tpu.memory_space<vmem>>, %arg9: memref<128x384xbf16, #tpu.memory_space<vmem>>, %arg10: memref<1x384xf32, #tpu.memory_space<vmem>>, %arg11: memref<128x128xbf16, #tpu.memory_space<vmem>>, %arg12: memref<1x128xf32, #tpu.memory_space<vmem>>, %arg13: memref<1x128xf32, #tpu.memory_space<vmem>>, %arg14: memref<1x128xf32, #tpu.memory_space<vmem>>, %arg15: memref<128x128xbf16, #tpu.memory_space<vmem>>, %arg16: memref<1x128xf32, #tpu.memory_space<vmem>>, %arg17: memref<128x256xbf16, #tpu.memory_space<vmem>>, %arg18: memref<1x256xf32, #tpu.memory_space<vmem>>, %arg19: memref<128x128xbf16, #tpu.memory_space<vmem>>, %arg20: memref<1x128xf32, #tpu.memory_space<vmem>>, %arg21: memref<1x128xf32, #tpu.memory_space<vmem>>, %arg22: memref<1x128xf32, #tpu.memory_space<vmem>>, %arg23: memref<128x512xbf16, #tpu.memory_space<vmem>>, %arg24: memref<1x512xf32, #tpu.memory_space<vmem>>, %arg25: memref<512x128xbf16, #tpu.memory_space<vmem>>, %arg26: memref<1x128xf32, #tpu.memory_space<vmem>>, %arg27: memref<1x8x128xf32, #tpu.memory_space<vmem>>) attributes {dimension_semantics = [#tpu.dimension_semantics<parallel>], iteration_bounds = array<i64: 2>, scalar_prefetch = 0 : i64, scratch_operands = 0 : i64, tpu.core_type = #tpu.core_type<tc>, window_params = [{transform_indices = @transform_0, window_bounds = array<i64: 1, 8, 128>}, {transform_indices = @transform_1, window_bounds = array<i64: 1, 8, 128>}, {pipeline_mode = #tpu.pipeline_mode<synchronous>, transform_indices = @transform_2, window_bounds = array<i64: 8, 8, 8>}, {transform_indices = @transform_3, window_bounds = array<i64: 1, 8, 1>}, {transform_indices = @transform_4, window_bounds = array<i64: 1, 1, 8>}, {transform_indices = @transform_5, window_bounds = array<i64: 1, 1, 8>}, {pipeline_mode = #tpu.pipeline_mode<synchronous>, transform_indices = @transform_6, window_bounds = array<i64: 1, 128>}, {pipeline_mode = #tpu.pipeline_mode<synchronous>, transform_indices = @transform_7, window_bounds = array<i64: 1, 128>}, {pipeline_mode = #tpu.pipeline_mode<synchronous>, transform_indices = @transform_8, window_bounds = array<i64: 128, 384>}, {pipeline_mode = #tpu.pipeline_mode<synchronous>, transform_indices = @transform_9, window_bounds = array<i64: 1, 384>}, {pipeline_mode = #tpu.pipeline_mode<synchronous>, transform_indices = @transform_10, window_bounds = array<i64: 128, 128>}, {pipeline_mode = #tpu.pipeline_mode<synchronous>, transform_indices = @transform_11, window_bounds = array<i64: 1, 128>}, {pipeline_mode = #tpu.pipeline_mode<synchronous>, transform_indices = @transform_12, window_bounds = array<i64: 1, 128>}, {pipeline_mode = #tpu.pipeline_mode<synchronous>, transform_indices = @transform_13, window_bounds = array<i64: 1, 128>}, {pipeline_mode = #tpu.pipeline_mode<synchronous>, transform_indices = @transform_14, window_bounds = array<i64: 128, 128>}, {pipeline_mode = #tpu.pipeline_mode<synchronous>, transform_indices = @transform_15, window_bounds = array<i64: 1, 128>}, {pipeline_mode = #tpu.pipeline_mode<synchronous>, transform_indices = @transform_16, window_bounds = array<i64: 128, 256>}, {pipeline_mode = #tpu.pipeline_mode<synchronous>, transform_indices = @transform_17, window_bounds = array<i64: 1, 256>}, {pipeline_mode = #tpu.pipeline_mode<synchronous>, transform_indices = @transform_18, window_bounds = array<i64: 128, 128>}, {pipeline_mode = #tpu.pipeline_mode<synchronous>, transform_indices = @transform_19, window_bounds = array<i64: 1, 128>}, {pipeline_mode = #tpu.pipeline_mode<synchronous>, transform_indices = @transform_20, window_bounds = array<i64: 1, 128>}, {pipeline_mode = #tpu.pipeline_mode<synchronous>, transform_indices = @transform_21, window_bounds = array<i64: 1, 128>}, {pipeline_mode = #tpu.pipeline_mode<synchronous>, transform_indices = @transform_22, window_bounds = array<i64: 128, 512>}, {pipeline_mode = #tpu.pipeline_mode<synchronous>, transform_indices = @transform_23, window_bounds = array<i64: 1, 512>}, {pipeline_mode = #tpu.pipeline_mode<synchronous>, transform_indices = @transform_24, window_bounds = array<i64: 512, 128>}, {pipeline_mode = #tpu.pipeline_mode<synchronous>, transform_indices = @transform_25, window_bounds = array<i64: 1, 128>}, {transform_indices = @transform_26, window_bounds = array<i64: 1, 8, 128>}]} {
    %c0 = arith.constant 0 : index
    %c0_0 = arith.constant 0 : index
    %c0_1 = arith.constant 0 : index
    %0 = vector.load %arg1[%c0, %c0_0, %c0_1] : memref<1x8x128xf32, #tpu.memory_space<vmem>>, vector<1x8x128xf32>
    %1 = vector.shape_cast %0 : vector<1x8x128xf32> to vector<8x128xf32>
    %c0_2 = arith.constant 0 : index
    %c0_3 = arith.constant 0 : index
    %c0_4 = arith.constant 0 : index
    %2 = vector.load %arg4[%c0_2, %c0_3, %c0_4] : memref<1x8x1xf32, #tpu.memory_space<vmem>>, vector<1x8x1xf32>
    %c0_5 = arith.constant 0 : index
    %c0_6 = arith.constant 0 : index
    %c0_7 = arith.constant 0 : index
    %3 = vector.load %arg5[%c0_5, %c0_6, %c0_7] : memref<1x1x8xf32, #tpu.memory_space<vmem>>, vector<1x1x8xf32>
    %c0_8 = arith.constant 0 : index
    %c0_9 = arith.constant 0 : index
    %c0_10 = arith.constant 0 : index
    %4 = vector.load %arg6[%c0_8, %c0_9, %c0_10] : memref<1x1x8xf32, #tpu.memory_space<vmem>>, vector<1x1x8xf32>
    %5 = tpu.iota {dimensions = array<i32: 0>} : vector<8x8xi32>
    %6 = tpu.iota {dimensions = array<i32: 1>} : vector<8x8xi32>
    %7 = arith.cmpi sgt, %6, %5 : vector<8x8xi32>
    %8 = vector.shape_cast %7 : vector<8x8xi1> to vector<1x8x8xi1>
    %9 = vector.broadcast %2 : vector<1x8x1xf32> to vector<1x8x8xf32>
    %10 = vector.broadcast %3 : vector<1x1x8xf32> to vector<1x8x8xf32>
    %11 = arith.mulf %9, %10 : vector<1x8x8xf32>
    %cst = arith.constant 5.000000e-01 : f32
    %12 = vector.broadcast %cst : f32 to vector<1x8x8xf32>
    %13 = arith.cmpf olt, %11, %12 : vector<1x8x8xf32>
    %14 = arith.ori %8, %13 : vector<1x8x8xi1>
    %15 = vector.broadcast %2 : vector<1x8x1xf32> to vector<1x8x8xf32>
    %16 = vector.broadcast %4 : vector<1x1x8xf32> to vector<1x8x8xf32>
    %17 = arith.mulf %15, %16 : vector<1x8x8xf32>
    %cst_11 = arith.constant 5.000000e-01 : f32
    %18 = vector.broadcast %cst_11 : f32 to vector<1x8x8xf32>
    %19 = arith.cmpf olt, %17, %18 : vector<1x8x8xf32>
    %c0_12 = arith.constant 0 : index
    %c0_13 = arith.constant 0 : index
    %20 = vector.load %arg7[%c0_12, %c0_13] : memref<1x128xf32, #tpu.memory_space<vmem>>, vector<1x128xf32>
    %c0_14 = arith.constant 0 : index
    %c0_15 = arith.constant 0 : index
    %21 = vector.load %arg8[%c0_14, %c0_15] : memref<1x128xf32, #tpu.memory_space<vmem>>, vector<1x128xf32>
    %cst_16 = arith.constant dense<0.000000e+00> : vector<8xf32>
    %22 = vector.multi_reduction <add>, %1, %cst_16 [1] : vector<8x128xf32> to vector<8xf32>
    %23 = vector.shape_cast %22 : vector<8xf32> to vector<8x1xf32>
    %cst_17 = arith.constant 1.280000e+02 : f32
    %24 = vector.broadcast %cst_17 : f32 to vector<8x1xf32>
    %25 = arith.divf %23, %24 : vector<8x1xf32>
    %26 = vector.broadcast %25 : vector<8x1xf32> to vector<8x128xf32>
    %27 = arith.subf %1, %26 : vector<8x128xf32>
    %28 = arith.mulf %27, %27 : vector<8x128xf32>
    %cst_18 = arith.constant dense<0.000000e+00> : vector<8xf32>
    %29 = vector.multi_reduction <add>, %28, %cst_18 [1] : vector<8x128xf32> to vector<8xf32>
    %30 = vector.shape_cast %29 : vector<8xf32> to vector<8x1xf32>
    %cst_19 = arith.constant 1.280000e+02 : f32
    %31 = vector.broadcast %cst_19 : f32 to vector<8x1xf32>
    %32 = arith.divf %30, %31 : vector<8x1xf32>
    %33 = vector.broadcast %25 : vector<8x1xf32> to vector<8x128xf32>
    %34 = arith.subf %1, %33 : vector<8x128xf32>
    %cst_20 = arith.constant 9.99999974E-6 : f32
    %35 = vector.broadcast %cst_20 : f32 to vector<8x1xf32>
    %36 = arith.addf %32, %35 : vector<8x1xf32>
    %37 = math.rsqrt %36 : vector<8x1xf32>
    %38 = vector.broadcast %37 : vector<8x1xf32> to vector<8x128xf32>
    %39 = arith.mulf %34, %38 : vector<8x128xf32>
    %40 = vector.broadcast %20 : vector<1x128xf32> to vector<8x128xf32>
    %41 = arith.mulf %39, %40 : vector<8x128xf32>
    %42 = vector.broadcast %21 : vector<1x128xf32> to vector<8x128xf32>
    %43 = arith.addf %41, %42 : vector<8x128xf32>
    %44 = arith.truncf %43 : vector<8x128xf32> to vector<8x128xbf16>
    %c0_21 = arith.constant 0 : index
    %c0_22 = arith.constant 0 : index
    %45 = vector.load %arg9[%c0_21, %c0_22] : memref<128x384xbf16, #tpu.memory_space<vmem>>, vector<128x384xbf16>
    %cst_23 = arith.constant dense<0.000000e+00> : vector<8x384xf32>
    %46 = tpu.matmul %44, %45, %cst_23 {dimension_numbers = #tpu.dot_dimension_numbers<[1], [0], [0], [1], [0, 0, 1, 1], [], []>} : vector<8x128xbf16>, vector<128x384xbf16>, vector<8x384xf32> -> vector<8x384xf32>
    %c0_24 = arith.constant 0 : index
    %c0_25 = arith.constant 0 : index
    %47 = vector.load %arg10[%c0_24, %c0_25] : memref<1x384xf32, #tpu.memory_space<vmem>>, vector<1x384xf32>
    %48 = vector.broadcast %47 : vector<1x384xf32> to vector<8x384xf32>
    %49 = arith.addf %46, %48 : vector<8x384xf32>
    %50 = vector.extract_strided_slice %49 {offsets = [0, 0], sizes = [8, 128], strides = [1, 1]} : vector<8x384xf32> to vector<8x128xf32>
    %51 = vector.extract_strided_slice %49 {offsets = [0, 128], sizes = [8, 128], strides = [1, 1]} : vector<8x384xf32> to vector<8x128xf32>
    %52 = vector.extract_strided_slice %49 {offsets = [0, 256], sizes = [8, 128], strides = [1, 1]} : vector<8x384xf32> to vector<8x128xf32>
    %c0_26 = arith.constant 0 : index
    %c0_27 = arith.constant 0 : index
    %c0_28 = arith.constant 0 : index
    %53 = vector.load %arg3[%c0_26, %c0_27, %c0_28] : memref<8x8x8xbf16, #tpu.memory_space<vmem>>, vector<8x8x8xbf16>
    %54 = arith.extf %53 : vector<8x8x8xbf16> to vector<8x8x8xf32>
    %55 = vector.shape_cast %50 : vector<8x128xf32> to vector<1x8x128xf32>
    %56 = arith.truncf %55 : vector<1x8x128xf32> to vector<1x8x128xbf16>
    %57 = vector.extract_strided_slice %56 {offsets = [0, 0, 0], sizes = [1, 8, 16], strides = [1, 1, 1]} : vector<1x8x128xbf16> to vector<1x8x16xbf16>
    %58 = vector.extract_strided_slice %56 {offsets = [0, 0, 16], sizes = [1, 8, 16], strides = [1, 1, 1]} : vector<1x8x128xbf16> to vector<1x8x16xbf16>
    %59 = vector.extract_strided_slice %56 {offsets = [0, 0, 32], sizes = [1, 8, 16], strides = [1, 1, 1]} : vector<1x8x128xbf16> to vector<1x8x16xbf16>
    %60 = vector.extract_strided_slice %56 {offsets = [0, 0, 48], sizes = [1, 8, 16], strides = [1, 1, 1]} : vector<1x8x128xbf16> to vector<1x8x16xbf16>
    %61 = vector.extract_strided_slice %56 {offsets = [0, 0, 64], sizes = [1, 8, 16], strides = [1, 1, 1]} : vector<1x8x128xbf16> to vector<1x8x16xbf16>
    %62 = vector.extract_strided_slice %56 {offsets = [0, 0, 80], sizes = [1, 8, 16], strides = [1, 1, 1]} : vector<1x8x128xbf16> to vector<1x8x16xbf16>
    %63 = vector.extract_strided_slice %56 {offsets = [0, 0, 96], sizes = [1, 8, 16], strides = [1, 1, 1]} : vector<1x8x128xbf16> to vector<1x8x16xbf16>
    %64 = vector.extract_strided_slice %56 {offsets = [0, 0, 112], sizes = [1, 8, 16], strides = [1, 1, 1]} : vector<1x8x128xbf16> to vector<1x8x16xbf16>
    %65 = tpu.concatenate %57, %58, %59, %60, %61, %62, %63, %64 in 0 : vector<1x8x16xbf16>, vector<1x8x16xbf16>, vector<1x8x16xbf16>, vector<1x8x16xbf16>, vector<1x8x16xbf16>, vector<1x8x16xbf16>, vector<1x8x16xbf16>, vector<1x8x16xbf16> -> vector<8x8x16xbf16>
    %66 = vector.shape_cast %51 : vector<8x128xf32> to vector<1x8x128xf32>
    %67 = arith.truncf %66 : vector<1x8x128xf32> to vector<1x8x128xbf16>
    %68 = vector.extract_strided_slice %67 {offsets = [0, 0, 0], sizes = [1, 8, 16], strides = [1, 1, 1]} : vector<1x8x128xbf16> to vector<1x8x16xbf16>
    %69 = vector.extract_strided_slice %67 {offsets = [0, 0, 16], sizes = [1, 8, 16], strides = [1, 1, 1]} : vector<1x8x128xbf16> to vector<1x8x16xbf16>
    %70 = vector.extract_strided_slice %67 {offsets = [0, 0, 32], sizes = [1, 8, 16], strides = [1, 1, 1]} : vector<1x8x128xbf16> to vector<1x8x16xbf16>
    %71 = vector.extract_strided_slice %67 {offsets = [0, 0, 48], sizes = [1, 8, 16], strides = [1, 1, 1]} : vector<1x8x128xbf16> to vector<1x8x16xbf16>
    %72 = vector.extract_strided_slice %67 {offsets = [0, 0, 64], sizes = [1, 8, 16], strides = [1, 1, 1]} : vector<1x8x128xbf16> to vector<1x8x16xbf16>
    %73 = vector.extract_strided_slice %67 {offsets = [0, 0, 80], sizes = [1, 8, 16], strides = [1, 1, 1]} : vector<1x8x128xbf16> to vector<1x8x16xbf16>
    %74 = vector.extract_strided_slice %67 {offsets = [0, 0, 96], sizes = [1, 8, 16], strides = [1, 1, 1]} : vector<1x8x128xbf16> to vector<1x8x16xbf16>
    %75 = vector.extract_strided_slice %67 {offsets = [0, 0, 112], sizes = [1, 8, 16], strides = [1, 1, 1]} : vector<1x8x128xbf16> to vector<1x8x16xbf16>
    %76 = tpu.concatenate %68, %69, %70, %71, %72, %73, %74, %75 in 0 : vector<1x8x16xbf16>, vector<1x8x16xbf16>, vector<1x8x16xbf16>, vector<1x8x16xbf16>, vector<1x8x16xbf16>, vector<1x8x16xbf16>, vector<1x8x16xbf16>, vector<1x8x16xbf16> -> vector<8x8x16xbf16>
    %77 = vector.shape_cast %52 : vector<8x128xf32> to vector<1x8x128xf32>
    %78 = arith.truncf %77 : vector<1x8x128xf32> to vector<1x8x128xbf16>
    %79 = vector.extract_strided_slice %78 {offsets = [0, 0, 0], sizes = [1, 8, 16], strides = [1, 1, 1]} : vector<1x8x128xbf16> to vector<1x8x16xbf16>
    %80 = vector.extract_strided_slice %78 {offsets = [0, 0, 16], sizes = [1, 8, 16], strides = [1, 1, 1]} : vector<1x8x128xbf16> to vector<1x8x16xbf16>
    %81 = vector.extract_strided_slice %78 {offsets = [0, 0, 32], sizes = [1, 8, 16], strides = [1, 1, 1]} : vector<1x8x128xbf16> to vector<1x8x16xbf16>
    %82 = vector.extract_strided_slice %78 {offsets = [0, 0, 48], sizes = [1, 8, 16], strides = [1, 1, 1]} : vector<1x8x128xbf16> to vector<1x8x16xbf16>
    %83 = vector.extract_strided_slice %78 {offsets = [0, 0, 64], sizes = [1, 8, 16], strides = [1, 1, 1]} : vector<1x8x128xbf16> to vector<1x8x16xbf16>
    %84 = vector.extract_strided_slice %78 {offsets = [0, 0, 80], sizes = [1, 8, 16], strides = [1, 1, 1]} : vector<1x8x128xbf16> to vector<1x8x16xbf16>
    %85 = vector.extract_strided_slice %78 {offsets = [0, 0, 96], sizes = [1, 8, 16], strides = [1, 1, 1]} : vector<1x8x128xbf16> to vector<1x8x16xbf16>
    %86 = vector.extract_strided_slice %78 {offsets = [0, 0, 112], sizes = [1, 8, 16], strides = [1, 1, 1]} : vector<1x8x128xbf16> to vector<1x8x16xbf16>
    %87 = tpu.concatenate %79, %80, %81, %82, %83, %84, %85, %86 in 0 : vector<1x8x16xbf16>, vector<1x8x16xbf16>, vector<1x8x16xbf16>, vector<1x8x16xbf16>, vector<1x8x16xbf16>, vector<1x8x16xbf16>, vector<1x8x16xbf16>, vector<1x8x16xbf16> -> vector<8x8x16xbf16>
    %cst_29 = arith.constant dense<0.000000e+00> : vector<8x8x8xf32>
    %88 = tpu.matmul %65, %76, %cst_29 {dimension_numbers = #tpu.dot_dimension_numbers<[2], [2], [1], [1], [0, 0, 0, 1, 1, 1], [0], [0]>} : vector<8x8x16xbf16>, vector<8x8x16xbf16>, vector<8x8x8xf32> -> vector<8x8x8xf32>
    %89 = vector.shape_cast %88 : vector<8x8x8xf32> to vector<8x1x8x8xf32>
    %cst_30 = arith.constant 2.500000e-01 : f32
    %90 = vector.broadcast %cst_30 : f32 to vector<8x1x8x8xf32>
    %91 = arith.mulf %89, %90 : vector<8x1x8x8xf32>
    %92 = vector.shape_cast %54 : vector<8x8x8xf32> to vector<8x1x8x8xf32>
    %93 = arith.addf %91, %92 : vector<8x1x8x8xf32>
    %94 = vector.shape_cast %14 : vector<1x8x8xi1> to vector<1x1x8x8xi1>
    %cst_31 = arith.constant -1.000000e+30 : f32
    %95 = vector.shape_cast %94 : vector<1x1x8x8xi1> to vector<1x1x8x8xi1>
    %96 = vector.broadcast %95 : vector<1x1x8x8xi1> to vector<8x1x8x8xi1>
    %97 = vector.broadcast %cst_31 : f32 to vector<8x1x8x8xf32>
    %98 = arith.select %96, %97, %93 : vector<8x1x8x8xi1>, vector<8x1x8x8xf32>
    %cst_32 = arith.constant dense<0xFF800000> : vector<8x1x8xf32>
    %99 = vector.multi_reduction <maximumf>, %98, %cst_32 [3] : vector<8x1x8x8xf32> to vector<8x1x8xf32>
    %100 = vector.shape_cast %99 : vector<8x1x8xf32> to vector<8x1x8x1xf32>
    %101 = vector.broadcast %100 : vector<8x1x8x1xf32> to vector<8x1x8x8xf32>
    %102 = arith.subf %98, %101 : vector<8x1x8x8xf32>
    %103 = math.exp %102 : vector<8x1x8x8xf32>
    %cst_33 = arith.constant dense<0.000000e+00> : vector<8x1x8xf32>
    %104 = vector.multi_reduction <add>, %103, %cst_33 [3] : vector<8x1x8x8xf32> to vector<8x1x8xf32>
    %105 = vector.shape_cast %104 : vector<8x1x8xf32> to vector<8x1x8x1xf32>
    %106 = tpu.reciprocal %105 : vector<8x1x8x1xf32> -> vector<8x1x8x1xf32>
    %107 = vector.broadcast %106 : vector<8x1x8x1xf32> to vector<8x1x8x8xf32>
    %108 = arith.mulf %103, %107 : vector<8x1x8x8xf32>
    %109 = vector.shape_cast %108 : vector<8x1x8x8xf32> to vector<8x8x8xf32>
    %110 = arith.truncf %109 : vector<8x8x8xf32> to vector<8x8x8xbf16>
    %cst_34 = arith.constant dense<0.000000e+00> : vector<8x8x16xf32>
    %111 = tpu.matmul %110, %87, %cst_34 {dimension_numbers = #tpu.dot_dimension_numbers<[2], [1], [1], [2], [0, 0, 0, 1, 1, 2], [0], [0]>} : vector<8x8x8xbf16>, vector<8x8x16xbf16>, vector<8x8x16xf32> -> vector<8x8x16xf32>
    %112 = vector.shape_cast %111 : vector<8x8x16xf32> to vector<8x1x8x16xf32>
    %113 = vector.extract_strided_slice %112 {offsets = [0, 0, 0, 0], sizes = [1, 1, 8, 16], strides = [1, 1, 1, 1]} : vector<8x1x8x16xf32> to vector<1x1x8x16xf32>
    %114 = vector.shape_cast %113 : vector<1x1x8x16xf32> to vector<1x8x16xf32>
    %115 = vector.extract_strided_slice %112 {offsets = [1, 0, 0, 0], sizes = [1, 1, 8, 16], strides = [1, 1, 1, 1]} : vector<8x1x8x16xf32> to vector<1x1x8x16xf32>
    %116 = vector.shape_cast %115 : vector<1x1x8x16xf32> to vector<1x8x16xf32>
    %117 = vector.extract_strided_slice %112 {offsets = [2, 0, 0, 0], sizes = [1, 1, 8, 16], strides = [1, 1, 1, 1]} : vector<8x1x8x16xf32> to vector<1x1x8x16xf32>
    %118 = vector.shape_cast %117 : vector<1x1x8x16xf32> to vector<1x8x16xf32>
    %119 = vector.extract_strided_slice %112 {offsets = [3, 0, 0, 0], sizes = [1, 1, 8, 16], strides = [1, 1, 1, 1]} : vector<8x1x8x16xf32> to vector<1x1x8x16xf32>
    %120 = vector.shape_cast %119 : vector<1x1x8x16xf32> to vector<1x8x16xf32>
    %121 = vector.extract_strided_slice %112 {offsets = [4, 0, 0, 0], sizes = [1, 1, 8, 16], strides = [1, 1, 1, 1]} : vector<8x1x8x16xf32> to vector<1x1x8x16xf32>
    %122 = vector.shape_cast %121 : vector<1x1x8x16xf32> to vector<1x8x16xf32>
    %123 = vector.extract_strided_slice %112 {offsets = [5, 0, 0, 0], sizes = [1, 1, 8, 16], strides = [1, 1, 1, 1]} : vector<8x1x8x16xf32> to vector<1x1x8x16xf32>
    %124 = vector.shape_cast %123 : vector<1x1x8x16xf32> to vector<1x8x16xf32>
    %125 = vector.extract_strided_slice %112 {offsets = [6, 0, 0, 0], sizes = [1, 1, 8, 16], strides = [1, 1, 1, 1]} : vector<8x1x8x16xf32> to vector<1x1x8x16xf32>
    %126 = vector.shape_cast %125 : vector<1x1x8x16xf32> to vector<1x8x16xf32>
    %127 = vector.extract_strided_slice %112 {offsets = [7, 0, 0, 0], sizes = [1, 1, 8, 16], strides = [1, 1, 1, 1]} : vector<8x1x8x16xf32> to vector<1x1x8x16xf32>
    %128 = vector.shape_cast %127 : vector<1x1x8x16xf32> to vector<1x8x16xf32>
    %129 = tpu.concatenate %114, %116, %118, %120, %122, %124, %126, %128 in 2 : vector<1x8x16xf32>, vector<1x8x16xf32>, vector<1x8x16xf32>, vector<1x8x16xf32>, vector<1x8x16xf32>, vector<1x8x16xf32>, vector<1x8x16xf32>, vector<1x8x16xf32> -> vector<1x8x128xf32>
    %130 = vector.shape_cast %129 : vector<1x8x128xf32> to vector<8x128xf32>
    %131 = arith.truncf %130 : vector<8x128xf32> to vector<8x128xbf16>
    %c0_35 = arith.constant 0 : index
    %c0_36 = arith.constant 0 : index
    %132 = vector.load %arg11[%c0_35, %c0_36] : memref<128x128xbf16, #tpu.memory_space<vmem>>, vector<128x128xbf16>
    %cst_37 = arith.constant dense<0.000000e+00> : vector<8x128xf32>
    %133 = tpu.matmul %131, %132, %cst_37 {dimension_numbers = #tpu.dot_dimension_numbers<[1], [0], [0], [1], [0, 0, 1, 1], [], []>} : vector<8x128xbf16>, vector<128x128xbf16>, vector<8x128xf32> -> vector<8x128xf32>
    %134 = arith.addf %1, %133 : vector<8x128xf32>
    %c0_38 = arith.constant 0 : index
    %c0_39 = arith.constant 0 : index
    %135 = vector.load %arg12[%c0_38, %c0_39] : memref<1x128xf32, #tpu.memory_space<vmem>>, vector<1x128xf32>
    %136 = vector.broadcast %135 : vector<1x128xf32> to vector<8x128xf32>
    %137 = arith.addf %134, %136 : vector<8x128xf32>
    %c0_40 = arith.constant 0 : index
    %c0_41 = arith.constant 0 : index
    %138 = vector.load %arg13[%c0_40, %c0_41] : memref<1x128xf32, #tpu.memory_space<vmem>>, vector<1x128xf32>
    %c0_42 = arith.constant 0 : index
    %c0_43 = arith.constant 0 : index
    %139 = vector.load %arg14[%c0_42, %c0_43] : memref<1x128xf32, #tpu.memory_space<vmem>>, vector<1x128xf32>
    %cst_44 = arith.constant dense<0.000000e+00> : vector<8xf32>
    %140 = vector.multi_reduction <add>, %137, %cst_44 [1] : vector<8x128xf32> to vector<8xf32>
    %141 = vector.shape_cast %140 : vector<8xf32> to vector<8x1xf32>
    %cst_45 = arith.constant 1.280000e+02 : f32
    %142 = vector.broadcast %cst_45 : f32 to vector<8x1xf32>
    %143 = arith.divf %141, %142 : vector<8x1xf32>
    %144 = vector.broadcast %143 : vector<8x1xf32> to vector<8x128xf32>
    %145 = arith.subf %137, %144 : vector<8x128xf32>
    %146 = arith.mulf %145, %145 : vector<8x128xf32>
    %cst_46 = arith.constant dense<0.000000e+00> : vector<8xf32>
    %147 = vector.multi_reduction <add>, %146, %cst_46 [1] : vector<8x128xf32> to vector<8xf32>
    %148 = vector.shape_cast %147 : vector<8xf32> to vector<8x1xf32>
    %cst_47 = arith.constant 1.280000e+02 : f32
    %149 = vector.broadcast %cst_47 : f32 to vector<8x1xf32>
    %150 = arith.divf %148, %149 : vector<8x1xf32>
    %151 = vector.broadcast %143 : vector<8x1xf32> to vector<8x128xf32>
    %152 = arith.subf %137, %151 : vector<8x128xf32>
    %cst_48 = arith.constant 9.99999974E-6 : f32
    %153 = vector.broadcast %cst_48 : f32 to vector<8x1xf32>
    %154 = arith.addf %150, %153 : vector<8x1xf32>
    %155 = math.rsqrt %154 : vector<8x1xf32>
    %156 = vector.broadcast %155 : vector<8x1xf32> to vector<8x128xf32>
    %157 = arith.mulf %152, %156 : vector<8x128xf32>
    %158 = vector.broadcast %138 : vector<1x128xf32> to vector<8x128xf32>
    %159 = arith.mulf %157, %158 : vector<8x128xf32>
    %160 = vector.broadcast %139 : vector<1x128xf32> to vector<8x128xf32>
    %161 = arith.addf %159, %160 : vector<8x128xf32>
    %162 = arith.truncf %161 : vector<8x128xf32> to vector<8x128xbf16>
    %c0_49 = arith.constant 0 : index
    %c0_50 = arith.constant 0 : index
    %c0_51 = arith.constant 0 : index
    %163 = vector.load %arg2[%c0_49, %c0_50, %c0_51] : memref<1x8x128xf32, #tpu.memory_space<vmem>>, vector<1x8x128xf32>
    %164 = vector.shape_cast %163 : vector<1x8x128xf32> to vector<8x128xf32>
    %165 = arith.truncf %164 : vector<8x128xf32> to vector<8x128xbf16>
    %c0_52 = arith.constant 0 : index
    %c0_53 = arith.constant 0 : index
    %166 = vector.load %arg15[%c0_52, %c0_53] : memref<128x128xbf16, #tpu.memory_space<vmem>>, vector<128x128xbf16>
    %cst_54 = arith.constant dense<0.000000e+00> : vector<8x128xf32>
    %167 = tpu.matmul %162, %166, %cst_54 {dimension_numbers = #tpu.dot_dimension_numbers<[1], [0], [0], [1], [0, 0, 1, 1], [], []>} : vector<8x128xbf16>, vector<128x128xbf16>, vector<8x128xf32> -> vector<8x128xf32>
    %c0_55 = arith.constant 0 : index
    %c0_56 = arith.constant 0 : index
    %168 = vector.load %arg16[%c0_55, %c0_56] : memref<1x128xf32, #tpu.memory_space<vmem>>, vector<1x128xf32>
    %169 = vector.broadcast %168 : vector<1x128xf32> to vector<8x128xf32>
    %170 = arith.addf %167, %169 : vector<8x128xf32>
    %c0_57 = arith.constant 0 : index
    %c0_58 = arith.constant 0 : index
    %171 = vector.load %arg17[%c0_57, %c0_58] : memref<128x256xbf16, #tpu.memory_space<vmem>>, vector<128x256xbf16>
    %cst_59 = arith.constant dense<0.000000e+00> : vector<8x256xf32>
    %172 = tpu.matmul %165, %171, %cst_59 {dimension_numbers = #tpu.dot_dimension_numbers<[1], [0], [0], [1], [0, 0, 1, 1], [], []>} : vector<8x128xbf16>, vector<128x256xbf16>, vector<8x256xf32> -> vector<8x256xf32>
    %c0_60 = arith.constant 0 : index
    %c0_61 = arith.constant 0 : index
    %173 = vector.load %arg18[%c0_60, %c0_61] : memref<1x256xf32, #tpu.memory_space<vmem>>, vector<1x256xf32>
    %174 = vector.broadcast %173 : vector<1x256xf32> to vector<8x256xf32>
    %175 = arith.addf %172, %174 : vector<8x256xf32>
    %176 = vector.extract_strided_slice %175 {offsets = [0, 0], sizes = [8, 128], strides = [1, 1]} : vector<8x256xf32> to vector<8x128xf32>
    %177 = vector.extract_strided_slice %175 {offsets = [0, 128], sizes = [8, 128], strides = [1, 1]} : vector<8x256xf32> to vector<8x128xf32>
    %178 = vector.shape_cast %170 : vector<8x128xf32> to vector<1x8x128xf32>
    %179 = arith.truncf %178 : vector<1x8x128xf32> to vector<1x8x128xbf16>
    %180 = vector.extract_strided_slice %179 {offsets = [0, 0, 0], sizes = [1, 8, 16], strides = [1, 1, 1]} : vector<1x8x128xbf16> to vector<1x8x16xbf16>
    %181 = vector.extract_strided_slice %179 {offsets = [0, 0, 16], sizes = [1, 8, 16], strides = [1, 1, 1]} : vector<1x8x128xbf16> to vector<1x8x16xbf16>
    %182 = vector.extract_strided_slice %179 {offsets = [0, 0, 32], sizes = [1, 8, 16], strides = [1, 1, 1]} : vector<1x8x128xbf16> to vector<1x8x16xbf16>
    %183 = vector.extract_strided_slice %179 {offsets = [0, 0, 48], sizes = [1, 8, 16], strides = [1, 1, 1]} : vector<1x8x128xbf16> to vector<1x8x16xbf16>
    %184 = vector.extract_strided_slice %179 {offsets = [0, 0, 64], sizes = [1, 8, 16], strides = [1, 1, 1]} : vector<1x8x128xbf16> to vector<1x8x16xbf16>
    %185 = vector.extract_strided_slice %179 {offsets = [0, 0, 80], sizes = [1, 8, 16], strides = [1, 1, 1]} : vector<1x8x128xbf16> to vector<1x8x16xbf16>
    %186 = vector.extract_strided_slice %179 {offsets = [0, 0, 96], sizes = [1, 8, 16], strides = [1, 1, 1]} : vector<1x8x128xbf16> to vector<1x8x16xbf16>
    %187 = vector.extract_strided_slice %179 {offsets = [0, 0, 112], sizes = [1, 8, 16], strides = [1, 1, 1]} : vector<1x8x128xbf16> to vector<1x8x16xbf16>
    %188 = tpu.concatenate %180, %181, %182, %183, %184, %185, %186, %187 in 0 : vector<1x8x16xbf16>, vector<1x8x16xbf16>, vector<1x8x16xbf16>, vector<1x8x16xbf16>, vector<1x8x16xbf16>, vector<1x8x16xbf16>, vector<1x8x16xbf16>, vector<1x8x16xbf16> -> vector<8x8x16xbf16>
    %189 = vector.shape_cast %176 : vector<8x128xf32> to vector<1x8x128xf32>
    %190 = arith.truncf %189 : vector<1x8x128xf32> to vector<1x8x128xbf16>
    %191 = vector.extract_strided_slice %190 {offsets = [0, 0, 0], sizes = [1, 8, 16], strides = [1, 1, 1]} : vector<1x8x128xbf16> to vector<1x8x16xbf16>
    %192 = vector.extract_strided_slice %190 {offsets = [0, 0, 16], sizes = [1, 8, 16], strides = [1, 1, 1]} : vector<1x8x128xbf16> to vector<1x8x16xbf16>
    %193 = vector.extract_strided_slice %190 {offsets = [0, 0, 32], sizes = [1, 8, 16], strides = [1, 1, 1]} : vector<1x8x128xbf16> to vector<1x8x16xbf16>
    %194 = vector.extract_strided_slice %190 {offsets = [0, 0, 48], sizes = [1, 8, 16], strides = [1, 1, 1]} : vector<1x8x128xbf16> to vector<1x8x16xbf16>
    %195 = vector.extract_strided_slice %190 {offsets = [0, 0, 64], sizes = [1, 8, 16], strides = [1, 1, 1]} : vector<1x8x128xbf16> to vector<1x8x16xbf16>
    %196 = vector.extract_strided_slice %190 {offsets = [0, 0, 80], sizes = [1, 8, 16], strides = [1, 1, 1]} : vector<1x8x128xbf16> to vector<1x8x16xbf16>
    %197 = vector.extract_strided_slice %190 {offsets = [0, 0, 96], sizes = [1, 8, 16], strides = [1, 1, 1]} : vector<1x8x128xbf16> to vector<1x8x16xbf16>
    %198 = vector.extract_strided_slice %190 {offsets = [0, 0, 112], sizes = [1, 8, 16], strides = [1, 1, 1]} : vector<1x8x128xbf16> to vector<1x8x16xbf16>
    %199 = tpu.concatenate %191, %192, %193, %194, %195, %196, %197, %198 in 0 : vector<1x8x16xbf16>, vector<1x8x16xbf16>, vector<1x8x16xbf16>, vector<1x8x16xbf16>, vector<1x8x16xbf16>, vector<1x8x16xbf16>, vector<1x8x16xbf16>, vector<1x8x16xbf16> -> vector<8x8x16xbf16>
    %200 = vector.shape_cast %177 : vector<8x128xf32> to vector<1x8x128xf32>
    %201 = arith.truncf %200 : vector<1x8x128xf32> to vector<1x8x128xbf16>
    %202 = vector.extract_strided_slice %201 {offsets = [0, 0, 0], sizes = [1, 8, 16], strides = [1, 1, 1]} : vector<1x8x128xbf16> to vector<1x8x16xbf16>
    %203 = vector.extract_strided_slice %201 {offsets = [0, 0, 16], sizes = [1, 8, 16], strides = [1, 1, 1]} : vector<1x8x128xbf16> to vector<1x8x16xbf16>
    %204 = vector.extract_strided_slice %201 {offsets = [0, 0, 32], sizes = [1, 8, 16], strides = [1, 1, 1]} : vector<1x8x128xbf16> to vector<1x8x16xbf16>
    %205 = vector.extract_strided_slice %201 {offsets = [0, 0, 48], sizes = [1, 8, 16], strides = [1, 1, 1]} : vector<1x8x128xbf16> to vector<1x8x16xbf16>
    %206 = vector.extract_strided_slice %201 {offsets = [0, 0, 64], sizes = [1, 8, 16], strides = [1, 1, 1]} : vector<1x8x128xbf16> to vector<1x8x16xbf16>
    %207 = vector.extract_strided_slice %201 {offsets = [0, 0, 80], sizes = [1, 8, 16], strides = [1, 1, 1]} : vector<1x8x128xbf16> to vector<1x8x16xbf16>
    %208 = vector.extract_strided_slice %201 {offsets = [0, 0, 96], sizes = [1, 8, 16], strides = [1, 1, 1]} : vector<1x8x128xbf16> to vector<1x8x16xbf16>
    %209 = vector.extract_strided_slice %201 {offsets = [0, 0, 112], sizes = [1, 8, 16], strides = [1, 1, 1]} : vector<1x8x128xbf16> to vector<1x8x16xbf16>
    %210 = tpu.concatenate %202, %203, %204, %205, %206, %207, %208, %209 in 0 : vector<1x8x16xbf16>, vector<1x8x16xbf16>, vector<1x8x16xbf16>, vector<1x8x16xbf16>, vector<1x8x16xbf16>, vector<1x8x16xbf16>, vector<1x8x16xbf16>, vector<1x8x16xbf16> -> vector<8x8x16xbf16>
    %cst_62 = arith.constant dense<0.000000e+00> : vector<8x8x8xf32>
    %211 = tpu.matmul %188, %199, %cst_62 {dimension_numbers = #tpu.dot_dimension_numbers<[2], [2], [1], [1], [0, 0, 0, 1, 1, 1], [0], [0]>} : vector<8x8x16xbf16>, vector<8x8x16xbf16>, vector<8x8x8xf32> -> vector<8x8x8xf32>
    %212 = vector.shape_cast %211 : vector<8x8x8xf32> to vector<8x1x8x8xf32>
    %cst_63 = arith.constant 2.500000e-01 : f32
    %213 = vector.broadcast %cst_63 : f32 to vector<8x1x8x8xf32>
    %214 = arith.mulf %212, %213 : vector<8x1x8x8xf32>
    %215 = vector.shape_cast %19 : vector<1x8x8xi1> to vector<1x1x8x8xi1>
    %cst_64 = arith.constant -1.000000e+30 : f32
    %216 = vector.shape_cast %215 : vector<1x1x8x8xi1> to vector<1x1x8x8xi1>
    %217 = vector.broadcast %216 : vector<1x1x8x8xi1> to vector<8x1x8x8xi1>
    %218 = vector.broadcast %cst_64 : f32 to vector<8x1x8x8xf32>
    %219 = arith.select %217, %218, %214 : vector<8x1x8x8xi1>, vector<8x1x8x8xf32>
    %cst_65 = arith.constant dense<0xFF800000> : vector<8x1x8xf32>
    %220 = vector.multi_reduction <maximumf>, %219, %cst_65 [3] : vector<8x1x8x8xf32> to vector<8x1x8xf32>
    %221 = vector.shape_cast %220 : vector<8x1x8xf32> to vector<8x1x8x1xf32>
    %222 = vector.broadcast %221 : vector<8x1x8x1xf32> to vector<8x1x8x8xf32>
    %223 = arith.subf %219, %222 : vector<8x1x8x8xf32>
    %224 = math.exp %223 : vector<8x1x8x8xf32>
    %cst_66 = arith.constant dense<0.000000e+00> : vector<8x1x8xf32>
    %225 = vector.multi_reduction <add>, %224, %cst_66 [3] : vector<8x1x8x8xf32> to vector<8x1x8xf32>
    %226 = vector.shape_cast %225 : vector<8x1x8xf32> to vector<8x1x8x1xf32>
    %227 = tpu.reciprocal %226 : vector<8x1x8x1xf32> -> vector<8x1x8x1xf32>
    %228 = vector.broadcast %227 : vector<8x1x8x1xf32> to vector<8x1x8x8xf32>
    %229 = arith.mulf %224, %228 : vector<8x1x8x8xf32>
    %230 = vector.shape_cast %229 : vector<8x1x8x8xf32> to vector<8x8x8xf32>
    %231 = arith.truncf %230 : vector<8x8x8xf32> to vector<8x8x8xbf16>
    %cst_67 = arith.constant dense<0.000000e+00> : vector<8x8x16xf32>
    %232 = tpu.matmul %231, %210, %cst_67 {dimension_numbers = #tpu.dot_dimension_numbers<[2], [1], [1], [2], [0, 0, 0, 1, 1, 2], [0], [0]>} : vector<8x8x8xbf16>, vector<8x8x16xbf16>, vector<8x8x16xf32> -> vector<8x8x16xf32>
    %233 = vector.shape_cast %232 : vector<8x8x16xf32> to vector<8x1x8x16xf32>
    %234 = vector.extract_strided_slice %233 {offsets = [0, 0, 0, 0], sizes = [1, 1, 8, 16], strides = [1, 1, 1, 1]} : vector<8x1x8x16xf32> to vector<1x1x8x16xf32>
    %235 = vector.shape_cast %234 : vector<1x1x8x16xf32> to vector<1x8x16xf32>
    %236 = vector.extract_strided_slice %233 {offsets = [1, 0, 0, 0], sizes = [1, 1, 8, 16], strides = [1, 1, 1, 1]} : vector<8x1x8x16xf32> to vector<1x1x8x16xf32>
    %237 = vector.shape_cast %236 : vector<1x1x8x16xf32> to vector<1x8x16xf32>
    %238 = vector.extract_strided_slice %233 {offsets = [2, 0, 0, 0], sizes = [1, 1, 8, 16], strides = [1, 1, 1, 1]} : vector<8x1x8x16xf32> to vector<1x1x8x16xf32>
    %239 = vector.shape_cast %238 : vector<1x1x8x16xf32> to vector<1x8x16xf32>
    %240 = vector.extract_strided_slice %233 {offsets = [3, 0, 0, 0], sizes = [1, 1, 8, 16], strides = [1, 1, 1, 1]} : vector<8x1x8x16xf32> to vector<1x1x8x16xf32>
    %241 = vector.shape_cast %240 : vector<1x1x8x16xf32> to vector<1x8x16xf32>
    %242 = vector.extract_strided_slice %233 {offsets = [4, 0, 0, 0], sizes = [1, 1, 8, 16], strides = [1, 1, 1, 1]} : vector<8x1x8x16xf32> to vector<1x1x8x16xf32>
    %243 = vector.shape_cast %242 : vector<1x1x8x16xf32> to vector<1x8x16xf32>
    %244 = vector.extract_strided_slice %233 {offsets = [5, 0, 0, 0], sizes = [1, 1, 8, 16], strides = [1, 1, 1, 1]} : vector<8x1x8x16xf32> to vector<1x1x8x16xf32>
    %245 = vector.shape_cast %244 : vector<1x1x8x16xf32> to vector<1x8x16xf32>
    %246 = vector.extract_strided_slice %233 {offsets = [6, 0, 0, 0], sizes = [1, 1, 8, 16], strides = [1, 1, 1, 1]} : vector<8x1x8x16xf32> to vector<1x1x8x16xf32>
    %247 = vector.shape_cast %246 : vector<1x1x8x16xf32> to vector<1x8x16xf32>
    %248 = vector.extract_strided_slice %233 {offsets = [7, 0, 0, 0], sizes = [1, 1, 8, 16], strides = [1, 1, 1, 1]} : vector<8x1x8x16xf32> to vector<1x1x8x16xf32>
    %249 = vector.shape_cast %248 : vector<1x1x8x16xf32> to vector<1x8x16xf32>
    %250 = tpu.concatenate %235, %237, %239, %241, %243, %245, %247, %249 in 2 : vector<1x8x16xf32>, vector<1x8x16xf32>, vector<1x8x16xf32>, vector<1x8x16xf32>, vector<1x8x16xf32>, vector<1x8x16xf32>, vector<1x8x16xf32>, vector<1x8x16xf32> -> vector<1x8x128xf32>
    %251 = vector.shape_cast %250 : vector<1x8x128xf32> to vector<8x128xf32>
    %252 = arith.truncf %251 : vector<8x128xf32> to vector<8x128xbf16>
    %c0_68 = arith.constant 0 : index
    %c0_69 = arith.constant 0 : index
    %253 = vector.load %arg19[%c0_68, %c0_69] : memref<128x128xbf16, #tpu.memory_space<vmem>>, vector<128x128xbf16>
    %cst_70 = arith.constant dense<0.000000e+00> : vector<8x128xf32>
    %254 = tpu.matmul %252, %253, %cst_70 {dimension_numbers = #tpu.dot_dimension_numbers<[1], [0], [0], [1], [0, 0, 1, 1], [], []>} : vector<8x128xbf16>, vector<128x128xbf16>, vector<8x128xf32> -> vector<8x128xf32>
    %255 = arith.addf %137, %254 : vector<8x128xf32>
    %c0_71 = arith.constant 0 : index
    %c0_72 = arith.constant 0 : index
    %256 = vector.load %arg20[%c0_71, %c0_72] : memref<1x128xf32, #tpu.memory_space<vmem>>, vector<1x128xf32>
    %257 = vector.broadcast %256 : vector<1x128xf32> to vector<8x128xf32>
    %258 = arith.addf %255, %257 : vector<8x128xf32>
    %c0_73 = arith.constant 0 : index
    %c0_74 = arith.constant 0 : index
    %259 = vector.load %arg21[%c0_73, %c0_74] : memref<1x128xf32, #tpu.memory_space<vmem>>, vector<1x128xf32>
    %c0_75 = arith.constant 0 : index
    %c0_76 = arith.constant 0 : index
    %260 = vector.load %arg22[%c0_75, %c0_76] : memref<1x128xf32, #tpu.memory_space<vmem>>, vector<1x128xf32>
    %cst_77 = arith.constant dense<0.000000e+00> : vector<8xf32>
    %261 = vector.multi_reduction <add>, %258, %cst_77 [1] : vector<8x128xf32> to vector<8xf32>
    %262 = vector.shape_cast %261 : vector<8xf32> to vector<8x1xf32>
    %cst_78 = arith.constant 1.280000e+02 : f32
    %263 = vector.broadcast %cst_78 : f32 to vector<8x1xf32>
    %264 = arith.divf %262, %263 : vector<8x1xf32>
    %265 = vector.broadcast %264 : vector<8x1xf32> to vector<8x128xf32>
    %266 = arith.subf %258, %265 : vector<8x128xf32>
    %267 = arith.mulf %266, %266 : vector<8x128xf32>
    %cst_79 = arith.constant dense<0.000000e+00> : vector<8xf32>
    %268 = vector.multi_reduction <add>, %267, %cst_79 [1] : vector<8x128xf32> to vector<8xf32>
    %269 = vector.shape_cast %268 : vector<8xf32> to vector<8x1xf32>
    %cst_80 = arith.constant 1.280000e+02 : f32
    %270 = vector.broadcast %cst_80 : f32 to vector<8x1xf32>
    %271 = arith.divf %269, %270 : vector<8x1xf32>
    %272 = vector.broadcast %264 : vector<8x1xf32> to vector<8x128xf32>
    %273 = arith.subf %258, %272 : vector<8x128xf32>
    %cst_81 = arith.constant 9.99999974E-6 : f32
    %274 = vector.broadcast %cst_81 : f32 to vector<8x1xf32>
    %275 = arith.addf %271, %274 : vector<8x1xf32>
    %276 = math.rsqrt %275 : vector<8x1xf32>
    %277 = vector.broadcast %276 : vector<8x1xf32> to vector<8x128xf32>
    %278 = arith.mulf %273, %277 : vector<8x128xf32>
    %279 = vector.broadcast %259 : vector<1x128xf32> to vector<8x128xf32>
    %280 = arith.mulf %278, %279 : vector<8x128xf32>
    %281 = vector.broadcast %260 : vector<1x128xf32> to vector<8x128xf32>
    %282 = arith.addf %280, %281 : vector<8x128xf32>
    %283 = arith.truncf %282 : vector<8x128xf32> to vector<8x128xbf16>
    %c0_82 = arith.constant 0 : index
    %c0_83 = arith.constant 0 : index
    %284 = vector.load %arg23[%c0_82, %c0_83] : memref<128x512xbf16, #tpu.memory_space<vmem>>, vector<128x512xbf16>
    %cst_84 = arith.constant dense<0.000000e+00> : vector<8x512xf32>
    %285 = tpu.matmul %283, %284, %cst_84 {dimension_numbers = #tpu.dot_dimension_numbers<[1], [0], [0], [1], [0, 0, 1, 1], [], []>} : vector<8x128xbf16>, vector<128x512xbf16>, vector<8x512xf32> -> vector<8x512xf32>
    %c0_85 = arith.constant 0 : index
    %c0_86 = arith.constant 0 : index
    %286 = vector.load %arg24[%c0_85, %c0_86] : memref<1x512xf32, #tpu.memory_space<vmem>>, vector<1x512xf32>
    %287 = vector.broadcast %286 : vector<1x512xf32> to vector<8x512xf32>
    %288 = arith.addf %285, %287 : vector<8x512xf32>
    %cst_87 = arith.constant 5.000000e-01 : f32
    %289 = vector.broadcast %cst_87 : f32 to vector<8x512xf32>
    %290 = arith.mulf %289, %288 : vector<8x512xf32>
    %cst_88 = arith.constant 0.707106769 : f32
    %291 = vector.broadcast %cst_88 : f32 to vector<8x512xf32>
    %292 = arith.mulf %288, %291 : vector<8x512xf32>
    %293 = math.erf %292 : vector<8x512xf32>
    %cst_89 = arith.constant 1.000000e+00 : f32
    %294 = vector.broadcast %cst_89 : f32 to vector<8x512xf32>
    %295 = arith.addf %294, %293 : vector<8x512xf32>
    %296 = arith.mulf %290, %295 : vector<8x512xf32>
    %297 = arith.truncf %296 : vector<8x512xf32> to vector<8x512xbf16>
    %c0_90 = arith.constant 0 : index
    %c0_91 = arith.constant 0 : index
    %298 = vector.load %arg25[%c0_90, %c0_91] : memref<512x128xbf16, #tpu.memory_space<vmem>>, vector<512x128xbf16>
    %cst_92 = arith.constant dense<0.000000e+00> : vector<8x128xf32>
    %299 = tpu.matmul %297, %298, %cst_92 {dimension_numbers = #tpu.dot_dimension_numbers<[1], [0], [0], [1], [0, 0, 1, 1], [], []>} : vector<8x512xbf16>, vector<512x128xbf16>, vector<8x128xf32> -> vector<8x128xf32>
    %300 = arith.addf %258, %299 : vector<8x128xf32>
    %c0_93 = arith.constant 0 : index
    %c0_94 = arith.constant 0 : index
    %301 = vector.load %arg26[%c0_93, %c0_94] : memref<1x128xf32, #tpu.memory_space<vmem>>, vector<1x128xf32>
    %302 = vector.broadcast %301 : vector<1x128xf32> to vector<8x128xf32>
    %303 = arith.addf %300, %302 : vector<8x128xf32>
    %304 = vector.shape_cast %303 : vector<8x128xf32> to vector<1x8x128xf32>
    %c0_95 = arith.constant 0 : index
    %c0_96 = arith.constant 0 : index
    %c0_97 = arith.constant 0 : index
    %305 = vector.load %arg27[%c0_95, %c0_96, %c0_97] : memref<1x8x128xf32, #tpu.memory_space<vmem>>, vector<1x8x128xf32>
    tpu.vector_store %arg27[%c0_95, %c0_96, %c0_97], %304 {strides = array<i32>} : memref<1x8x128xf32, #tpu.memory_space<vmem>>, vector<1x8x128xf32>,
    return
  }
  func.func @transform_0(%arg0: i32) -> (i32, i32, i32) {
    %c0_i32 = arith.constant 0 : i32
    %c0_i32_0 = arith.constant 0 : i32
    %c0_i32_1 = arith.constant 0 : i32
    return %arg0, %c0_i32, %c0_i32_0 : i32, i32, i32
  }
  func.func @transform_1(%arg0: i32) -> (i32, i32, i32) {
    %c0_i32 = arith.constant 0 : i32
    %c0_i32_0 = arith.constant 0 : i32
    %c0_i32_1 = arith.constant 0 : i32
    return %arg0, %c0_i32, %c0_i32_0 : i32, i32, i32
  }
  func.func @transform_2(%arg0: i32) -> (i32, i32, i32) {
    %c0_i32 = arith.constant 0 : i32
    %c0_i32_0 = arith.constant 0 : i32
    %c0_i32_1 = arith.constant 0 : i32
    %c0_i32_2 = arith.constant 0 : i32
    return %c0_i32, %c0_i32_0, %c0_i32_1 : i32, i32, i32
  }
  func.func @transform_3(%arg0: i32) -> (i32, i32, i32) {
    %c0_i32 = arith.constant 0 : i32
    %c0_i32_0 = arith.constant 0 : i32
    %c0_i32_1 = arith.constant 0 : i32
    return %arg0, %c0_i32, %c0_i32_0 : i32, i32, i32
  }
  func.func @transform_4(%arg0: i32) -> (i32, i32, i32) {
    %c0_i32 = arith.constant 0 : i32
    %c0_i32_0 = arith.constant 0 : i32
    %c0_i32_1 = arith.constant 0 : i32
    return %arg0, %c0_i32, %c0_i32_0 : i32, i32, i32
  }
  func.func @transform_5(%arg0: i32) -> (i32, i32, i32) {
    %c0_i32 = arith.constant 0 : i32
    %c0_i32_0 = arith.constant 0 : i32
    %c0_i32_1 = arith.constant 0 : i32
    return %arg0, %c0_i32, %c0_i32_0 : i32, i32, i32
  }
  func.func @transform_6(%arg0: i32) -> (i32, i32) {
    %c0_i32 = arith.constant 0 : i32
    %c0_i32_0 = arith.constant 0 : i32
    %c0_i32_1 = arith.constant 0 : i32
    return %c0_i32, %c0_i32_0 : i32, i32
  }
  func.func @transform_7(%arg0: i32) -> (i32, i32) {
    %c0_i32 = arith.constant 0 : i32
    %c0_i32_0 = arith.constant 0 : i32
    %c0_i32_1 = arith.constant 0 : i32
    return %c0_i32, %c0_i32_0 : i32, i32
  }
  func.func @transform_8(%arg0: i32) -> (i32, i32) {
    %c0_i32 = arith.constant 0 : i32
    %c0_i32_0 = arith.constant 0 : i32
    %c0_i32_1 = arith.constant 0 : i32
    return %c0_i32, %c0_i32_0 : i32, i32
  }
  func.func @transform_9(%arg0: i32) -> (i32, i32) {
    %c0_i32 = arith.constant 0 : i32
    %c0_i32_0 = arith.constant 0 : i32
    %c0_i32_1 = arith.constant 0 : i32
    return %c0_i32, %c0_i32_0 : i32, i32
  }
  func.func @transform_10(%arg0: i32) -> (i32, i32) {
    %c0_i32 = arith.constant 0 : i32
    %c0_i32_0 = arith.constant 0 : i32
    %c0_i32_1 = arith.constant 0 : i32
    return %c0_i32, %c0_i32_0 : i32, i32
  }
  func.func @transform_11(%arg0: i32) -> (i32, i32) {
    %c0_i32 = arith.constant 0 : i32
    %c0_i32_0 = arith.constant 0 : i32
    %c0_i32_1 = arith.constant 0 : i32
    return %c0_i32, %c0_i32_0 : i32, i32
  }
  func.func @transform_12(%arg0: i32) -> (i32, i32) {
    %c0_i32 = arith.constant 0 : i32
    %c0_i32_0 = arith.constant 0 : i32
    %c0_i32_1 = arith.constant 0 : i32
    return %c0_i32, %c0_i32_0 : i32, i32
  }
  func.func @transform_13(%arg0: i32) -> (i32, i32) {
    %c0_i32 = arith.constant 0 : i32
    %c0_i32_0 = arith.constant 0 : i32
    %c0_i32_1 = arith.constant 0 : i32
    return %c0_i32, %c0_i32_0 : i32, i32
  }
  func.func @transform_14(%arg0: i32) -> (i32, i32) {
    %c0_i32 = arith.constant 0 : i32
    %c0_i32_0 = arith.constant 0 : i32
    %c0_i32_1 = arith.constant 0 : i32
    return %c0_i32, %c0_i32_0 : i32, i32
  }
  func.func @transform_15(%arg0: i32) -> (i32, i32) {
    %c0_i32 = arith.constant 0 : i32
    %c0_i32_0 = arith.constant 0 : i32
    %c0_i32_1 = arith.constant 0 : i32
    return %c0_i32, %c0_i32_0 : i32, i32
  }
  func.func @transform_16(%arg0: i32) -> (i32, i32) {
    %c0_i32 = arith.constant 0 : i32
    %c0_i32_0 = arith.constant 0 : i32
    %c0_i32_1 = arith.constant 0 : i32
    return %c0_i32, %c0_i32_0 : i32, i32
  }
  func.func @transform_17(%arg0: i32) -> (i32, i32) {
    %c0_i32 = arith.constant 0 : i32
    %c0_i32_0 = arith.constant 0 : i32
    %c0_i32_1 = arith.constant 0 : i32
    return %c0_i32, %c0_i32_0 : i32, i32
  }
  func.func @transform_18(%arg0: i32) -> (i32, i32) {
    %c0_i32 = arith.constant 0 : i32
    %c0_i32_0 = arith.constant 0 : i32
    %c0_i32_1 = arith.constant 0 : i32
    return %c0_i32, %c0_i32_0 : i32, i32
  }
  func.func @transform_19(%arg0: i32) -> (i32, i32) {
    %c0_i32 = arith.constant 0 : i32
    %c0_i32_0 = arith.constant 0 : i32
    %c0_i32_1 = arith.constant 0 : i32
    return %c0_i32, %c0_i32_0 : i32, i32
  }
  func.func @transform_20(%arg0: i32) -> (i32, i32) {
    %c0_i32 = arith.constant 0 : i32
    %c0_i32_0 = arith.constant 0 : i32
    %c0_i32_1 = arith.constant 0 : i32
    return %c0_i32, %c0_i32_0 : i32, i32
  }
  func.func @transform_21(%arg0: i32) -> (i32, i32) {
    %c0_i32 = arith.constant 0 : i32
    %c0_i32_0 = arith.constant 0 : i32
    %c0_i32_1 = arith.constant 0 : i32
    return %c0_i32, %c0_i32_0 : i32, i32
  }
  func.func @transform_22(%arg0: i32) -> (i32, i32) {
    %c0_i32 = arith.constant 0 : i32
    %c0_i32_0 = arith.constant 0 : i32
    %c0_i32_1 = arith.constant 0 : i32
    return %c0_i32, %c0_i32_0 : i32, i32
  }
  func.func @transform_23(%arg0: i32) -> (i32, i32) {
    %c0_i32 = arith.constant 0 : i32
    %c0_i32_0 = arith.constant 0 : i32
    %c0_i32_1 = arith.constant 0 : i32
    return %c0_i32, %c0_i32_0 : i32, i32
  }
  func.func @transform_24(%arg0: i32) -> (i32, i32) {
    %c0_i32 = arith.constant 0 : i32
    %c0_i32_0 = arith.constant 0 : i32
    %c0_i32_1 = arith.constant 0 : i32
    return %c0_i32, %c0_i32_0 : i32, i32
  }
  func.func @transform_25(%arg0: i32) -> (i32, i32) {
    %c0_i32 = arith.constant 0 : i32
    %c0_i32_0 = arith.constant 0 : i32
    %c0_i32_1 = arith.constant 0 : i32
    return %c0_i32, %c0_i32_0 : i32, i32
  }
  func.func @transform_26(%arg0: i32) -> (i32, i32, i32) {
    %c0_i32 = arith.constant 0 : i32
    %c0_i32_0 = arith.constant 0 : i32
    %c0_i32_1 = arith.constant 0 : i32
    return %arg0, %c0_i32, %c0_i32_0 : i32, i32, i32
  }
}

</mosaic_0001>

<bundles_post_ra>
// kernel: tpu_custom_call.1
= control target key start
LH: loop header
LB: loop body
LE: loop exit
PB: predicated region body
PF: predicated region fallthrough
CT: control target
= control target key end

     0   :  { %s7625_s0 = inlined_call_operand.hbm [shape: f32[2,8,128], index: 0, kind: input, shape index: {}]   ;;  %s7626_s1 = inlined_call_operand.hbm [shape: f32[2,8,128], index: 1, kind: input, shape index: {}]   ;;  %s7627_s2 = inlined_call_operand.hbm [shape: bf16[8,8,8], index: 2, kind: input, shape index: {}]   ;;  %s7628_s3 = inlined_call_operand.vmem [shape: f32[2,8,1], index: 3, kind: input, shape index: {}]   ;;  %s7629_s4 = inlined_call_operand.vmem [shape: f32[2,1,8], index: 4, kind: input, shape index: {}]   ;;  %s7630_s5 = inlined_call_operand.hbm [shape: f32[2,1,8], index: 5, kind: input, shape index: {}]   ;;  %s7631_s6 = inlined_call_operand.vmem [shape: f32[1,128], index: 6, kind: input, shape index: {}]   ;;  %s7632_s7 = inlined_call_operand.hbm [shape: f32[1,128], index: 7, kind: input, shape index: {}]   ;;  %s7633_s8 = inlined_call_operand.hbm [shape: bf16[128,384], index: 8, kind: input, shape index: {}]   ;;  %s7634_s9 = inlined_call_operand.hbm [shape: f32[1,384], index: 9, kind: input, shape index: {}]   ;;  %s7635_s10 = inlined_call_operand.hbm [shape: bf16[128,128], index: 10, kind: input, shape index: {}]   ;;  %s7636_s11 = inlined_call_operand.hbm [shape: f32[1,128], index: 11, kind: input, shape index: {}]   ;;  %s7637_s12 = inlined_call_operand.hbm [shape: f32[1,128], index: 12, kind: input, shape index: {}]   ;;  %s7638_s13 = inlined_call_operand.hbm [shape: f32[1,128], index: 13, kind: input, shape index: {}]   ;;  %s7639_s14 = inlined_call_operand.vmem [shape: bf16[128,128], index: 14, kind: input, shape index: {}]   ;;  %s7640_s15 = inlined_call_operand.vmem [shape: f32[1,128], index: 15, kind: input, shape index: {}]   ;;  %s7641_s16 = inlined_call_operand.hbm [shape: bf16[128,256], index: 16, kind: input, shape index: {}]   ;;  %s7642_s17 = inlined_call_operand.vmem [shape: f32[1,256], index: 17, kind: input, shape index: {}]   ;;  %s7643_s18 = inlined_call_operand.hbm [shape: bf16[128,128], index: 18, kind: input, shape index: {}]   ;;  %s7644_s19 = inlined_call_operand.vmem [shape: f32[1,128], index: 19, kind: input, shape index: {}]   ;;  %s7645_s20 = inlined_call_operand.vmem [shape: f32[1,128], index: 20, kind: input, shape index: {}]   ;;  %s7646_s21 = inlined_call_operand.vmem [shape: f32[1,128], index: 21, kind: input, shape index: {}]   ;;  %s7647_s22 = inlined_call_operand.hbm [shape: bf16[128,512], index: 22, kind: input, shape index: {}]   ;;  %s7648_s23 = inlined_call_operand.vmem [shape: f32[1,512], index: 23, kind: input, shape index: {}]   ;;  %s7649_s24 = inlined_call_operand.hbm [shape: bf16[512,128], index: 24, kind: input, shape index: {}]   ;;  %s7650_s25 = inlined_call_operand.vmem [shape: f32[1,128], index: 25, kind: input, shape index: {}]   ;;  %s7651_s26 = inlined_call_operand.hbm [shape: f32[2,8,128], index: 26, kind: output, shape index: {}]  }
   0x1   :  { %7681 = sst [smem:[#allocation40_spill]] %s7625_s0 }
   0x2   :  { %7682 = sst [smem:[#allocation41_spill]] %s7626_s1 }
   0x3   :  { %7683 = sst [smem:[#allocation42_spill]] %s7627_s2 }
   0x4   :  { %7684 = sst [smem:[#allocation43_spill]] %s7628_s3 }
   0x5   :  { %7685 = sst [smem:[#allocation44_spill]] %s7629_s4 }
   0x6   :  { %7686 = sst [smem:[#allocation45_spill]] %s7630_s5 }
   0x7   :  { %7687 = sst [smem:[#allocation46_spill]] %s7631_s6 }
   0x8   :  { %7688 = sst [smem:[#allocation47_spill]] %s7632_s7 }
   0x9   :  { %7689 = sst [smem:[#allocation48_spill]] %s7633_s8 }
   0xa   :  { %7690 = sst [smem:[#allocation49_spill]] %s7634_s9 }
   0xb   :  { %7691 = sst [smem:[#allocation50_spill]] %s7635_s10 }
   0xc   :  { %7692 = sst [smem:[#allocation51_spill]] %s7636_s11 }
   0xd   :  { %7693 = sst [smem:[#allocation52_spill]] %s7637_s12 }
   0xe   :  { %7694 = sst [smem:[#allocation53_spill]] %s7638_s13 }
   0xf   :  { %7695 = sst [smem:[#allocation54_spill]] %s7639_s14 }
  0x10   :  { %7696 = sst [smem:[#allocation55_spill]] %s7640_s15 }
  0x11   :  { %7697 = sst [smem:[#allocation56_spill]] %s7641_s16 }
  0x12   :  { %7698 = sst [smem:[#allocation57_spill]] %s7642_s17 }
  0x13   :  { %7699 = sst [smem:[#allocation58_spill]] %s7643_s18 }
  0x14   :  { %7700 = sst [smem:[#allocation59_spill]] %s7644_s19 }
  0x15   :  { %7701 = sst [smem:[#allocation60_spill]] %s7645_s20 }
  0x16   :  { %7702 = sst [smem:[#allocation61_spill]] %s7646_s21 }
  0x17   :  { %7703 = sst [smem:[#allocation62_spill]] %s7647_s22 }
  0x18   :  { %7704 = sst [smem:[#allocation63_spill]] %s7648_s23 }
  0x19   :  { %7705 = sst [smem:[#allocation64_spill]] %s7650_s25 }
  0x1a   :  { %7706 = sst [smem:[#allocation65_spill]] %s7651_s26 }
  0x1b   :  { %31 = vsyncpa [#allocation3], 0 }
  0x1c   :  { %33 = vsyncpa [#allocation3 + $0x1], 0 }
  0x1d   :  { %34 = vsyncpa [#allocation6], 0 }
  0x1e   :  { %36 = vsyncpa [#allocation6 + $0x1], 0 }
  0x1f   :  { %37 = vsyncpa [#allocation9], 0 }
  0x20   :  { %39 = vsyncpa [#allocation9 + $0x1], 0 }
  0x21   :  { %40 = vsyncpa [#allocation12], 0 }
  0x22   :  { %41 = vsyncpa [#allocation15], 0 }
  0x23   :  { %42 = vsyncpa [#allocation18], 0 }
  0x24   :  { %43 = vsyncpa [#allocation21], 0 }
  0x25   :  { %44 = vsyncpa [#allocation24], 0 }
  0x26   :  { %45 = vsyncpa [#allocation4], 0 }
  0x27   :  { %47 = vsyncpa [#allocation4 + $0x1], 0  ;;  %s6546_s27 = smov 0   ;;  %s6548_s3 = smov 0  }
  0x28   :  { %s6550_s7 = smov 0   ;;  %s6552_s28 = smov 0  }
  0x29 LB: > { %s6377_s8 = smov [#allocation7]   ;;  %s6567_s29 = sadd.s32 4294967295, %s6375_s28   ;;  %s6375_s28 = sphi %s6552_s28, %s7780_s28   ;;  %s6371_s7 = sphi %s6550_s7, %s7779_s7   ;;  %s6367_s3 = sphi %s6548_s3, %s7778_s3   ;;  %s6363_s27 = sphi %s6546_s27, %s7777_s27  }
  0x2a   : > { %s667_s4 = sshll.u32 %s6377_s8, 4  ;;  %7707 = sst [smem:[#allocation38_spill]] %s6567_s29  ;;  %s6572_s4 = int_to_ptr.vmem [resolvable:$true] %s667_s4 }
  0x2b   : > { %p4764_p0 = scmp.ge.s32.totalorder %s6375_s28, 1  ;;  %p7672_p1 = scmp.eq.s32.totalorder %s6567_s29, 0 }
  0x2c   : > { %p655_p2 = scmp.lt.s32.totalorder %s6375_s28, 3  ;;  %s6378_s9 = smov [#allocation10]  }
  0x2d   : > { %s684_s30 = sshll.u32 %s6378_s9, 4  ;;  %s6379_s5 = smov [#allocation11]   ;;  %s6587_s30 = int_to_ptr.vmem [resolvable:$true] %s684_s30 }
  0x2e   : > { %p6574_p3 = pnand %p4764_p0, %p655_p2  ;;  %s694_s10 = sshll.u32 %s6379_s5, 4  ;;  %s6589_s10 = int_to_ptr.vmem [resolvable:$true] %s694_s10 }
  0x2f   : > { %s7711_s8 = sld [smem:[#allocation42_spill]] }
  0x30   : > { %s7708_s0 = scalar_select %p6574_p3, 1, 0 }
  0x31   : > { %p5467_p5 = pneg %p6574_p3 }
  0x32   : > { %7709 = sst [smem:[#allocation39_spill]] %s7708_s0 }
  0x33   : > { %p6583_p6 = pnand %p5467_p5, %p7672_p1 }
  0x35   : > { %s5847_s26 = scalar_lea.hbm %s7711_s8, 512  ;;  %p6599_p8 = pneg %p6583_p6 }
  0x36   : > { %p5848_p7 = scmp.ne.s32.totalorder %s7711_s8, %s5847_s26  ;;  %p5854_p11 = scmp.lt.u32.totalorder %s5847_s26, %s7711_s8 }
  0x38   : > { %p5850_p9 = pnand %p6599_p8, %p5848_p7 }
  0x3a   : > { %p5851_p10 = pneg %p5850_p9 }
  0x3c   : > { %p5856_p12 = pnand %p5854_p11, %p5851_p10 }
  0x3e   : > { %5859 = shalt.err (!%p5856_p12)
}
  0x3f   : > { %s5860_s23 = scalar_lea.vmem %s6572_s4, 512  ;;  %p5868_p5 = scmp.lt.s32.totalorder %s6572_s4, %s6572_s4 }
  0x40   : > { %p5861_p13 = scmp.ne.s32.totalorder %s6572_s4, %s5860_s23  ;;  %p5869_p4 = scmp.lt.s32.totalorder %s5860_s23, %s5860_s23 }
  0x42   : > { %p5863_p0 = pnand %p5861_p13, %p6599_p8  ;;  %p5870_p7 = por %p5869_p4, %p5868_p5 }
  0x44   : > { %p5864_p2 = pneg %p5863_p0 }
  0x46   : > { %p5871_p9 = pnand %p5870_p7, %p5864_p2 }
  0x48   : > { %5874 = shalt.err (!%p5871_p9)
}
  0x49   : > { %s7662_s25 = smov 64   ;;  %s7664_s21 = smov 4  }
  0x4a   : > { %5470 = dma.hbm_to_vmem [thread:$0]  (!%p6583_p6), %s7711_s8, 512, %s6572_s4, [#allocation6], %s7662_s25, %s7662_s25, %s7664_s21  }
  0x4b   : > { %s7713_s20 = sld [smem:[#allocation47_spill]] }
  0x51   : > { %s5875_s23 = scalar_lea.hbm %s7713_s20, 16 }
  0x52   : > { %p5876_p4 = scmp.ne.s32.totalorder %s7713_s20, %s5875_s23  ;;  %p5882_p12 = scmp.lt.u32.totalorder %s5875_s23, %s7713_s20 }
  0x54   : > { %p5878_p10 = pnand %p5876_p4, %p6599_p8 }
  0x56   : > { %p5879_p11 = pneg %p5878_p10 }
  0x58   : > { %p5884_p13 = pnand %p5882_p12, %p5879_p11 }
  0x5a   : > { %5887 = shalt.err (!%p5884_p13)
}
  0x5b   : > { %s5888_s4 = scalar_lea.vmem %s6587_s30, 16  ;;  %s5895_s15 = scalar_lea.vmem %s6587_s30, 32 }
  0x5c   : > { %p5889_p0 = scmp.ne.s32.totalorder %s6587_s30, %s5888_s4  ;;  %p5896_p7 = scmp.lt.s32.totalorder %s6587_s30, %s6587_s30 }
  0x5d   : > { %p5897_p9 = scmp.lt.s32.totalorder %s5895_s15, %s5888_s4 }
  0x5e   : > { %p5891_p2 = pnand %p5889_p0, %p6599_p8 }
  0x5f   : > { %p5898_p4 = por %p5897_p9, %p5896_p7 }
  0x60   : > { %p5892_p5 = pneg %p5891_p2 }
  0x62   : > { %p5899_p10 = pnand %p5898_p4, %p5892_p5 }
  0x64   : > { %5902 = shalt.err (!%p5899_p10)
}
  0x65   : > { %5473 = dma.hbm_to_vmem [thread:$0]  (!%p6583_p6), %s7713_s20, 16, %s6587_s30, [#allocation9]  }
  0x66   : > { %s7714_s6 = sld [smem:[#allocation48_spill]] }
  0x6c   : > { %s5903_s1 = scalar_lea.hbm %s7714_s6, 3072 }
  0x6d   : > { %p5904_p11 = scmp.ne.s32.totalorder %s7714_s6, %s5903_s1  ;;  %p5910_p0 = scmp.lt.u32.totalorder %s5903_s1, %s7714_s6 }
  0x6f   : > { %p5906_p12 = pnand %p5904_p11, %p6599_p8 }
  0x71   : > { %p5907_p13 = pneg %p5906_p12 }
  0x73   : > { %p5912_p2 = pnand %p5910_p0, %p5907_p13 }
  0x75   : > { %5915 = shalt.err (!%p5912_p2)
}
  0x76   : > { %s5916_s30 = scalar_lea.vmem %s6589_s10, 3072  ;;  %p5924_p4 = scmp.lt.s32.totalorder %s6589_s10, %s6589_s10 }
  0x77   : > { %p5917_p5 = scmp.ne.s32.totalorder %s6589_s10, %s5916_s30  ;;  %p5925_p10 = scmp.lt.s32.totalorder %s5916_s30, %s5916_s30 }
  0x79   : > { %p5919_p7 = pnand %p5917_p5, %p6599_p8  ;;  %p5926_p11 = por %p5925_p10, %p5924_p4 }
  0x7b   : > { %p5920_p9 = pneg %p5919_p7 }
  0x7d   : > { %p5927_p12 = pnand %p5926_p11, %p5920_p9 }
  0x7f   : > { %5930 = shalt.err (!%p5927_p12)
}
  0x80   : > { %s6382_s14 = smov 192   ;;  %s6383_s17 = smov 12  }
  0x81   : > { %5476 = dma.hbm_to_vmem [thread:$0]  (!%p6583_p6), %s7714_s6, 3072, %s6589_s10, [#allocation12], %s6382_s14, %s6382_s14, %s6383_s17  }
  0x82   : > { %s6384_s1 = smov [#allocation14]   ;;  %s6385_s23 = smov [#allocation17]  }
  0x83   : > { %s718_s5 = sshll.u32 %s6384_s1, 4  ;;  %s743_s4 = sshll.u32 %s6385_s23, 4  ;;  %s719_s5 = int_to_ptr.vmem [resolvable:$true] %s718_s5  ;;  %s744_s4 = int_to_ptr.vmem [resolvable:$true] %s743_s4 }
  0x84   : > { %s7715_s25 = sld [smem:[#allocation50_spill]] }
  0x8a   : > { %s5931_s21 = scalar_lea.hbm %s7715_s25, 1024 }
  0x8b   : > { %p5932_p13 = scmp.ne.s32.totalorder %s7715_s25, %s5931_s21  ;;  %p5938_p5 = scmp.lt.u32.totalorder %s5931_s21, %s7715_s25 }
  0x8d   : > { %p5934_p0 = pnand %p5932_p13, %p6599_p8 }
  0x8f   : > { %p5935_p2 = pneg %p5934_p0 }
  0x91   : > { %p5940_p7 = pnand %p5938_p5, %p5935_p2 }
  0x93   : > { %5943 = shalt.err (!%p5940_p7)
}
  0x94   : > { %s5944_s10 = scalar_lea.vmem %s719_s5, 1024  ;;  %p5952_p11 = scmp.lt.s32.totalorder %s719_s5, %s719_s5 }
  0x95   : > { %p5945_p9 = scmp.ne.s32.totalorder %s719_s5, %s5944_s10  ;;  %p5953_p12 = scmp.lt.s32.totalorder %s5944_s10, %s5944_s10 }
  0x97   : > { %p5947_p4 = pnand %p5945_p9, %p6599_p8  ;;  %p5954_p1 = por %p5953_p12, %p5952_p11 }
  0x99   : > { %p5948_p10 = pneg %p5947_p4 }
  0x9b   : > { %p5955_p3 = pnand %p5954_p1, %p5948_p10 }
  0x9d   : > { %5958 = shalt.err (!%p5955_p3)
}
  0x9e   : > { %s7716_s20 = smov 4   ;;  %s7717_s8 = smov 64  }
  0x9f   : > { %5482 = dma.hbm_to_vmem [thread:$0]  (!%p6583_p6), %s7715_s25, 1024, %s719_s5, [#allocation15], %s7717_s8, %s7717_s8, %s7716_s20  }
  0xa0   : > { %s7718_s12 = sld [smem:[#allocation52_spill]] }
  0xa6   : > { %s5959_s17 = scalar_lea.hbm %s7718_s12, 16 }
  0xa7   : > { %p5960_p1 = scmp.ne.s32.totalorder %s7718_s12, %s5959_s17  ;;  %p5966_p0 = scmp.lt.u32.totalorder %s5959_s17, %s7718_s12 }
  0xa9   : > { %p5962_p3 = pnand %p5960_p1, %p6599_p8 }
  0xab   : > { %p5963_p13 = pneg %p5962_p3 }
  0xad   : > { %p5968_p2 = pnand %p5966_p0, %p5963_p13 }
  0xaf   : > { %5971 = shalt.err (!%p5968_p2)
}
  0xb0   : > { %s5972_s15 = scalar_lea.vmem %s744_s4, 16  ;;  %s5979_s5 = scalar_lea.vmem %s744_s4, 32 }
  0xb1   : > { %p5973_p5 = scmp.ne.s32.totalorder %s744_s4, %s5972_s15  ;;  %p5980_p4 = scmp.lt.s32.totalorder %s744_s4, %s744_s4 }
  0xb2   : > { %p5981_p10 = scmp.lt.s32.totalorder %s5979_s5, %s5972_s15 }
  0xb3   : > { %p5975_p7 = pnand %p5973_p5, %p6599_p8 }
  0xb4   : > { %p5982_p11 = por %p5981_p10, %p5980_p4 }
  0xb5   : > { %p5976_p9 = pneg %p5975_p7 }
  0xb7   : > { %p5983_p12 = pnand %p5982_p11, %p5976_p9 }
  0xb9   : > { %5986 = shalt.err (!%p5983_p12)
}
  0xba   : > { %5488 = dma.hbm_to_vmem [thread:$0]  (!%p6583_p6), %s7718_s12, 16, %s744_s4, [#allocation18]  }
  0xbb   : > { %s6386_s29 = smov [#allocation20]   ;;  %s7719_s16 = sld [smem:[#allocation56_spill]] }
  0xbc   : > { %s770_s0 = sshll.u32 %s6386_s29, 4  ;;  %s771_s0 = int_to_ptr.vmem [resolvable:$true] %s770_s0 }
  0xc1   : > { %s5987_s17 = scalar_lea.hbm %s7719_s16, 2048 }
  0xc2   : > { %p5988_p1 = scmp.ne.s32.totalorder %s7719_s16, %s5987_s17  ;;  %p5994_p0 = scmp.lt.u32.totalorder %s5987_s17, %s7719_s16 }
  0xc4   : > { %p5990_p3 = pnand %p5988_p1, %p6599_p8 }
  0xc6   : > { %p5991_p13 = pneg %p5990_p3 }
  0xc8   : > { %p5996_p2 = pnand %p5994_p0, %p5991_p13 }
  0xca   : > { %5999 = shalt.err (!%p5996_p2)
}
  0xcb   : > { %s6000_s4 = scalar_lea.vmem %s771_s0, 2048  ;;  %p6008_p4 = scmp.lt.s32.totalorder %s771_s0, %s771_s0 }
  0xcc   : > { %p6001_p5 = scmp.ne.s32.totalorder %s771_s0, %s6000_s4  ;;  %p6009_p10 = scmp.lt.s32.totalorder %s6000_s4, %s6000_s4 }
  0xce   : > { %p6003_p7 = pnand %p6001_p5, %p6599_p8  ;;  %p6010_p11 = por %p6009_p10, %p6008_p4 }
  0xd0   : > { %p6004_p9 = pneg %p6003_p7 }
  0xd2   : > { %p6011_p12 = pnand %p6010_p11, %p6004_p9 }
  0xd4   : > { %6014 = shalt.err (!%p6011_p12)
}
  0xd5   : > { %s6387_s15 = smov 128   ;;  %s6388_s5 = smov 8  }
  0xd6   : > { %5494 = dma.hbm_to_vmem [thread:$0]  (!%p6583_p6), %s7719_s16, 2048, %s771_s0, [#allocation21], %s6387_s15, %s6387_s15, %s6388_s5  }
  0xd7   : > { %s6389_s29 = smov [#allocation23]   ;;  %s7720_s22 = sld [smem:[#allocation62_spill]] }
  0xd8   : > { %s808_s21 = sshll.u32 %s6389_s29, 4  ;;  %s809_s21 = int_to_ptr.vmem [resolvable:$true] %s808_s21 }
  0xdd   : > { %s6015_s19 = scalar_lea.hbm %s7720_s22, 4096 }
  0xde   : > { %p6016_p1 = scmp.ne.s32.totalorder %s7720_s22, %s6015_s19  ;;  %p6022_p0 = scmp.lt.u32.totalorder %s6015_s19, %s7720_s22 }
  0xe0   : > { %p6018_p3 = pnand %p6016_p1, %p6599_p8 }
  0xe2   : > { %p6019_p13 = pneg %p6018_p3 }
  0xe4   : > { %p6024_p2 = pnand %p6022_p0, %p6019_p13 }
  0xe6   : > { %6027 = shalt.err (!%p6024_p2)
}
  0xe7   : > { %s6028_s0 = scalar_lea.vmem %s809_s21, 4096  ;;  %p6036_p4 = scmp.lt.s32.totalorder %s809_s21, %s809_s21 }
  0xe8   : > { %p6029_p5 = scmp.ne.s32.totalorder %s809_s21, %s6028_s0  ;;  %p6037_p10 = scmp.lt.s32.totalorder %s6028_s0, %s6028_s0 }
  0xea   : > { %p6031_p7 = pnand %p6029_p5, %p6599_p8  ;;  %p6038_p11 = por %p6037_p10, %p6036_p4 }
  0xec   : > { %p6032_p9 = pneg %p6031_p7 }
  0xee   : > { %p6039_p12 = pnand %p6038_p11, %p6032_p9 }
  0xf0   : > { %6042 = shalt.err (!%p6039_p12)
}
  0xf1   : > { %s6390_s15 = smov 256   ;;  %s6391_s5 = smov 16  }
  0xf2   : > { %5500 = dma.hbm_to_vmem [thread:$0]  (!%p6583_p6), %s7720_s22, 4096, %s809_s21, [#allocation24], %s6390_s15, %s6390_s15, %s6391_s5  }
  0xf3   : > { %s6392_s29 = smov [#allocation13]   ;;  %s6393_s17 = smov [#allocation16]  }
  0xf4   : > { %s708_s14 = sshll.u32 %s6392_s29, 4  ;;  %s732_s19 = sshll.u32 %s6393_s17, 4  ;;  %s709_s14 = int_to_ptr.vmem [resolvable:$true] %s708_s14  ;;  %s733_s19 = int_to_ptr.vmem [resolvable:$true] %s732_s19 }
  0xf5   : > { %s7721_s23 = sld [smem:[#allocation49_spill]] }
  0xfb   : > { %s6043_s4 = scalar_lea.hbm %s7721_s23, 48 }
  0xfc   : > { %p6044_p1 = scmp.ne.s32.totalorder %s7721_s23, %s6043_s4  ;;  %p6050_p0 = scmp.lt.u32.totalorder %s6043_s4, %s7721_s23 }
  0xfe   : > { %p6046_p3 = pnand %p6044_p1, %p6599_p8 }
 0x100   : > { %p6047_p13 = pneg %p6046_p3 }
 0x102   : > { %p6052_p2 = pnand %p6050_p0, %p6047_p13 }
 0x104   : > { %6055 = shalt.err (!%p6052_p2)
}
 0x105   : > { %s6056_s21 = scalar_lea.vmem %s709_s14, 48  ;;  %s6063_s15 = scalar_lea.vmem %s709_s14, 64 }
 0x106   : > { %p6057_p5 = scmp.ne.s32.totalorder %s709_s14, %s6056_s21  ;;  %p6064_p4 = scmp.lt.s32.totalorder %s709_s14, %s709_s14 }
 0x107   : > { %p6065_p10 = scmp.lt.s32.totalorder %s6063_s15, %s6056_s21 }
 0x108   : > { %p6059_p7 = pnand %p6057_p5, %p6599_p8 }
 0x109   : > { %p6066_p11 = por %p6065_p10, %p6064_p4 }
 0x10a   : > { %p6060_p9 = pneg %p6059_p7 }
 0x10c   : > { %p6067_p12 = pnand %p6066_p11, %p6060_p9 }
 0x10e   : > { %6070 = shalt.err (!%p6067_p12)
}
 0x10f   : > { %5479 = dma.hbm_to_vmem [thread:$0]  (!%p6583_p6), %s7721_s23, 48, %s709_s14, [#allocation12]  }
 0x110   : > { %s7722_s11 = sld [smem:[#allocation51_spill]] }
 0x116   : > { %s6071_s30 = scalar_lea.hbm %s7722_s11, 16 }
 0x117   : > { %p6072_p1 = scmp.ne.s32.totalorder %s7722_s11, %s6071_s30  ;;  %p6078_p0 = scmp.lt.u32.totalorder %s6071_s30, %s7722_s11 }
 0x119   : > { %p6074_p3 = pnand %p6072_p1, %p6599_p8 }
 0x11b   : > { %p6075_p13 = pneg %p6074_p3 }
 0x11d   : > { %p6080_p2 = pnand %p6078_p0, %p6075_p13 }
 0x11f   : > { %6083 = shalt.err (!%p6080_p2)
}
 0x120   : > { %s6084_s1 = scalar_lea.vmem %s733_s19, 16  ;;  %s6091_s14 = scalar_lea.vmem %s733_s19, 32 }
 0x121   : > { %p6085_p5 = scmp.ne.s32.totalorder %s733_s19, %s6084_s1  ;;  %p6092_p4 = scmp.lt.s32.totalorder %s733_s19, %s733_s19 }
 0x122   : > { %p6093_p10 = scmp.lt.s32.totalorder %s6091_s14, %s6084_s1 }
 0x123   : > { %p6087_p7 = pnand %p6085_p5, %p6599_p8 }
 0x124   : > { %p6094_p11 = por %p6093_p10, %p6092_p4 }
 0x125   : > { %p6088_p9 = pneg %p6087_p7 }
 0x127   : > { %p6095_p12 = pnand %p6094_p11, %p6088_p9 }
 0x129   : > { %6098 = shalt.err (!%p6095_p12)
}
 0x12a   : > { %5485 = dma.hbm_to_vmem [thread:$0]  (!%p6583_p6), %s7722_s11, 16, %s733_s19, [#allocation15]  }
 0x12b   : > { %s6394_s21 = smov [#allocation19]   ;;  %s6395_s6 = smov [#allocation22]  }
 0x12c   : > { %s754_s15 = sshll.u32 %s6394_s21, 4  ;;  %s786_s5 = sshll.u32 %s6395_s6, 4  ;;  %s755_s15 = int_to_ptr.vmem [resolvable:$true] %s754_s15  ;;  %s787_s5 = int_to_ptr.vmem [resolvable:$true] %s786_s5 }
 0x12d   : > { %s7723_s13 = sld [smem:[#allocation53_spill]] }
 0x133   : > { %s6099_s30 = scalar_lea.hbm %s7723_s13, 16 }
 0x134   : > { %p6100_p1 = scmp.ne.s32.totalorder %s7723_s13, %s6099_s30  ;;  %p6106_p0 = scmp.lt.u32.totalorder %s6099_s30, %s7723_s13 }
 0x136   : > { %p6102_p3 = pnand %p6100_p1, %p6599_p8 }
 0x138   : > { %p6103_p13 = pneg %p6102_p3 }
 0x13a   : > { %p6108_p2 = pnand %p6106_p0, %p6103_p13 }
 0x13c   : > { %6111 = shalt.err (!%p6108_p2)
}
 0x13d   : > { %s6112_s19 = scalar_lea.vmem %s755_s15, 16  ;;  %s6119_s1 = scalar_lea.vmem %s755_s15, 32 }
 0x13e   : > { %p6113_p5 = scmp.ne.s32.totalorder %s755_s15, %s6112_s19  ;;  %p6120_p4 = scmp.lt.s32.totalorder %s755_s15, %s755_s15 }
 0x13f   : > { %p6121_p10 = scmp.lt.s32.totalorder %s6119_s1, %s6112_s19 }
 0x140   : > { %p6115_p7 = pnand %p6113_p5, %p6599_p8 }
 0x141   : > { %p6122_p11 = por %p6121_p10, %p6120_p4 }
 0x142   : > { %p6116_p9 = pneg %p6115_p7 }
 0x144   : > { %p6123_p12 = pnand %p6122_p11, %p6116_p9 }
 0x146   : > { %6126 = shalt.err (!%p6123_p12)
}
 0x147   : > { %5491 = dma.hbm_to_vmem [thread:$0]  (!%p6583_p6), %s7723_s13, 16, %s755_s15, [#allocation18]  }
 0x148   : > { %s7724_s18 = sld [smem:[#allocation58_spill]] }
 0x14e   : > { %s6127_s6 = scalar_lea.hbm %s7724_s18, 1024 }
 0x14f   : > { %p6128_p1 = scmp.ne.s32.totalorder %s7724_s18, %s6127_s6  ;;  %p6134_p0 = scmp.lt.u32.totalorder %s6127_s6, %s7724_s18 }
 0x151   : > { %p6130_p3 = pnand %p6128_p1, %p6599_p8 }
 0x153   : > { %p6131_p13 = pneg %p6130_p3 }
 0x155   : > { %p6136_p2 = pnand %p6134_p0, %p6131_p13 }
 0x157   : > { %6139 = shalt.err (!%p6136_p2)
}
 0x158   : > { %s6140_s29 = scalar_lea.vmem %s787_s5, 1024  ;;  %p6148_p4 = scmp.lt.s32.totalorder %s787_s5, %s787_s5 }
 0x159   : > { %p6141_p5 = scmp.ne.s32.totalorder %s787_s5, %s6140_s29  ;;  %p6149_p10 = scmp.lt.s32.totalorder %s6140_s29, %s6140_s29 }
 0x15b   : > { %p6143_p7 = pnand %p6141_p5, %p6599_p8  ;;  %p6150_p11 = por %p6149_p10, %p6148_p4 }
 0x15d   : > { %p6144_p9 = pneg %p6143_p7 }
 0x15f   : > { %p6151_p12 = pnand %p6150_p11, %p6144_p9 }
 0x161   : > { %6154 = shalt.err (!%p6151_p12)
}
 0x162   : > { %5497 = dma.hbm_to_vmem [thread:$0]  (!%p6583_p6), %s7724_s18, 1024, %s787_s5, [#allocation21], %s7717_s8, %s7717_s8, %s7716_s20  }
 0x163   : > { %s6396_s26 = smov [#allocation25]   ;;  %s6155_s4 = scalar_lea.hbm %s7649_s24, 4096 }
 0x164   : > { %s824_s19 = sshll.u32 %s6396_s26, 4  ;;  %p6156_p1 = scmp.ne.s32.totalorder %s7649_s24, %s6155_s4  ;;  %s825_s19 = int_to_ptr.vmem [resolvable:$true] %s824_s19 }
 0x165   : > { %p6162_p0 = scmp.lt.u32.totalorder %s6155_s4, %s7649_s24 }
 0x166   : > { %p6158_p3 = pnand %p6156_p1, %p6599_p8 }
 0x168   : > { %p6159_p13 = pneg %p6158_p3 }
 0x16a   : > { %p6164_p2 = pnand %p6162_p0, %p6159_p13 }
 0x16c   : > { %6167 = shalt.err (!%p6164_p2)
}
 0x16d   : > { %s6168_s5 = scalar_lea.vmem %s825_s19, 4096  ;;  %p6176_p4 = scmp.lt.s32.totalorder %s825_s19, %s825_s19 }
 0x16e   : > { %p6169_p5 = scmp.ne.s32.totalorder %s825_s19, %s6168_s5  ;;  %p6177_p10 = scmp.lt.s32.totalorder %s6168_s5, %s6168_s5 }
 0x170   : > { %p6171_p7 = pnand %p6169_p5, %p6599_p8  ;;  %p6178_p11 = por %p6177_p10, %p6176_p4 }
 0x172   : > { %p6172_p9 = pneg %p6171_p7 }
 0x174   : > { %p6179_p12 = pnand %p6178_p11, %p6172_p9 }
 0x176   : > { %6182 = shalt.err (!%p6179_p12)
}
 0x177   : > { %s7725_s9 = sld [smem:[#allocation38_spill]]  ;;  %s4763_s2 = sadd.s32 4294967294, %s6375_s28  }
 0x178   : > { %5503 = dma.hbm_to_vmem [thread:$0]  (!%p6583_p6), %s7649_s24, 4096, %s825_s19, [#allocation24], %s7717_s8, %s7717_s8, %s7716_s20  }
 0x179   : > { %s6843_s10 = sadd.s32 1, %s6375_s28   ;;  %s60_s15 = sadd.s32 1, %s6371_s7 }
 0x17a   : > { %s57_s29 = ssub.s32 %s6375_s28, %s6843_s10  ;;  %p67_p1 = scmp.ne.s32.totalorder %s6371_s7, %s6367_s3 }
 0x17b   : > { %p58_p8 = scmp.eq.s32.totalorder %s57_s29, 0  ;;  %p68_p3 = scmp.eq.s32.totalorder %s6375_s28, 0 }
 0x17c   : > { %p73_p13 = scmp.ne.s32.totalorder %s6367_s3, %s6363_s27  ;;  %p648_p7 = scmp.eq.s32.totalorder %s4763_s2, 1 }
 0x17d   : > { %s6854_s17 = scalar_select %p58_p8, %s6371_s7, %s60_s15  }
 0x17e   : > { %p6856_p0 = por %p68_p3, %p67_p1  ;;  %p7727_p2 = scmp.eq.s32.totalorder %s7725_s9, 0 }
 0x17f   : > { %p642_p5 = scmp.eq.s32.totalorder %s7725_s9, 1  ;;  %p5530_p9 = scmp.lt.s32.totalorder %s6375_s28, 2 }
 0x180   : > { %p6862_p6 = por %p7727_p2, %p73_p13  ;;  %s6869_s8 = sand.u32 1, %s6371_s7  }
 0x181   : > { %p6871_p4 = por %p642_p5, %p67_p1  ;;  %p6875_p10 = por %p648_p7, %p73_p13 }
 0x182   : > { %s7728_s20 = scalar_select %p6862_p6, 1, 0 }
 0x183   : > { %s7729_s19 = scalar_select %p6871_p4, 1, 0 }
 0x184   : > { %s7730_s1 = scalar_select %p6875_p10, 1, 0 }
 0x185   : > { %s7675_s14 = sshll.u32 %s6869_s8, 3  ;;  %s4779_s4 = sshll.u32 %s6375_s28, 7 }
 0x186   : > { %s7731_s6 = sld [smem:[#allocation40_spill]]  ;;  %s845_s5 = scalar_lea.vmem [#allocation2], %s7675_s14 }
 0x187   : > { %s852_s16 = sshll.u32 %s845_s5, 4  ;;  %p6892_p11 = pnand %p5530_p9, %p6856_p0  ;;  %s6888_s16 = int_to_ptr.vmem [resolvable:$true] %s852_s16 }
 0x188   : > { %s7733_s29 = sld [smem:[#allocation41_spill]]  ;;  %s842_s21 = scalar_lea.sflag [#allocation3], %s6869_s8 }
 0x189   : > { %s7732_s30 = scalar_select %p6892_p11, 1, 0 }
 0x18a   : > { %p6907_p8 = pneg %p6892_p11 }
 0x18c   : > { %s6884_s12 = scalar_lea.hbm %s7731_s6, %s4779_s4  ;;  %s6188_s9 = scalar_lea.hbm %s7731_s6, 256 }
 0x18d   : > { %s6183_s11 = scalar_lea.hbm %s6884_s12, 128  ;;  %p6189_p13 = scmp.lt.u32.totalorder %s6884_s12, %s7731_s6 }
 0x18e   : > { %s6899_s15 = scalar_lea.hbm %s7733_s29, %s4779_s4  ;;  %p6184_p12 = scmp.ne.s32.totalorder %s6884_s12, %s6183_s11 }
 0x18f   : > { %p6190_p0 = scmp.lt.u32.totalorder %s6188_s9, %s6183_s11  ;;  %p6192_p5 = scmp.lt.u32.totalorder %s6183_s11, %s6884_s12 }
 0x190   : > { %p6186_p1 = pnand %p6907_p8, %p6184_p12 }
 0x191   : > { %p6191_p2 = por %p6190_p0, %p6189_p13 }
 0x192   : > { %p6187_p3 = pneg %p6186_p1 }
 0x193   : > { %p6193_p7 = por %p6192_p5, %p6191_p2 }
 0x195   : > { %p6194_p9 = pnand %p6193_p7, %p6187_p3 }
 0x197   : > { %6197 = shalt.err (!%p6194_p9)
}
 0x198   : > { %s6198_s0 = scalar_lea.vmem %s6888_s16, 128  ;;  %s6397_s14 = smov [#allocation2]  }
 0x199   : > { %p6199_p12 = scmp.ne.s32.totalorder %s6888_s16, %s6198_s0  ;;  %s6203_s26 = sshll.u32 %s6397_s14, 4  ;;  %s6204_s26 = int_to_ptr.vmem [resolvable:$false] %s6203_s26 }
 0x19a   : > { %s6205_s2 = scalar_lea.vmem %s6204_s26, 256  ;;  %p6206_p4 = scmp.lt.s32.totalorder %s6888_s16, %s6204_s26 }
 0x19b   : > { %p6201_p1 = pnand %p6199_p12, %p6907_p8  ;;  %p6207_p6 = scmp.lt.s32.totalorder %s6205_s2, %s6198_s0 }
 0x19d   : > { %p6202_p10 = pneg %p6201_p1  ;;  %p6208_p13 = por %p6207_p6, %p6206_p4 }
 0x19f   : > { %p6209_p0 = pnand %p6208_p13, %p6202_p10 }
 0x1a1   : > { %6212 = shalt.err (!%p6209_p0)
}
 0x1a2   : > { %5507 = dma.hbm_to_vmem [thread:$0]  (!%p6892_p11), %s6884_s12, 128, %s6888_s16, %s842_s21  }
 0x1a3   : > { %s7735_s11 = sshll.u32 %s6869_s8, 3  ;;  %s7736_s0 = sand.u32 1, %s6375_s28  }
 0x1a4   : > { %s863_s9 = scalar_lea.vmem [#allocation5], %s7735_s11  ;;  %s860_s14 = scalar_lea.sflag [#allocation6], %s7736_s0 }
 0x1a5   : > { %s870_s4 = sshll.u32 %s863_s9, 4  ;;  %s6213_s26 = scalar_lea.hbm %s6899_s15, 128  ;;  %s871_s4 = int_to_ptr.vmem [resolvable:$true] %s870_s4 }
 0x1a6   : > { %p6214_p6 = scmp.ne.s32.totalorder %s6899_s15, %s6213_s26  ;;  %s6218_s13 = scalar_lea.hbm %s7733_s29, 256 }
 0x1a7   : > { %p6219_p3 = scmp.lt.u32.totalorder %s6899_s15, %s7733_s29  ;;  %p6220_p2 = scmp.lt.u32.totalorder %s6218_s13, %s6213_s26 }
 0x1a8   : > { %p6216_p4 = pnand %p6214_p6, %p6907_p8  ;;  %p6222_p7 = scmp.lt.u32.totalorder %s6213_s26, %s6899_s15 }
 0x1a9   : > { %p6221_p5 = por %p6220_p2, %p6219_p3 }
 0x1aa   : > { %p6217_p10 = pneg %p6216_p4 }
 0x1ab   : > { %p6223_p9 = por %p6222_p7, %p6221_p5 }
 0x1ad   : > { %p6224_p12 = pnand %p6223_p9, %p6217_p10 }
 0x1af   : > { %6227 = shalt.err (!%p6224_p12)
}
 0x1b0   : > { %s6228_s12 = scalar_lea.vmem %s871_s4, 128  ;;  %s6398_s16 = smov [#allocation5]  }
 0x1b1   : > { %p6229_p1 = scmp.ne.s32.totalorder %s871_s4, %s6228_s12  ;;  %s6233_s21 = sshll.u32 %s6398_s16, 4  ;;  %s6234_s21 = int_to_ptr.vmem [resolvable:$false] %s6233_s21 }
 0x1b2   : > { %s6235_s6 = scalar_lea.vmem %s6234_s21, 256  ;;  %p6236_p6 = scmp.lt.s32.totalorder %s871_s4, %s6234_s21 }
 0x1b3   : > { %p6231_p13 = pnand %p6229_p1, %p6907_p8  ;;  %p6237_p4 = scmp.lt.s32.totalorder %s6235_s6, %s6228_s12 }
 0x1b5   : > { %p6232_p0 = pneg %p6231_p13  ;;  %p6238_p11 = por %p6237_p4, %p6236_p6 }
 0x1b7   : > { %p6239_p2 = pnand %p6238_p11, %p6232_p0 }
 0x1b9   : > { %6242 = shalt.err (!%p6239_p2)
}
 0x1ba   : > { %p7737_p3 = scmp.ne.s32.totalorder %s7732_s30, 0  ;;  %s4782_s13 = sshll.u32 %s6375_s28, 4 }
 0x1bb   : > { %s7738_s11 = sld [smem:[#allocation45_spill]]  ;;  %s893_s0 = scalar_lea.vmem [#allocation8], %s6869_s8 }
 0x1bc   : > { %5510 = dma.hbm_to_vmem [thread:$0]  (!%p7737_p3), %s6899_s15, 128, %s871_s4, %s860_s14  }
 0x1bd   : > { %s900_s26 = sshll.u32 %s893_s0, 4  ;;  %s7739_s2 = sand.u32 1, %s6375_s28   ;;  %s901_s26 = int_to_ptr.vmem [resolvable:$true] %s900_s26 }
 0x1be   : > { %s891_s12 = scalar_lea.sflag [#allocation9], %s7739_s2 }
 0x1c1   : > { %s6955_s9 = scalar_lea.hbm %s7738_s11, %s4782_s13  ;;  %s6248_s14 = scalar_lea.hbm %s7738_s11, 32 }
 0x1c2   : > { %s6243_s16 = scalar_lea.hbm %s6955_s9, 16  ;;  %p6249_p7 = scmp.lt.u32.totalorder %s6955_s9, %s7738_s11 }
 0x1c3   : > { %p6244_p11 = scmp.ne.s32.totalorder %s6955_s9, %s6243_s16  ;;  %p6250_p9 = scmp.lt.u32.totalorder %s6248_s14, %s6243_s16 }
 0x1c4   : > { %p6252_p1 = scmp.lt.u32.totalorder %s6243_s16, %s6955_s9 }
 0x1c5   : > { %p6246_p10 = pnand %p6244_p11, %p6907_p8  ;;  %p6251_p12 = por %p6250_p9, %p6249_p7 }
 0x1c7   : > { %p6247_p5 = pneg %p6246_p10  ;;  %p6253_p13 = por %p6252_p1, %p6251_p12 }
 0x1c9   : > { %p6254_p0 = pnand %p6253_p13, %p6247_p5 }
 0x1cb   : > { %6257 = shalt.err (!%p6254_p0)
}
 0x1cc   : > { %s6258_s8 = scalar_lea.vmem %s901_s26, 16  ;;  %s6399_s13 = smov [#allocation8]  }
 0x1cd   : > { %p6259_p6 = scmp.ne.s32.totalorder %s901_s26, %s6258_s8  ;;  %s6263_s18 = sshll.u32 %s6399_s13, 4  ;;  %s6264_s18 = int_to_ptr.vmem [resolvable:$false] %s6263_s18 }
 0x1ce   : > { %s6265_s22 = scalar_lea.vmem %s6264_s18, 32  ;;  %p6266_p11 = scmp.lt.s32.totalorder %s901_s26, %s6264_s18 }
 0x1cf   : > { %p6261_p4 = pnand %p6259_p6, %p6907_p8  ;;  %p6267_p10 = scmp.lt.s32.totalorder %s6265_s22, %s6258_s8 }
 0x1d1   : > { %p6262_p2 = pneg %p6261_p4  ;;  %p6268_p3 = por %p6267_p10, %p6266_p11 }
 0x1d3   : > { %p6269_p7 = pnand %p6268_p3, %p6262_p2 }
 0x1d5   : > { %6272 = shalt.err (!%p6269_p7)
}
 0x1d6   : > { %p7740_p9 = scmp.ne.s32.totalorder %s7732_s30, 0  ;;  %s7741_s0 = sld [smem:[#allocation39_spill]] }
 0x1d8   : > { %5513 = dma.hbm_to_vmem [thread:$0]  (!%p7740_p9), %s6955_s9, 16, %s901_s26, %s891_s12  }
 0x1dc   : > { %p7742_p5 = scmp.ne.s32.totalorder %s7741_s0, 0 }
 0x1dd   : > { %s6980_s5 = sand.u32 (!%p7742_p5), 1, %s6367_s3   ;;  %p7743_p8 = scmp.ne.s32.totalorder (!%p7742_p5), %s7728_s20, 0 }
 0x1de   : > { %909 = sbr.rel (%p7742_p5) target bundleno = 4914 (0x1332), region = 124  ;;  %s6983_s2 = sshll.u32 (!%p7742_p5), %s6980_s5, 3 }
 0x1df   : > { %s912_s16 = scalar_lea.sflag (!%p7742_p5), [#allocation3], %s6980_s5  ;;  %s915_s15 = scalar_lea.vmem (!%p7742_p5), [#allocation2], %s6983_s2 }
 0x1e5   : > { %6318 = dma.done.wait (%p7743_p8), %s912_s16, 128  }
 0x1e6   : > { %6320 = vsyncadd (%p7743_p8), %s912_s16, 4294967168  ;;  %s7744_s30 = sld [smem:[#allocation38_spill]]  ;;  %s924_s12 = scalar_lea.vmem [#allocation5], %s6983_s2 }
 0x1ec   : > { %s920_s9 = sand.u32 1, %s7744_s30  }
 0x1ed   : > { %s921_s26 = scalar_lea.sflag [#allocation6], %s920_s9 }
 0x1ee   : > { %6322 = dma.done.wait (%p7743_p8), %s921_s26, 128  }
 0x1ef   : > { %6324 = vsyncadd (%p7743_p8), %s921_s26, 4294967168  ;;  %p7745_p3 = scmp.eq.s32.totalorder %s7744_s30, 0 }
 0x1f1   : > { %6326 = dma.done.wait (%p7745_p3), [#allocation6], 512   ;;  %p7746_p12 = pmov %p7745_p3 }
 0x1f2   : > { %s934_s4 = scalar_lea.sflag [#allocation9], %s920_s9 }
 0x1f3   : > { %6328 = vsyncadd (%p7746_p12), [#allocation6], 4294966784 }
 0x1f4   : > { %6330 = dma.done.wait (%p7743_p8), %s934_s4, 16  }
 0x1f5   : > { %6332 = vsyncadd (%p7743_p8), %s934_s4, 4294967280  ;;  %p7747_p1 = pmov %p7745_p3 }
 0x1f7   : > { %6334 = dma.done.wait (%p7747_p1), [#allocation9], 16   ;;  %p7748_p13 = pmov %p7747_p1 }
 0x1f8   : > { %p7749_p0 = pmov %p7747_p1 }
 0x1f9   : > { %6336 = vsyncadd (%p7748_p13), [#allocation9], 4294967280 }
 0x1fa   : > { %6338 = dma.done.wait (%p7749_p0), [#allocation12], 3120   ;;  %p7750_p6 = pmov %p7749_p0 }
 0x1fb   : > { %p7751_p4 = pmov %p7749_p0 }
 0x1fc   : > { %6340 = vsyncadd (%p7750_p6), [#allocation12], 4294964176 }
 0x1fd   : > { %6342 = dma.done.wait (%p7751_p4), [#allocation15], 1040   ;;  %p7752_p2 = pmov %p7749_p0 }
 0x1fe   : > { %p7753_p11 = pmov %p7749_p0 }
 0x1ff   : > { %6344 = vsyncadd (%p7752_p2), [#allocation15], 4294966256 }
 0x200   : > { %6346 = dma.done.wait (%p7753_p11), [#allocation18], 32   ;;  %p7754_p10 = pmov %p7749_p0 }
 0x201   : > { %p7755_p7 = pmov %p7749_p0 }
 0x202   : > { %6348 = vsyncadd (%p7754_p10), [#allocation18], 4294967264 }
 0x203   : > { %6350 = dma.done.wait (%p7755_p7), [#allocation21], 3072   ;;  %p7756_p9 = pmov %p7749_p0 }
 0x204   : > { %p7757_p5 = pmov %p7749_p0 }
 0x205   : > { %6352 = vsyncadd (%p7756_p9), [#allocation21], 4294964224 }
 0x206   : > { %6354 = dma.done.wait (%p7757_p5), [#allocation24], 8192   ;;  %p7758_p8 = pmov %p7749_p0 }
 0x207   : > { %v1073_v0 = vld [vmem:[%s915_s15] sm:$0xff]  ;;  %v6400_v3 = vmov 0.0   ;;  %v5620_v15 = vld [vmem:[#allocation11 + $0x4c] ss:$12 sps:$4 sm:$0xff]   ;;  %v6401_v25 = vmov 0   ;;  %vm6402_vm0 = vmmov 0   ;;  %v1077_v41 = vlaneseq }
 0x208   : > { %6356 = vsyncadd (%p7758_p8), [#allocation24], 4294959104  ;;  %1106 = vadd.xlane.f32.xlu0 %v1073_v0  ;;  %v5608_v1 = vld [vmem:[#allocation11 + $0x4] ss:$12 sps:$4 sm:$0xff]   ;;  %v5610_v2 = vld [vmem:[#allocation11] ss:$12 sps:$4 sm:$0xff]   ;;  %5139 = vmatprep.subr.bf16.mxu1 %v6400_v3 }
 0x209   : > { %v5611_v4 = vld [vmem:[#allocation11 + $0x8] ss:$12 sps:$4 sm:$0xff]   ;;  %v5614_v6 = vld [vmem:[#allocation11 + $0x18] ss:$12 sps:$4 sm:$0xff]   ;;  %1310 = vmatprep.subr.bf16.mxu0 %v5608_v1  ;;  %v5615_v7 = vld [vmem:[#allocation11 + $0x20] ss:$12 sps:$4 sm:$0xff]   ;;  %1342 = vmatprep.mubr.bf16.mxu0 %v6401_v25 }
 0x20a   : > { %v5612_v5 = vld [vmem:[#allocation11 + $0x1c] ss:$12 sps:$4 sm:$0xff]   ;;  %v5616_v8 = vld [vmem:[#allocation11 + $0x34] ss:$12 sps:$4 sm:$0xff]   ;;  %1311 = vmatpush1.bf16.msra.mxu0 %v5610_v2  ;;  %5140 = vmatpush3.bf16.msra.mxu1 %v5611_v4  ;;  %v5619_v14 = vld [vmem:[#allocation11 + $0x38] ss:$12 sps:$4 sm:$0xff]  }
 0x20b   : > { %1312 = vmatprep.subr.bf16.mxu0 %v5612_v5  ;;  %5141 = vmatprep.subr.bf16.mxu1 %v6400_v3  ;;  %v5618_v13 = vld [vmem:[#allocation11 + $0x30] ss:$12 sps:$4 sm:$0xff]   ;;  %v5622_v16 = vld [vmem:[#allocation11 + $0x48] ss:$12 sps:$4 sm:$0xff]   ;;  %v5626_v19 = vld [vmem:[#allocation11 + $0x60] ss:$12 sps:$4 sm:$0xff]  }
 0x20c   : > { %v5623_v17 = vld [vmem:[#allocation11 + $0x50] ss:$12 sps:$4 sm:$0xff]   ;;  %v5627_v20 = vld [vmem:[#allocation11 + $0x68] ss:$12 sps:$4 sm:$0xff]   ;;  %v5630_v22 = vld [vmem:[#allocation11 + $0x78] ss:$12 sps:$4 sm:$0xff]   ;;  %5155 = vmatprep.mubr.msk.bf16.mxu1 %vm6402_vm0, %v6400_v3  ;;  %5606 = vset.pattern.permute.xlu1 %v6401_v25 }
 0x20d   : > { %v5624_v18 = vld [vmem:[#allocation11 + $0x64] ss:$12 sps:$4 sm:$0xff]   ;;  %v5628_v21 = vld [vmem:[#allocation11 + $0x7c] ss:$12 sps:$4 sm:$0xff]   ;;  %v5631_v23 = vld [vmem:[#allocation11 + $0x80] ss:$12 sps:$4 sm:$0xff]   ;;  %5607 = vset.pattern.permute.xlu0 %v6401_v25 }
 0x20e   : > { %1313 = vmatpush1.bf16.msra.mxu0 %v5614_v6  ;;  %5142 = vmatpush3.bf16.msra.mxu1 %v5615_v7  ;;  %v5632_v24 = vld [vmem:[#allocation11 + $0x94] ss:$12 sps:$4 sm:$0xff]   ;;  %v5634_v26 = vld [vmem:[#allocation11 + $0x90] ss:$12 sps:$4 sm:$0xff]   ;;  %v5635_v27 = vld [vmem:[#allocation11 + $0x98] ss:$12 sps:$4 sm:$0xff]  }
 0x20f   : > { %1314 = vmatprep.subr.bf16.mxu0 %v5616_v8  ;;  %5143 = vmatprep.subr.bf16.mxu1 %v6400_v3  ;;  %v5636_v28 = vld [vmem:[#allocation11 + $0xac] ss:$12 sps:$4 sm:$0xff]   ;;  %v5638_v29 = vld [vmem:[#allocation11 + $0xa8] ss:$12 sps:$4 sm:$0xff]   ;;  %v5639_v30 = vld [vmem:[#allocation11 + $0xb0] ss:$12 sps:$4 sm:$0xff]  }
 0x210   : > { %s7759_s6 = sld [smem:[#allocation46_spill]]  ;;  %v4803_v37 = vld [vmem:[#allocation10] ss:$0 sm:$0xff]  ;;  %v7055_v42 = vshrl.u32 %v1077_v41, 7  ;;  %v1165_v44 = vld [vmem:[#allocation13] sm:$0x7] }
 0x211   : > { %vm1455_vm1 = vcmask 130048   ;;  %s6403_s8 = smov 96   ;;  %s6404_s13 = smov 112   ;;  %vm1950_vm2 = vcmask 1043456   ;;  %vm1850_vm6 = vcmask 64512   ;;  %vm2345_vm7 = vcmask 261120  }
 0x212   : > { %1315 = vmatpush1.bf16.msra.mxu0 %v5618_v13  ;;  %5144 = vmatpush3.bf16.msra.mxu1 %v5619_v14  ;;  %v7058_v43 = vsub.s32 1, %v7055_v42  ;;  %v7061_v45 = vsub.s32 0, %v7055_v42  ;;  %s6405_s18 = smov 32   ;;  %s6406_s22 = smov 16   ;;  %v1177_v61 = vsub.s32 2, %v7055_v42  ;;  %vm2347_vm8 = vcmask 392192  }
 0x213   : > { %5145 = vmatprep.subr.bf16.mxu1 %v6400_v3  ;;  %1316 = vmatprep.subr.bf16.mxu0 %v5620_v15  ;;  %s6407_s0 = smov 80   ;;  %s6408_s16 = smov 64   ;;  %vm2349_vm9 = vcmask 523264   ;;  %vm2351_vm10 = vcmask 654336   ;;  %vm2353_vm11 = vcmask 785408   ;;  %vm2355_vm12 = vcmask 916480  }
 0x214   : > { %v1174_v46 = vrot.slane %v1165_v44, %v7058_v43  ;;  %v1170_v47 = vrot.slane %v1165_v44, %v7061_v45  ;;  %p1065_p3 = scmp.lt.s32.totalorder %s7744_s30, 1  ;;  %s6409_s9 = smov 48   ;;  %v1178_v62 = vrot.slane %v1165_v44, %v1177_v61 }
 0x215   : > { %s7761_s20 = sld [smem:[#allocation44_spill]]  ;;  %p7774_p1 = scmp.ne.s32.totalorder %s7729_s19, 0 }
 0x216   : > { %1317 = vmatpush1.bf16.msra.mxu0 %v5622_v16  ;;  %5146 = vmatpush3.bf16.msra.mxu1 %v5623_v17  ;;  %v4802_v35 = vld [vmem:[%s7759_s6] ss:$0 sm:$0xff]  ;;  %s7083_s26 = scalar_select %p1065_p3, %s7744_s30, 1 }
 0x217   : > { %5147 = vmatprep.subr.bf16.mxu1 %v6400_v3  ;;  %1318 = vmatprep.subr.bf16.mxu0 %v5624_v18  ;;  %s7760_s6 = sld [smem:[#allocation43_spill]] }
 0x218   : > { %s4799_s4 = sshll.u32 %s7083_s26, 3 }
 0x21a   : > { %1319 = vmatpush1.bf16.msra.mxu0 %v5626_v19  ;;  %5148 = vmatpush3.bf16.msra.mxu1 %v5627_v20 }
 0x21b   : > { %1320 = vmatprep.subr.bf16.mxu0 %v5628_v21  ;;  %5149 = vmatprep.subr.bf16.mxu1 %v6400_v3  ;;  %s1071_s21 = scalar_lea.vmem %s7761_s20, %s7083_s26  ;;  %s7770_s20 = sld [smem:[#allocation61_spill]] }
 0x21c   : > { %s7771_s26 = sld [smem:[#allocation63_spill]] }
 0x21d   : > { %s1068_s14 = scalar_lea.vmem %s7760_s6, %s4799_s4  ;;  %s7766_s6 = sld [smem:[#allocation55_spill]] }
 0x21e   : > { %1321 = vmatpush1.bf16.msra.mxu0 %v5630_v22  ;;  %5150 = vmatpush3.bf16.msra.mxu1 %v5631_v23  ;;  %v1074_v63 = vld [vmem:[%s1068_s14] sm:$0xff]  ;;  %s7764_s14 = sld [smem:[#allocation54_spill]] }
 0x21f   : > { %1322 = vmatprep.subr.bf16.mxu0 %v5632_v24  ;;  %5151 = vmatprep.subr.bf16.mxu1 %v6400_v3 }
 0x222   : > { %1323 = vmatpush1.bf16.msra.mxu0 %v5634_v26  ;;  %5152 = vmatpush3.bf16.msra.mxu1 %v5635_v27 }
 0x223   : > { %1324 = vmatprep.subr.bf16.mxu0 %v5636_v28  ;;  %5153 = vmatprep.subr.bf16.mxu1 %v6400_v3 }
 0x226   : > { %1325 = vmatpush1.bf16.msra.mxu0 %v5638_v29  ;;  %5154 = vmatpush3.bf16.msra.mxu1 %v5639_v30  ;;  %v4800_v29 = vld [vmem:[%s1071_s21] ss:$0 sm:$0xff]  ;;  %v1080_v30 = vand.u32 127, %v1077_v41  ;;  %s7765_s21 = sld [smem:[#allocation57_spill]] }
 0x227   : > { %5159 = vmatprep.subr.bf16.mxu1 %v6400_v3  ;;  %5183 = vmatprep.subr.bf16.mxu0 %v6400_v3 }
 0x228   : > { %vm1081_vm3 = vcmp.gt.s32.totalorder %v1080_v30, %v7055_v42 }
 0x295   : > { %v1107_v9 = vpop.xlane.xlu0 %1106 }
 0x296   : > { %v1109_v10 = vmul.f32 0.0078125, %v1107_v9 }
 0x298   : > { %v1110_v11 = vsub.f32 %v1073_v0, %v1109_v10 }
 0x29a   : > { %v1111_v12 = vmul.f32 %v1110_v11, %v1110_v11 }
 0x29c   : > { %1112 = vadd.xlane.f32.xlu0 %v1111_v12 }
 0x329   : > { %v1113_v31 = vpop.xlane.xlu0 %1112 }
 0x32a   : > { %v1114_v32 = vmul.f32 0.0078125, %v1113_v31 }
 0x32c   : > { %v1115_v33 = vadd.f32 1e-05, %v1114_v32  ;;  %v4977_v32 = vld [vmem:[#allocation7] sm:$0xff]  }
 0x32e   : > { %5768 = vrsqrt.f32 %v1115_v33  ;;  %v4978_v33 = vunpack.c.l.bf16 %v4977_v32 }
 0x338   : > { %v5769_v34 = vpop.eup %5768 }
 0x339   : > { %v1117_v36 = vmul.f32 %v5769_v34, %v1110_v11 }
 0x33b   : > { %v1124_v38 = vmul.f32 %v4802_v35, %v1117_v36 }
 0x33d   : > { %v1131_v39 = vadd.f32 %v4803_v37, %v1124_v38 }
 0x33f   : > { %v1132_v40 = vpack.c.bf16 %v1131_v39, %v1131_v39 }
 0x341   : > { %1343 = vmatmul.mubr.bf16.vlgmr.msra.gmra.mrb[0].mxu0 %v1132_v40  ;;  %5156 = vmatmul.mubr.bf16.vlgmr.msra.gmra.mrb[0].mxu1 %v1132_v40 }
 0x342   : > { %5161 = vmatprep.mubr.msk.bf16.mxu1 %vm6402_vm0, %v6400_v3  ;;  %5185 = vmatprep.mubr.msk.bf16.mxu0 %vm6402_vm0, %v6400_v3 }
 0x414   : > { %v1344_v48 = vpop.f32.mrb[0].mxu0  ;;  %v1385_v49 = vpop.f32.mrb[0].mxu1 }
 0x415   : > { %v1346_v50 = vpop.f32.mrb[1].mxu0  ;;  %v5157_v51 = vpop.f32.mrb[1].mxu1  ;;  %v1345_v57 = vadd.f32 %v1344_v48, %v1170_v47  ;;  %v1386_v0 = vadd.f32 %v1385_v49, %v1178_v62 }
 0x416   : > { %v1347_v52 = vadd.f32 %v1346_v50, %v1174_v46  ;;  %v1348_v53 = vpop.f32.mrb[2].mxu0  ;;  %v1388_v54 = vpop.f32.mrb[2].mxu1  ;;  %v4979_v46 = vunpack.c.h.bf16 %v4977_v32 }
 0x417   : > { %v1349_v55 = vpop.f32.mrb[3].mxu0  ;;  %v5158_v56 = vpop.f32.mrb[3].mxu1  ;;  %v1407_v60 = vpack.c.bf16 %v1345_v57, %v1345_v57  ;;  %v7095_v1 = vpack.c.bf16 %v1386_v0, %v1386_v0  ;;  %v4992_v53 = vld [vmem:[#allocation7 + $0x8] sm:$0xff]  }
 0x418   : > { %v1423_v58 = vpack.c.bf16 %v1347_v52, %v1347_v52  ;;  %v4982_v56 = vunpack.c.l.bf16 %v4992_v53 }
 0x419   : > { %v1952_v23 = vsel %vm1950_vm2, %v7095_v1, 0 }
 0x41a   : > { %1427 = vrot.lane.b32.xlu0 %v1423_v58, %s6403_s8  ;;  %1425 = vrot.lane.b32.xlu1 %v1423_v58, %s6404_s13  ;;  %v1460_v59 = vsel %vm1455_vm1, %v1423_v58, 0 }
 0x41b   : > { %5160 = vmatpush3.bf16.xpose.msra.mxu1 %v1460_v59 }
 0x41c   : > { %5165 = vmatprep.subr.bf16.mxu1 %v6400_v3 }
 0x41e   : > { %1435 = vrot.lane.b32.xlu0 %v1423_v58, %s6405_s18  ;;  %1409 = vrot.lane.b32.xlu1 %v1407_v60, %s6404_s13 }
 0x422   : > { %1437 = vrot.lane.b32.xlu0 %v1423_v58, %s6406_s22  ;;  %1411 = vrot.lane.b32.xlu1 %v1407_v60, %s6403_s8 }
 0x423   : > { %5162 = vmatmul.mubr.msk.bf16.vlgmr.msra.gmra.mrb[4].mxu1 %vm1455_vm1, %v1407_v60 }
 0x424   : > { %5167 = vmatprep.mubr.msk.bf16.mxu1 %vm6402_vm0, %v6400_v3 }
 0x426   : > { %1421 = vrot.lane.b32.xlu0 %v1407_v60, %s6406_s22  ;;  %1413 = vrot.lane.b32.xlu1 %v1407_v60, %s6407_s0 }
 0x42a   : > { %1429 = vrot.lane.b32.xlu1 %v1423_v58, %s6407_s0 }
 0x42e   : > { %1431 = vrot.lane.b32.xlu1 %v1423_v58, %s6408_s16 }
 0x432   : > { %1433 = vrot.lane.b32.xlu1 %v1423_v58, %s6409_s9 }
 0x436   : > { %1415 = vrot.lane.b32.xlu1 %v1407_v60, %s6408_s16 }
 0x43a   : > { %1417 = vrot.lane.b32.xlu1 %v1407_v60, %s6409_s9 }
 0x43e   : > { %1419 = vrot.lane.b32.xlu1 %v1407_v60, %s6405_s18 }
 0x442   : > { %1084 = vperm.xlu1 %5606, %v1074_v63  }
 0x446   : > { %1441 = vrot.lane.b32.xlu1 %v7095_v1, %s6404_s13 }
 0x48c   : > { %v1426_v2 = vpop.permute.xlu1 %1425  ;;  %v1428_v6 = vpop.permute.xlu0 %1427 }
 0x48d   : > { %v1506_v4 = vsel %vm1455_vm1, %v1426_v2, 0  ;;  %v1552_v8 = vsel %vm1455_vm1, %v1428_v6, 0  ;;  %v4993_v6 = vld [vmem:[#allocation7 + $0x10] sm:$0xff]  }
 0x48e   : > { %5166 = vmatpush3.bf16.xpose.msra.mxu1 %v1506_v4  ;;  %v4983_v4 = vunpack.c.h.bf16 %v4992_v53 }
 0x48f   : > { %5171 = vmatprep.subr.bf16.mxu1 %v6400_v3 }
 0x490   : > { %v1410_v5 = vpop.permute.xlu1 %1409  ;;  %v1436_v14 = vpop.permute.xlu0 %1435 }
 0x491   : > { %v1736_v18 = vsel %vm1455_vm1, %v1436_v14, 0 }
 0x494   : > { %v1412_v7 = vpop.permute.xlu1 %1411  ;;  %v1438_v19 = vpop.permute.xlu0 %1437 }
 0x495   : > { %5168 = vmatmul.mubr.msk.bf16.vlgmr.msra.gmra.mrb[8].mxu1 %vm1455_vm1, %v1410_v5  ;;  %v1782_v21 = vsel %vm1455_vm1, %v1438_v19, 0 }
 0x496   : > { %5172 = vmatpush3.bf16.xpose.msra.mxu1 %v1552_v8  ;;  %5173 = vmatprep.mubr.msk.bf16.mxu1 %vm6402_vm0, %v6400_v3 }
 0x497   : > { %5177 = vmatprep.subr.bf16.mxu1 %v6400_v3 }
 0x498   : > { %v1414_v9 = vpop.permute.xlu1 %1413  ;;  %v1422_v24 = vpop.permute.xlu0 %1421 }
 0x49c   : > { %v1430_v10 = vpop.permute.xlu1 %1429 }
 0x49d   : > { %v1598_v11 = vsel %vm1455_vm1, %v1430_v10, 0  ;;  %5174 = vmatmul.mubr.msk.bf16.vlgmr.msra.gmra.mrb[12].mxu1 %vm1455_vm1, %v1412_v7 }
 0x49e   : > { %5178 = vmatpush3.bf16.xpose.msra.mxu1 %v1598_v11  ;;  %5179 = vmatprep.mubr.msk.bf16.mxu1 %vm6402_vm0, %v6400_v3 }
 0x49f   : > { %5189 = vmatprep.subr.bf16.mxu1 %v6400_v3 }
 0x4a0   : > { %v1432_v12 = vpop.permute.xlu1 %1431 }
 0x4a1   : > { %v1644_v13 = vsel %vm1455_vm1, %v1432_v12, 0  ;;  %v4986_v12 = vunpack.c.l.bf16 %v4993_v6 }
 0x4a2   : > { %5184 = vmatpush3.bf16.xpose.msra.mxu0 %v1644_v13 }
 0x4a3   : > { %5195 = vmatprep.subr.bf16.mxu0 %v6400_v3 }
 0x4a4   : > { %v1434_v15 = vpop.permute.xlu1 %1433 }
 0x4a5   : > { %v1690_v16 = vsel %vm1455_vm1, %v1434_v15, 0  ;;  %5180 = vmatmul.mubr.msk.bf16.vlgmr.msra.gmra.mrb[16].mxu1 %vm1455_vm1, %v1414_v9 }
 0x4a6   : > { %5190 = vmatpush3.bf16.xpose.msra.mxu1 %v1690_v16  ;;  %5191 = vmatprep.mubr.msk.bf16.mxu1 %vm6402_vm0, %v6400_v3 }
 0x4a7   : > { %5201 = vmatprep.subr.bf16.mxu1 %v6400_v3 }
 0x4a8   : > { %v1416_v17 = vpop.permute.xlu1 %1415 }
 0x4a9   : > { %5186 = vmatmul.mubr.msk.bf16.vlgmr.msra.gmra.mrb[4].mxu0 %vm1455_vm1, %v1416_v17 }
 0x4aa   : > { %5196 = vmatpush3.bf16.xpose.msra.mxu0 %v1736_v18  ;;  %5197 = vmatprep.mubr.msk.bf16.mxu0 %vm6402_vm0, %v6400_v3 }
 0x4ab   : > { %5207 = vmatprep.subr.bf16.mxu0 %v6400_v3 }
 0x4ac   : > { %v1418_v20 = vpop.permute.xlu1 %1417 }
 0x4ad   : > { %5192 = vmatmul.mubr.msk.bf16.vlgmr.msra.gmra.mrb[20].mxu1 %vm1455_vm1, %v1418_v20 }
 0x4ae   : > { %5202 = vmatpush3.bf16.xpose.msra.mxu1 %v1782_v21  ;;  %5203 = vmatprep.mubr.msk.bf16.mxu1 %vm6402_vm0, %v6400_v3  ;;  %v4987_v21 = vunpack.c.h.bf16 %v4993_v6 }
 0x4af   : > { %5213 = vmatprep.subr.bf16.mxu1 %v6400_v3 }
 0x4b0   : > { %v1420_v22 = vpop.permute.xlu1 %1419 }
 0x4b1   : > { %5198 = vmatmul.mubr.msk.bf16.vlgmr.msra.gmra.mrb[8].mxu0 %vm1455_vm1, %v1420_v22 }
 0x4b2   : > { %5208 = vmatpush3.bf16.msra.mxu0 %v1952_v23  ;;  %5209 = vmatprep.mubr.msk.bf16.mxu0 %vm6402_vm0, %v6400_v3  ;;  %v4994_v23 = vld [vmem:[#allocation7 + $0x18] sm:$0xff]  }
 0x4b3   : > { %5219 = vmatprep.subr.bf16.mxu0 %v6400_v3 }
 0x4b5   : > { %5204 = vmatmul.mubr.msk.bf16.vlgmr.msra.gmra.mrb[24].mxu1 %vm1455_vm1, %v1422_v24 }
 0x4b6   : > { %5215 = vmatprep.mubr.msk.bf16.mxu1 %vm6402_vm0, %v6400_v3 }
 0x4c1   : > { %v7137_v26 = vpop.permute.xlu1 %1084 }
 0x4c2   : > { %v1093_v31 = vmul.f32 %v4800_v29, %v7137_v26 }
 0x4c4   : > { %vm1094_vm4 = vcmp.lt.f32.partialorder %v1093_v31, 0.5 }
 0x4c5   : > { %v1442_v27 = vpop.permute.xlu1 %1441  ;;  %vm7148_vm5 = vmor %vm1081_vm3, %vm1094_vm4 }
 0x4c6   : > { %v1998_v28 = vsel %vm1950_vm2, %v1442_v27, 0 }
 0x4c7   : > { %5214 = vmatpush3.bf16.msra.mxu1 %v1998_v28 }
 0x4c8   : > { %5225 = vmatprep.subr.bf16.mxu1 %v6400_v3 }
 0x4f6   : > { %v1496_v34 = vpop.f32.mrb[4].mxu1 }
 0x4f7   : > { %v1824_v35 = vmul.f32 0.25, %v1496_v34  ;;  %v5163_v36 = vpop.f32.mrb[5].mxu1 }
 0x4f8   : > { %v1499_v38 = vpop.f32.mrb[6].mxu1 }
 0x4f9   : > { %v1832_v39 = vadd.f32 %v4978_v33, %v1824_v35  ;;  %v5164_v40 = vpop.f32.mrb[7].mxu1  ;;  %v4990_v33 = vunpack.c.l.bf16 %v4994_v23 }
 0x4fb   : > { %v7154_v41 = vsel %vm7148_vm5, -1e+30, %v1832_v39 }
 0x4fc   : > { %v1851_v44 = vsel %vm1850_vm6, %v7154_v41, -inf }
 0x4fd   : > { %1852 = vmax.xlane.f32.xlu0 %v1851_v44 }
 0x568   : > { %v1542_v47 = vpop.f32.mrb[8].mxu1 }
 0x569   : > { %v1825_v48 = vmul.f32 0.25, %v1542_v47  ;;  %v5169_v49 = vpop.f32.mrb[9].mxu1  ;;  %v4991_v47 = vunpack.c.h.bf16 %v4994_v23 }
 0x56a   : > { %v1545_v50 = vpop.f32.mrb[10].mxu1 }
 0x56b   : > { %v1833_v51 = vadd.f32 %v4979_v46, %v1825_v48  ;;  %v5170_v52 = vpop.f32.mrb[11].mxu1 }
 0x56d   : > { %v7160_v54 = vsel %vm7148_vm5, -1e+30, %v1833_v51 }
 0x56e   : > { %v1854_v55 = vsel %vm1850_vm6, %v7160_v54, -inf }
 0x56f   : > { %1855 = vmax.xlane.f32.xlu1 %v1854_v55 }
 0x570   : > { %v1588_v57 = vpop.f32.mrb[12].mxu1 }
 0x571   : > { %v1826_v58 = vmul.f32 0.25, %v1588_v57  ;;  %v5175_v59 = vpop.f32.mrb[13].mxu1 }
 0x572   : > { %v1591_v60 = vpop.f32.mrb[14].mxu1 }
 0x573   : > { %v1834_v62 = vadd.f32 %v4982_v56, %v1826_v58  ;;  %v5176_v63 = vpop.f32.mrb[15].mxu1 }
 0x575   : > { %v7166_v0 = vsel %vm7148_vm5, -1e+30, %v1834_v62 }
 0x576   : > { %v1857_v2 = vsel %vm1850_vm6, %v7166_v0, -inf }
 0x577   : > { %1858 = vmax.xlane.f32.xlu0 %v1857_v2 }
 0x578   : > { %v1634_v5 = vpop.f32.mrb[16].mxu1 }
 0x579   : > { %v1827_v7 = vmul.f32 0.25, %v1634_v5  ;;  %v5181_v8 = vpop.f32.mrb[17].mxu1 }
 0x57a   : > { %v1637_v9 = vpop.f32.mrb[18].mxu1 }
 0x57b   : > { %v1835_v10 = vadd.f32 %v4983_v4, %v1827_v7  ;;  %v5182_v11 = vpop.f32.mrb[19].mxu1 }
 0x57c   : > { %v1680_v13 = vpop.f32.mrb[4].mxu0 }
 0x57d   : > { %v1828_v14 = vmul.f32 0.25, %v1680_v13  ;;  %v5187_v15 = vpop.f32.mrb[5].mxu0  ;;  %v1845_v16 = vsel %vm7148_vm5, -1e+30, %v1835_v10 }
 0x57e   : > { %v1683_v17 = vpop.f32.mrb[6].mxu0  ;;  %v1860_v18 = vsel %vm1850_vm6, %v1845_v16, -inf }
 0x57f   : > { %v1836_v19 = vadd.f32 %v4986_v12, %v1828_v14  ;;  %v5188_v20 = vpop.f32.mrb[7].mxu0  ;;  %1861 = vmax.xlane.f32.xlu0 %v1860_v18 }
 0x580   : > { %v1726_v22 = vpop.f32.mrb[20].mxu1 }
 0x581   : > { %v1829_v24 = vmul.f32 0.25, %v1726_v22  ;;  %v5193_v27 = vpop.f32.mrb[21].mxu1  ;;  %v1846_v28 = vsel %vm7148_vm5, -1e+30, %v1836_v19 }
 0x582   : > { %v1729_v29 = vpop.f32.mrb[22].mxu1  ;;  %v1863_v30 = vsel %vm1850_vm6, %v1846_v28, -inf }
 0x583   : > { %v1837_v31 = vadd.f32 %v4987_v21, %v1829_v24  ;;  %1864 = vmax.xlane.f32.xlu1 %v1863_v30  ;;  %v5194_v32 = vpop.f32.mrb[23].mxu1 }
 0x584   : > { %v1772_v34 = vpop.f32.mrb[8].mxu0 }
 0x585   : > { %v1830_v35 = vmul.f32 0.25, %v1772_v34  ;;  %v5199_v36 = vpop.f32.mrb[9].mxu0  ;;  %v1847_v38 = vsel %vm7148_vm5, -1e+30, %v1837_v31 }
 0x586   : > { %v1775_v39 = vpop.f32.mrb[10].mxu0  ;;  %v1866_v40 = vsel %vm1850_vm6, %v1847_v38, -inf }
 0x587   : > { %v1838_v44 = vadd.f32 %v4990_v33, %v1830_v35  ;;  %v5200_v46 = vpop.f32.mrb[11].mxu0  ;;  %1867 = vmax.xlane.f32.xlu0 %v1866_v40 }
 0x588   : > { %v1818_v48 = vpop.f32.mrb[24].mxu1 }
 0x589   : > { %v1831_v49 = vmul.f32 0.25, %v1818_v48  ;;  %v5205_v50 = vpop.f32.mrb[25].mxu1  ;;  %v1848_v51 = vsel %vm7148_vm5, -1e+30, %v1838_v44 }
 0x58a   : > { %v1821_v52 = vpop.f32.mrb[26].mxu1  ;;  %v1869_v53 = vsel %vm1850_vm6, %v1848_v51, -inf  ;;  %v1853_v59 = vpop.xlane.xlu0 %1852 }
 0x58b   : > { %v1839_v55 = vadd.f32 %v4991_v47, %v1831_v49  ;;  %1870 = vmax.xlane.f32.xlu1 %v1869_v53  ;;  %v5206_v56 = vpop.f32.mrb[27].mxu1  ;;  %v1875_v60 = vsub.f32 %v7154_v41, %v1853_v59 }
 0x58d   : > { %v1849_v57 = vsel %vm7148_vm5, -1e+30, %v1839_v55  ;;  %v1883_v62 = vmul.f32 1.442695, %v1875_v60 }
 0x58e   : > { %v1872_v58 = vsel %vm1850_vm6, %v1849_v57, -inf }
 0x58f   : > { %1873 = vmax.xlane.f32.xlu0 %v1872_v58  ;;  %5770 = vpow2.f32 %v1883_v62 }
 0x599   : > { %v5771_v63 = vpop.eup %5770 }
 0x59a   : > { %v1899_v2 = vsel %vm1850_vm6, %v5771_v63, 0.0 }
 0x59c   : > { %1445 = vrot.lane.b32.xlu1 %v7095_v1, %s6407_s0 }
 0x5a5   : > { %1443 = vrot.lane.b32.xlu0 %v7095_v1, %s6403_s8 }
 0x5c0   : > { %1900 = vadd.xlane.f32.xlu1 %v1899_v2 }
 0x5fc   : > { %v1856_v37 = vpop.xlane.xlu1 %1855 }
 0x5fd   : > { %v1876_v4 = vsub.f32 %v7160_v54, %v1856_v37 }
 0x5ff   : > { %v1885_v5 = vmul.f32 1.442695, %v1876_v4 }
 0x601   : > { %5772 = vpow2.f32 %v1885_v5 }
 0x604   : > { %v1859_v6 = vpop.xlane.xlu0 %1858 }
 0x605   : > { %v1877_v41 = vsub.f32 %v7166_v0, %v1859_v6 }
 0x607   : > { %v1887_v14 = vmul.f32 1.442695, %v1877_v41 }
 0x60b   : > { %v7192_v7 = vpop.eup %5772 }
 0x60c   : > { %v1862_v8 = vpop.xlane.xlu0 %1861  ;;  %v1902_v9 = vsel %vm1850_vm6, %v7192_v7, 0.0 }
 0x60d   : > { %v1878_v10 = vsub.f32 %v1845_v16, %v1862_v8  ;;  %1903 = vadd.xlane.f32.xlu0 %v1902_v9 }
 0x60f   : > { %v1889_v11 = vmul.f32 1.442695, %v1878_v10 }
 0x610   : > { %v1865_v12 = vpop.xlane.xlu1 %1864 }
 0x611   : > { %5774 = vpow2.f32 %v1889_v11  ;;  %v1879_v13 = vsub.f32 %v1846_v28, %v1865_v12 }
 0x613   : > { %v1891_v15 = vmul.f32 1.442695, %v1879_v13 }
 0x614   : > { %v1868_v20 = vpop.xlane.xlu0 %1867 }
 0x615   : > { %5776 = vpow2.f32 %v1891_v15  ;;  %v1880_v21 = vsub.f32 %v1847_v38, %v1868_v20 }
 0x616   : > { %5778 = vpow2.f32 %v1887_v14 }
 0x617   : > { %v1893_v23 = vmul.f32 1.442695, %v1880_v21 }
 0x618   : > { %v1871_v27 = vpop.xlane.xlu1 %1870 }
 0x619   : > { %5780 = vpow2.f32 %v1893_v23  ;;  %v1881_v28 = vsub.f32 %v1848_v51, %v1871_v27 }
 0x61b   : > { %v5775_v54 = vpop.eup %5774  ;;  %v1895_v30 = vmul.f32 1.442695, %v1881_v28 }
 0x61c   : > { %v1908_v17 = vsel %vm1850_vm6, %v5775_v54, 0.0  ;;  %v1874_v22 = vpop.xlane.xlu0 %1873  ;;  %v1446_v31 = vpop.permute.xlu1 %1445 }
 0x61d   : > { %1909 = vadd.xlane.f32.xlu0 %v1908_v17  ;;  %v1882_v24 = vsub.f32 %v1849_v57, %v1874_v22  ;;  %v2090_v53 = vsel %vm1950_vm2, %v1446_v31, 0 }
 0x61f   : > { %v7198_v18 = vpop.eup %5776  ;;  %v1897_v29 = vmul.f32 1.442695, %v1882_v24 }
 0x620   : > { %v1911_v16 = vsel %vm1850_vm6, %v7198_v18, 0.0  ;;  %v7202_v19 = vpop.eup %5778  ;;  %v1444_v46 = vpop.permute.xlu0 %1443 }
 0x621   : > { %1912 = vadd.xlane.f32.xlu1 %v1911_v16  ;;  %v1905_v0 = vsel %vm1850_vm6, %v7202_v19, 0.0  ;;  %5782 = vpow2.f32 %v1897_v29  ;;  %v2044_v48 = vsel %vm1950_vm2, %v1444_v46, 0  ;;  %v5642_v46 = vld [vmem:[#allocation14 + $0x10] sm:$0xff]  }
 0x622   : > { %5784 = vpow2.f32 %v1895_v30 }
 0x623   : > { %v7210_v33 = vpop.eup %5780 }
 0x624   : > { %v1914_v34 = vsel %vm1850_vm6, %v7210_v33, 0.0 }
 0x625   : > { %1906 = vadd.xlane.f32.xlu1 %v1905_v0 }
 0x62b   : > { %v7214_v35 = vpop.eup %5782 }
 0x62c   : > { %v1920_v36 = vsel %vm1850_vm6, %v7214_v35, 0.0  ;;  %v7218_v38 = vpop.eup %5784 }
 0x62d   : > { %v1917_v44 = vsel %vm1850_vm6, %v7218_v38, 0.0 }
 0x633   : > { %1449 = vrot.lane.b32.xlu0 %v7095_v1, %s6409_s9 }
 0x636   : > { %1447 = vrot.lane.b32.xlu1 %v7095_v1, %s6408_s16 }
 0x64d   : > { %v1901_v32 = vpop.xlane.xlu1 %1900 }
 0x64e   : > { %5786 = vrcp.f32 %v1901_v32 }
 0x652   : > { %1915 = vadd.xlane.f32.xlu0 %v1914_v34 }
 0x656   : > { %1921 = vadd.xlane.f32.xlu0 %v1920_v36  ;;  %v5640_v36 = vld [vmem:[#allocation14] sm:$0xff]  }
 0x658   : > { %v5787_v39 = vpop.eup %5786 }
 0x659   : > { %v1931_v40 = vmul.f32 %v5787_v39, %v5771_v63 }
 0x65a   : > { %1918 = vadd.xlane.f32.xlu1 %v1917_v44 }
 0x65b   : > { %v1939_v47 = vpack.c.bf16 %v1931_v40, %v1931_v40 }
 0x65d   : > { %5210 = vmatmul.mubr.msk.bf16.vlgmr.msra.gmra.mrb[12].mxu0 %vm1850_vm6, %v1939_v47 }
 0x65e   : > { %5220 = vmatpush3.bf16.msra.mxu0 %v2044_v48  ;;  %5221 = vmatprep.mubr.msk.bf16.mxu0 %vm6402_vm0, %v6400_v3  ;;  %v5643_v48 = vld [vmem:[#allocation14 + $0x18] sm:$0xff]  }
 0x65f   : > { %5231 = vmatprep.subr.bf16.mxu0 %v6400_v3 }
 0x66b   : > { %1451 = vrot.lane.b32.xlu1 %v7095_v1, %s6405_s18 }
 0x66c   : > { %1453 = vrot.lane.b32.xlu0 %v7095_v1, %s6406_s22 }
 0x69a   : > { %v1904_v49 = vpop.xlane.xlu0 %1903 }
 0x69b   : > { %5788 = vrcp.f32 %v1904_v49 }
 0x6a5   : > { %v5789_v50 = vpop.eup %5788 }
 0x6a6   : > { %v1932_v51 = vmul.f32 %v5789_v50, %v7192_v7 }
 0x6a8   : > { %v1940_v52 = vpack.c.bf16 %v1932_v51, %v1932_v51 }
 0x6aa   : > { %5216 = vmatmul.mubr.msk.bf16.vlgmr.msra.gmra.mrb[28].mxu1 %vm1850_vm6, %v1940_v52  ;;  %v1910_v55 = vpop.xlane.xlu0 %1909  ;;  %v5644_v52 = vld [vmem:[#allocation14 + $0x20] sm:$0xff]  }
 0x6ab   : > { %5226 = vmatpush3.bf16.msra.mxu1 %v2090_v53  ;;  %5790 = vrcp.f32 %v1910_v55  ;;  %5227 = vmatprep.mubr.msk.bf16.mxu1 %vm6402_vm0, %v6400_v3  ;;  %v5645_v55 = vld [vmem:[#allocation14 + $0x28] sm:$0xff]  }
 0x6ac   : > { %5237 = vmatprep.subr.bf16.mxu1 %v6400_v3 }
 0x6ae   : > { %v1913_v56 = vpop.xlane.xlu1 %1912  ;;  %v1450_v59 = vpop.permute.xlu0 %1449 }
 0x6af   : > { %v2182_v62 = vsel %vm1950_vm2, %v1450_v59, 0 }
 0x6b2   : > { %v1907_v1 = vpop.xlane.xlu1 %1906 }
 0x6b3   : > { %5792 = vrcp.f32 %v1907_v1  ;;  %v5647_v1 = vld [vmem:[#allocation14 + $0x38] sm:$0xff]  }
 0x6b4   : > { %5794 = vrcp.f32 %v1913_v56  ;;  %v5646_v56 = vld [vmem:[#allocation14 + $0x30] sm:$0xff]  }
 0x6b5   : > { %v5791_v57 = vpop.eup %5790 }
 0x6b6   : > { %v1934_v58 = vmul.f32 %v5791_v57, %v5775_v54  ;;  %v1448_v37 = vpop.permute.xlu1 %1447 }
 0x6b7   : > { %v2136_v6 = vsel %vm1950_vm2, %v1448_v37, 0 }
 0x6b8   : > { %v1942_v60 = vpack.c.bf16 %v1934_v58, %v1934_v58 }
 0x6ba   : > { %5228 = vmatmul.mubr.msk.bf16.vlgmr.msra.gmra.mrb[32].mxu1 %vm1850_vm6, %v1942_v60 }
 0x6bb   : > { %5238 = vmatpush3.bf16.msra.mxu1 %v2182_v62  ;;  %5239 = vmatprep.mubr.msk.bf16.mxu1 %vm6402_vm0, %v6400_v3 }
 0x6bc   : > { %5249 = vmatprep.subr.bf16.mxu1 %v6400_v3 }
 0x6bd   : > { %v5793_v63 = vpop.eup %5792 }
 0x6be   : > { %v1933_v2 = vmul.f32 %v5793_v63, %v7202_v19  ;;  %v5795_v5 = vpop.eup %5794 }
 0x6bf   : > { %v1935_v7 = vmul.f32 %v5795_v5, %v7198_v18 }
 0x6c0   : > { %v1941_v4 = vpack.c.bf16 %v1933_v2, %v1933_v2 }
 0x6c1   : > { %v1943_v8 = vpack.c.bf16 %v1935_v7, %v1935_v7 }
 0x6c2   : > { %5222 = vmatmul.mubr.msk.bf16.vlgmr.msra.gmra.mrb[16].mxu0 %vm1850_vm6, %v1941_v4 }
 0x6c3   : > { %5232 = vmatpush3.bf16.msra.mxu0 %v2136_v6  ;;  %5233 = vmatprep.mubr.msk.bf16.mxu0 %vm6402_vm0, %v6400_v3 }
 0x6c4   : > { %5243 = vmatprep.subr.bf16.mxu0 %v6400_v3 }
 0x6ca   : > { %5234 = vmatmul.mubr.msk.bf16.vlgmr.msra.gmra.mrb[20].mxu0 %vm1850_vm6, %v1943_v8 }
 0x6cb   : > { %5245 = vmatprep.mubr.msk.bf16.mxu0 %vm6402_vm0, %v6400_v3 }
 0x6df   : > { %v1916_v9 = vpop.xlane.xlu0 %1915 }
 0x6e0   : > { %5796 = vrcp.f32 %v1916_v9 }
 0x6e3   : > { %v1922_v10 = vpop.xlane.xlu0 %1921 }
 0x6e4   : > { %5798 = vrcp.f32 %v1922_v10 }
 0x6e7   : > { %v1919_v41 = vpop.xlane.xlu1 %1918  ;;  %v1454_v14 = vpop.permute.xlu0 %1453 }
 0x6e8   : > { %5800 = vrcp.f32 %v1919_v41  ;;  %v2274_v18 = vsel %vm1950_vm2, %v1454_v14, 0 }
 0x6ea   : > { %v5797_v11 = vpop.eup %5796 }
 0x6eb   : > { %v1936_v12 = vmul.f32 %v5797_v11, %v7210_v33  ;;  %v1452_v13 = vpop.permute.xlu1 %1451 }
 0x6ec   : > { %v2228_v15 = vsel %vm1950_vm2, %v1452_v13, 0 }
 0x6ed   : > { %5244 = vmatpush3.bf16.msra.mxu0 %v2228_v15  ;;  %v1944_v54 = vpack.c.bf16 %v1936_v12, %v1936_v12 }
 0x6ee   : > { %v5799_v17 = vpop.eup %5798  ;;  %5255 = vmatprep.subr.bf16.mxu0 %v6400_v3 }
 0x6ef   : > { %5240 = vmatmul.mubr.msk.bf16.vlgmr.msra.gmra.mrb[36].mxu1 %vm1850_vm6, %v1944_v54  ;;  %v1938_v16 = vmul.f32 %v5799_v17, %v7214_v35 }
 0x6f0   : > { %5250 = vmatpush3.bf16.msra.mxu1 %v2274_v18  ;;  %5251 = vmatprep.mubr.msk.bf16.mxu1 %vm6402_vm0, %v6400_v3 }
 0x6f1   : > { %5275 = vmatprep.subr.bf16.mxu1 %v6400_v3  ;;  %v1946_v21 = vpack.c.bf16 %v1938_v16, %v1938_v16 }
 0x6f2   : > { %v5801_v19 = vpop.eup %5800 }
 0x6f3   : > { %v1937_v0 = vmul.f32 %v5801_v19, %v7218_v38  ;;  %v5641_v38 = vld [vmem:[#allocation14 + $0x8] sm:$0xff]  }
 0x6f5   : > { %v1945_v20 = vpack.c.bf16 %v1937_v0, %v1937_v0 }
 0x6f7   : > { %5246 = vmatmul.mubr.msk.bf16.vlgmr.msra.gmra.mrb[24].mxu0 %vm1850_vm6, %v1945_v20  ;;  %5252 = vmatmul.mubr.msk.bf16.vlgmr.msra.gmra.mrb[40].mxu1 %vm1850_vm6, %v1946_v21  ;;  %v4852_v21 = vld [vmem:[#allocation16] ss:$0 sm:$0xff] }
 0x6f8   : > { %5271 = vmatprep.mubr.msk.bf16.mxu0 %vm6402_vm0, %v6400_v3  ;;  %5291 = vmatprep.mubr.msk.bf16.mxu1 %vm6402_vm0, %v6400_v3 }
 0x6f9   : > { %5256 = vmatpush3.bf16.msra.mxu0 %v5640_v36  ;;  %v5667_v36 = vld [vmem:[%s7764_s14 + $0x8] sm:$0xff]  }
 0x6fa   : > { %5257 = vmatprep.subr.bf16.mxu0 %v6400_v3 }
 0x6fd   : > { %5258 = vmatpush3.bf16.msra.mxu0 %v5641_v38  ;;  %v5654_v38 = vld [vmem:[#allocation20 + $0x20] ss:$8 sps:$4 sm:$0xff]  }
 0x6fe   : > { %5259 = vmatprep.subr.bf16.mxu0 %v6400_v3 }
 0x701   : > { %5260 = vmatpush3.bf16.msra.mxu0 %v5642_v46  ;;  %v5660_v46 = vld [vmem:[#allocation20 + $0x40] ss:$8 sps:$4 sm:$0xff]  }
 0x702   : > { %5261 = vmatprep.subr.bf16.mxu0 %v6400_v3 }
 0x705   : > { %5262 = vmatpush3.bf16.msra.mxu0 %v5643_v48  ;;  %v5664_v48 = vld [vmem:[#allocation20 + $0x50] ss:$8 sps:$4 sm:$0xff]  }
 0x706   : > { %5263 = vmatprep.subr.bf16.mxu0 %v6400_v3 }
 0x709   : > { %5264 = vmatpush3.bf16.msra.mxu0 %v5644_v52 }
 0x70a   : > { %5265 = vmatprep.subr.bf16.mxu0 %v6400_v3 }
 0x70d   : > { %5266 = vmatpush3.bf16.msra.mxu0 %v5645_v55 }
 0x70e   : > { %5267 = vmatprep.subr.bf16.mxu0 %v6400_v3 }
 0x711   : > { %5268 = vmatpush3.bf16.msra.mxu0 %v5646_v56  ;;  %v5671_v56 = vld [vmem:[%s7764_s14 + $0x10] sm:$0xff]  }
 0x712   : > { %5269 = vmatprep.subr.bf16.mxu0 %v6400_v3 }
 0x715   : > { %5270 = vmatpush3.bf16.msra.mxu0 %v5647_v1  ;;  %v5674_v1 = vld [vmem:[#allocation20 + $0x74] ss:$8 sps:$4 sm:$0xff]  }
 0x730   : > { %v7268_v22 = vpop.f32.mrb[12].mxu0 }
 0x731   : > { %v5211_v23 = vpop.f32.mrb[13].mxu0 }
 0x732   : > { %v1991_v24 = vpop.f32.mrb[14].mxu0 }
 0x733   : > { %v5212_v27 = vpop.f32.mrb[15].mxu0 }
 0x77d   : > { %v2034_v28 = vpop.f32.mrb[28].mxu1 }
 0x77e   : > { %2317 = vrot.lane.b32.xlu1 %v2034_v28, %s6406_s22  ;;  %v5217_v29 = vpop.f32.mrb[29].mxu1 }
 0x77f   : > { %v2037_v30 = vpop.f32.mrb[30].mxu1 }
 0x780   : > { %v5218_v31 = vpop.f32.mrb[31].mxu1  ;;  %v5648_v30 = vld [vmem:[#allocation20] ss:$8 sps:$4 sm:$0xff]  }
 0x781   : > { %v5650_v31 = vld [vmem:[#allocation20 + $0x4] ss:$8 sps:$4 sm:$0xff]  }
 0x782   : > { %2720 = vmatprep.subr.bf16.mxu0 %v5650_v31 }
 0x78d   : > { %v2126_v32 = vpop.f32.mrb[32].mxu1 }
 0x78e   : > { %2325 = vrot.lane.b32.xlu1 %v2126_v32, %s6409_s9  ;;  %v5229_v33 = vpop.f32.mrb[33].mxu1  ;;  %v5653_v32 = vld [vmem:[#allocation20 + $0x14] ss:$8 sps:$4 sm:$0xff]  }
 0x78f   : > { %v2129_v34 = vpop.f32.mrb[34].mxu1  ;;  %v5651_v33 = vld [vmem:[#allocation20 + $0x10] ss:$8 sps:$4 sm:$0xff]  }
 0x790   : > { %v5230_v35 = vpop.f32.mrb[35].mxu1  ;;  %v5663_v34 = vld [vmem:[%s7764_s14] sm:$0xff]  }
 0x791   : > { %v5656_v35 = vld [vmem:[#allocation20 + $0x24] ss:$8 sps:$4 sm:$0xff]   ;;  %5276 = vmatpush3.bf16.msra.mxu1 %v5663_v34 }
 0x792   : > { %5277 = vmatprep.subr.bf16.mxu1 %v6400_v3 }
 0x795   : > { %v2080_v39 = vpop.f32.mrb[16].mxu0  ;;  %5278 = vmatpush3.bf16.msra.mxu1 %v5667_v36 }
 0x796   : > { %2321 = vrot.lane.b32.xlu0 %v2080_v39, %s6405_s18  ;;  %v5223_v40 = vpop.f32.mrb[17].mxu0  ;;  %v5659_v39 = vld [vmem:[#allocation20 + $0x34] ss:$8 sps:$4 sm:$0xff]   ;;  %5279 = vmatprep.subr.bf16.mxu1 %v6400_v3 }
 0x797   : > { %v2083_v44 = vpop.f32.mrb[18].mxu0  ;;  %v5657_v40 = vld [vmem:[#allocation20 + $0x30] ss:$8 sps:$4 sm:$0xff]  }
 0x798   : > { %v5224_v47 = vpop.f32.mrb[19].mxu0  ;;  %v5662_v44 = vld [vmem:[#allocation20 + $0x44] ss:$8 sps:$4 sm:$0xff]  }
 0x799   : > { %v5666_v47 = vld [vmem:[#allocation20 + $0x54] ss:$8 sps:$4 sm:$0xff]   ;;  %5280 = vmatpush3.bf16.msra.mxu1 %v5671_v56 }
 0x79a   : > { %5281 = vmatprep.subr.bf16.mxu1 %v6400_v3 }
 0x79d   : > { %v2172_v49 = vpop.f32.mrb[20].mxu0 }
 0x79e   : > { %2329 = vrot.lane.b32.xlu0 %v2172_v49, %s6408_s16  ;;  %v5235_v50 = vpop.f32.mrb[21].mxu0  ;;  %v5670_v49 = vld [vmem:[#allocation20 + $0x64] ss:$8 sps:$4 sm:$0xff]  }
 0x79f   : > { %v2175_v51 = vpop.f32.mrb[22].mxu0  ;;  %v5668_v50 = vld [vmem:[#allocation20 + $0x60] ss:$8 sps:$4 sm:$0xff]  }
 0x7a0   : > { %v5236_v53 = vpop.f32.mrb[23].mxu0 }
 0x7c2   : > { %v2218_v57 = vpop.f32.mrb[36].mxu1 }
 0x7c3   : > { %2333 = vrot.lane.b32.xlu1 %v2218_v57, %s6407_s0  ;;  %v5241_v58 = vpop.f32.mrb[37].mxu1  ;;  %v5672_v57 = vld [vmem:[#allocation20 + $0x70] ss:$8 sps:$4 sm:$0xff]  }
 0x7c4   : > { %v2221_v59 = vpop.f32.mrb[38].mxu1  ;;  %v5675_v58 = vld [vmem:[%s7764_s14 + $0x18] sm:$0xff]  }
 0x7c5   : > { %v5242_v60 = vpop.f32.mrb[39].mxu1  ;;  %v2499_v59 = vld [vmem:[%s924_s12] sm:$0xff]  ;;  %5282 = vmatpush3.bf16.msra.mxu1 %v5675_v58 }
 0x7c6   : > { %v2500_v60 = vpack.c.bf16 %v2499_v59, %v2499_v59  ;;  %5283 = vmatprep.subr.bf16.mxu1 %v6400_v3 }
 0x7ca   : > { %v2264_v62 = vpop.f32.mrb[24].mxu0  ;;  %v2310_v63 = vpop.f32.mrb[40].mxu1 }
 0x7cb   : > { %2337 = vrot.lane.b32.xlu0 %v2264_v62, %s6403_s8  ;;  %v5247_v2 = vpop.f32.mrb[25].mxu0  ;;  %2341 = vrot.lane.b32.xlu1 %v2310_v63, %s6404_s13  ;;  %v5253_v37 = vpop.f32.mrb[41].mxu1  ;;  %v5676_v62 = vld [vmem:[%s7764_s14 + $0x20] sm:$0xff]   ;;  %v5677_v63 = vld [vmem:[%s7764_s14 + $0x28] sm:$0xff]  }
 0x7cc   : > { %v2267_v4 = vpop.f32.mrb[26].mxu0  ;;  %v2313_v5 = vpop.f32.mrb[42].mxu1  ;;  %5284 = vmatpush3.bf16.msra.mxu1 %v5676_v62  ;;  %v5678_v2 = vld [vmem:[%s7764_s14 + $0x30] sm:$0xff]   ;;  %v5679_v37 = vld [vmem:[%s7764_s14 + $0x38] sm:$0xff]  }
 0x7cd   : > { %v5248_v6 = vpop.f32.mrb[27].mxu0  ;;  %v5254_v7 = vpop.f32.mrb[43].mxu1  ;;  %5285 = vmatprep.subr.bf16.mxu1 %v6400_v3 }
 0x7d0   : > { %5286 = vmatpush3.bf16.msra.mxu1 %v5677_v63 }
 0x7d1   : > { %5287 = vmatprep.subr.bf16.mxu1 %v6400_v3 }
 0x7d4   : > { %5288 = vmatpush3.bf16.msra.mxu1 %v5678_v2 }
 0x7d5   : > { %5289 = vmatprep.subr.bf16.mxu1 %v6400_v3 }
 0x7d8   : > { %5290 = vmatpush3.bf16.msra.mxu1 %v5679_v37 }
 0x7d9   : > { %5295 = vmatprep.subr.bf16.mxu1 %v6400_v3 }
 0x7f0   : > { %v2318_v8 = vpop.permute.xlu1 %2317 }
 0x7f1   : > { %v2344_v41 = vsel %vm1455_vm1, %v7268_v22, %v2318_v8  ;;  %v5846_v22 = vld [vmem:[%s915_s15] sm:$0xff]  ;;  %s7767_s15 = scalar_lea.vmem [#allocation8], %s6980_s5 }
 0x7f2   : > { %v4853_v8 = vld [vmem:[#allocation17] ss:$0 sm:$0xff]  ;;  %v4801_v63 = vld [vmem:[%s7767_s15] ss:$0 sm:$0xff] }
 0x7f3   : > { %v7412_v2 = vmul.f32 %v4801_v63, %v7137_v26 }
 0x7f5   : > { %vm1103_vm13 = vcmp.lt.f32.partialorder %v7412_v2, 0.5 }
 0x800   : > { %v2326_v9 = vpop.permute.xlu1 %2325 }
 0x808   : > { %v2322_v10 = vpop.permute.xlu0 %2321 }
 0x809   : > { %v2346_v11 = vsel %vm2345_vm7, %v2344_v41, %v2322_v10  ;;  %v4854_v10 = vld [vmem:[#allocation19] ss:$0 sm:$0xff] }
 0x80a   : > { %v2348_v14 = vsel %vm2347_vm8, %v2346_v11, %v2326_v9 }
 0x810   : > { %v2330_v12 = vpop.permute.xlu0 %2329 }
 0x811   : > { %v2350_v15 = vsel %vm2349_vm9, %v2348_v14, %v2330_v12 }
 0x835   : > { %v2334_v13 = vpop.permute.xlu1 %2333 }
 0x836   : > { %v2352_v54 = vsel %vm2351_vm10, %v2350_v15, %v2334_v13  ;;  %v2628_v13 = vld [vmem:[%s7765_s21] sm:$0x3] }
 0x837   : > { %v2633_v14 = vrot.slane %v2628_v13, %v7061_v45 }
 0x83d   : > { %v2338_v17 = vpop.permute.xlu0 %2337  ;;  %v2342_v18 = vpop.permute.xlu1 %2341 }
 0x83e   : > { %v2354_v16 = vsel %vm2353_vm11, %v2352_v54, %v2338_v17 }
 0x83f   : > { %v2356_v19 = vsel %vm2355_vm12, %v2354_v16, %v2342_v18 }
 0x840   : > { %v2357_v0 = vpack.c.bf16 %v2356_v19, %v2356_v19 }
 0x842   : > { %5272 = vmatmul.mubr.bf16.vlgmr.msra.gmra.mrb[28].mxu0 %v2357_v0 }
 0x843   : > { %2752 = vmatprep.mubr.bf16.mxu0 %v6401_v25  ;;  %2721 = vmatpush1.bf16.msra.mxu0 %v5648_v30 }
 0x844   : > { %2722 = vmatprep.subr.bf16.mxu0 %v5653_v32  ;;  %v2637_v32 = vrot.slane %v2628_v13, %v7058_v43 }
 0x847   : > { %2723 = vmatpush1.bf16.msra.mxu0 %v5651_v33 }
 0x848   : > { %2724 = vmatprep.subr.bf16.mxu0 %v5656_v35 }
 0x84b   : > { %2725 = vmatpush1.bf16.msra.mxu0 %v5654_v38 }
 0x84c   : > { %2726 = vmatprep.subr.bf16.mxu0 %v5659_v39 }
 0x84f   : > { %2727 = vmatpush1.bf16.msra.mxu0 %v5657_v40 }
 0x850   : > { %2728 = vmatprep.subr.bf16.mxu0 %v5662_v44 }
 0x853   : > { %2729 = vmatpush1.bf16.msra.mxu0 %v5660_v46 }
 0x854   : > { %2730 = vmatprep.subr.bf16.mxu0 %v5666_v47 }
 0x857   : > { %2731 = vmatpush1.bf16.msra.mxu0 %v5664_v48 }
 0x858   : > { %2732 = vmatprep.subr.bf16.mxu0 %v5670_v49 }
 0x85b   : > { %2733 = vmatpush1.bf16.msra.mxu0 %v5668_v50 }
 0x85c   : > { %2734 = vmatprep.subr.bf16.mxu0 %v5674_v1 }
 0x85f   : > { %2735 = vmatpush1.bf16.msra.mxu0 %v5672_v57 }
 0x860   : > { %5319 = vmatprep.subr.bf16.mxu0 %v6400_v3 }
 0x862   : > { %2753 = vmatmul.mubr.bf16.vlgmr.msra.gmra.mrb[32].mxu0 %v2500_v60 }
 0x863   : > { %5321 = vmatprep.mubr.msk.bf16.mxu0 %vm6402_vm0, %v6400_v3 }
 0x915   : > { %v2456_v20 = vpop.f32.mrb[28].mxu0 }
 0x916   : > { %v2462_v23 = vadd.f32 %v5846_v22, %v2456_v20  ;;  %v5273_v24 = vpop.f32.mrb[29].mxu0  ;;  %v4855_v20 = vld [vmem:[%s7766_s6] ss:$0 sm:$0xff] }
 0x917   : > { %v2459_v27 = vpop.f32.mrb[30].mxu0 }
 0x918   : > { %v7295_v28 = vadd.f32 %v4852_v21, %v2462_v23  ;;  %v5274_v29 = vpop.f32.mrb[31].mxu0 }
 0x91a   : > { %2473 = vadd.xlane.f32.xlu0 %v7295_v28 }
 0x935   : > { %v2754_v15 = vpop.f32.mrb[32].mxu0 }
 0x936   : > { %v2755_v54 = vadd.f32 %v2754_v15, %v2633_v14  ;;  %v2756_v17 = vpop.f32.mrb[33].mxu0 }
 0x937   : > { %v2758_v18 = vpop.f32.mrb[34].mxu0  ;;  %v2757_v33 = vadd.f32 %v2756_v17, %v2637_v32 }
 0x938   : > { %v2777_v16 = vpack.c.bf16 %v2755_v54, %v2755_v54  ;;  %v2759_v19 = vpop.f32.mrb[35].mxu0 }
 0x939   : > { %v7367_v34 = vpack.c.bf16 %v2757_v33, %v2757_v33 }
 0x93a   : > { %2779 = vrot.lane.b32.xlu0 %v2777_v16, %s6404_s13  ;;  %v2813_v0 = vsel %vm1455_vm1, %v2777_v16, 0 }
 0x93b   : > { %v3295_v59 = vsel %vm1950_vm2, %v7367_v34, 0 }
 0x93e   : > { %2781 = vrot.lane.b32.xlu0 %v2777_v16, %s6403_s8 }
 0x942   : > { %2783 = vrot.lane.b32.xlu0 %v2777_v16, %s6407_s0 }
 0x9a7   : > { %v2474_v51 = vpop.xlane.xlu0 %2473 }
 0x9a8   : > { %v2475_v52 = vmul.f32 0.0078125, %v2474_v51 }
 0x9aa   : > { %v2476_v53 = vsub.f32 %v7295_v28, %v2475_v52 }
 0x9ac   : > { %v2477_v55 = vmul.f32 %v2476_v53, %v2476_v53  ;;  %v2780_v30 = vpop.permute.xlu0 %2779 }
 0x9ad   : > { %v2859_v31 = vsel %vm1455_vm1, %v2780_v30, 0 }
 0x9ae   : > { %2478 = vadd.xlane.f32.xlu1 %v2477_v55 }
 0x9b0   : > { %v2782_v35 = vpop.permute.xlu0 %2781 }
 0x9b1   : > { %v2905_v38 = vsel %vm1455_vm1, %v2782_v35, 0 }
 0x9b4   : > { %v2784_v39 = vpop.permute.xlu0 %2783 }
 0x9b5   : > { %v2951_v47 = vsel %vm1455_vm1, %v2784_v39, 0 }
 0xa3b   : > { %v2479_v4 = vpop.xlane.xlu1 %2478 }
 0xa3c   : > { %v2480_v5 = vmul.f32 0.0078125, %v2479_v4 }
 0xa3e   : > { %v2481_v6 = vadd.f32 1e-05, %v2480_v5 }
 0xa40   : > { %5802 = vrsqrt.f32 %v2481_v6 }
 0xa4a   : > { %v5803_v7 = vpop.eup %5802 }
 0xa4b   : > { %v2483_v9 = vmul.f32 %v5803_v7, %v2476_v53 }
 0xa4d   : > { %v2490_v41 = vmul.f32 %v4853_v8, %v2483_v9 }
 0xa4f   : > { %v2497_v11 = vadd.f32 %v4854_v10, %v2490_v41 }
 0xa51   : > { %v2498_v12 = vpack.c.bf16 %v2497_v11, %v2497_v11 }
 0xa53   : > { %5292 = vmatmul.mubr.bf16.vlgmr.msra.gmra.mrb[44].mxu1 %v2498_v12 }
 0xa54   : > { %5297 = vmatprep.mubr.msk.bf16.mxu1 %vm6402_vm0, %v6400_v3  ;;  %5296 = vmatpush3.bf16.xpose.msra.mxu1 %v2813_v0 }
 0xa55   : > { %5301 = vmatprep.subr.bf16.mxu1 %v6400_v3 }
 0xb26   : > { %v2606_v21 = vpop.f32.mrb[44].mxu1 }
 0xb27   : > { %v2607_v22 = vadd.f32 %v4855_v20, %v2606_v21  ;;  %v5293_v23 = vpop.f32.mrb[45].mxu1 }
 0xb28   : > { %v2609_v24 = vpop.f32.mrb[46].mxu1 }
 0xb29   : > { %v2761_v27 = vpack.c.bf16 %v2607_v22, %v2607_v22  ;;  %v5294_v29 = vpop.f32.mrb[47].mxu1 }
 0xb2b   : > { %2767 = vrot.lane.b32.xlu0 %v2761_v27, %s6407_s0  ;;  %2763 = vrot.lane.b32.xlu1 %v2761_v27, %s6404_s13 }
 0xb2c   : > { %5298 = vmatmul.mubr.msk.bf16.vlgmr.msra.gmra.mrb[48].mxu1 %vm1455_vm1, %v2761_v27 }
 0xb2d   : > { %5302 = vmatpush3.bf16.xpose.msra.mxu1 %v2859_v31  ;;  %5303 = vmatprep.mubr.msk.bf16.mxu1 %vm6402_vm0, %v6400_v3 }
 0xb2e   : > { %5307 = vmatprep.subr.bf16.mxu1 %v6400_v3 }
 0xb2f   : > { %2769 = vrot.lane.b32.xlu0 %v2761_v27, %s6408_s16  ;;  %2765 = vrot.lane.b32.xlu1 %v2761_v27, %s6403_s8 }
 0xb33   : > { %2771 = vrot.lane.b32.xlu0 %v2761_v27, %s6409_s9  ;;  %2785 = vrot.lane.b32.xlu1 %v2777_v16, %s6408_s16 }
 0xb37   : > { %2773 = vrot.lane.b32.xlu0 %v2761_v27, %s6405_s18  ;;  %2787 = vrot.lane.b32.xlu1 %v2777_v16, %s6409_s9 }
 0xb3b   : > { %2789 = vrot.lane.b32.xlu1 %v2777_v16, %s6405_s18 }
 0xb3f   : > { %2791 = vrot.lane.b32.xlu1 %v2777_v16, %s6406_s22 }
 0xb43   : > { %2775 = vrot.lane.b32.xlu1 %v2761_v27, %s6406_s22 }
 0xb47   : > { %2795 = vrot.lane.b32.xlu1 %v7367_v34, %s6404_s13 }
 0xb9d   : > { %v2764_v36 = vpop.permute.xlu1 %2763  ;;  %v2768_v44 = vpop.permute.xlu0 %2767 }
 0xb9e   : > { %5304 = vmatmul.mubr.msk.bf16.vlgmr.msra.gmra.mrb[52].mxu1 %vm1455_vm1, %v2764_v36 }
 0xb9f   : > { %5308 = vmatpush3.bf16.xpose.msra.mxu1 %v2905_v38  ;;  %5309 = vmatprep.mubr.msk.bf16.mxu1 %vm6402_vm0, %v6400_v3 }
 0xba0   : > { %5313 = vmatprep.subr.bf16.mxu1 %v6400_v3 }
 0xba1   : > { %v2766_v40 = vpop.permute.xlu1 %2765  ;;  %v2770_v49 = vpop.permute.xlu0 %2769 }
 0xba5   : > { %v2786_v46 = vpop.permute.xlu1 %2785  ;;  %v2772_v55 = vpop.permute.xlu0 %2771 }
 0xba6   : > { %v2997_v48 = vsel %vm1455_vm1, %v2786_v46, 0  ;;  %5310 = vmatmul.mubr.msk.bf16.vlgmr.msra.gmra.mrb[56].mxu1 %vm1455_vm1, %v2766_v40 }
 0xba7   : > { %5314 = vmatpush3.bf16.xpose.msra.mxu1 %v2951_v47  ;;  %5320 = vmatpush3.bf16.xpose.msra.mxu0 %v2997_v48 }
 0xba8   : > { %5315 = vmatprep.mubr.msk.bf16.mxu1 %vm6402_vm0, %v6400_v3  ;;  %5325 = vmatprep.subr.bf16.mxu1 %v6400_v3 }
 0xba9   : > { %v2788_v50 = vpop.permute.xlu1 %2787  ;;  %5331 = vmatprep.subr.bf16.mxu0 %v6400_v3  ;;  %v2774_v1 = vpop.permute.xlu0 %2773 }
 0xbaa   : > { %v3043_v52 = vsel %vm1455_vm1, %v2788_v50, 0 }
 0xbad   : > { %v2790_v51 = vpop.permute.xlu1 %2789 }
 0xbae   : > { %v3089_v53 = vsel %vm1455_vm1, %v2790_v51, 0  ;;  %5316 = vmatmul.mubr.msk.bf16.vlgmr.msra.gmra.mrb[60].mxu1 %vm1455_vm1, %v2768_v44  ;;  %5322 = vmatmul.mubr.msk.bf16.vlgmr.msra.gmra.mrb[36].mxu0 %vm1455_vm1, %v2770_v49 }
 0xbaf   : > { %5326 = vmatpush3.bf16.xpose.msra.mxu1 %v3043_v52  ;;  %5332 = vmatpush3.bf16.xpose.msra.mxu0 %v3089_v53 }
 0xbb0   : > { %5333 = vmatprep.mubr.msk.bf16.mxu0 %vm6402_vm0, %v6400_v3  ;;  %5327 = vmatprep.mubr.msk.bf16.mxu1 %vm6402_vm0, %v6400_v3 }
 0xbb1   : > { %v2792_v56 = vpop.permute.xlu1 %2791  ;;  %5337 = vmatprep.subr.bf16.mxu1 %v6400_v3  ;;  %5343 = vmatprep.subr.bf16.mxu0 %v6400_v3 }
 0xbb2   : > { %v3135_v58 = vsel %vm1455_vm1, %v2792_v56, 0 }
 0xbb5   : > { %v2776_v57 = vpop.permute.xlu1 %2775 }
 0xbb6   : > { %5328 = vmatmul.mubr.msk.bf16.vlgmr.msra.gmra.mrb[64].mxu1 %vm1455_vm1, %v2772_v55  ;;  %5334 = vmatmul.mubr.msk.bf16.vlgmr.msra.gmra.mrb[40].mxu0 %vm1455_vm1, %v2774_v1 }
 0xbb7   : > { %5338 = vmatpush3.bf16.xpose.msra.mxu1 %v3135_v58  ;;  %5344 = vmatpush3.bf16.msra.mxu0 %v3295_v59 }
 0xbb8   : > { %5339 = vmatprep.mubr.msk.bf16.mxu1 %vm6402_vm0, %v6400_v3  ;;  %5349 = vmatprep.subr.bf16.mxu1 %v6400_v3 }
 0xbb9   : > { %5345 = vmatprep.mubr.msk.bf16.mxu0 %vm6402_vm0, %v6400_v3  ;;  %5355 = vmatprep.subr.bf16.mxu0 %v6400_v3  ;;  %v2796_v60 = vpop.permute.xlu1 %2795 }
 0xbba   : > { %v3341_v62 = vsel %vm1950_vm2, %v2796_v60, 0 }
 0xbbe   : > { %5340 = vmatmul.mubr.msk.bf16.vlgmr.msra.gmra.mrb[68].mxu1 %vm1455_vm1, %v2776_v57 }
 0xbbf   : > { %5350 = vmatpush3.bf16.msra.mxu1 %v3341_v62  ;;  %5351 = vmatprep.mubr.msk.bf16.mxu1 %vm6402_vm0, %v6400_v3 }
 0xbc0   : > { %5361 = vmatprep.subr.bf16.mxu1 %v6400_v3 }
 0xbff   : > { %v2849_v37 = vpop.f32.mrb[48].mxu1 }
 0xc00   : > { %v3177_v4 = vmul.f32 0.25, %v2849_v37  ;;  %v5299_v5 = vpop.f32.mrb[49].mxu1 }
 0xc01   : > { %v2852_v6 = vpop.f32.mrb[50].mxu1 }
 0xc02   : > { %v5300_v7 = vpop.f32.mrb[51].mxu1  ;;  %v7417_v8 = vsel %vm1103_vm13, -1e+30, %v3177_v4 }
 0xc03   : > { %v3195_v9 = vsel %vm1850_vm6, %v7417_v8, -inf }
 0xc04   : > { %3196 = vmax.xlane.f32.xlu0 %v3195_v9 }
 0xc71   : > { %v2895_v10 = vpop.f32.mrb[52].mxu1 }
 0xc72   : > { %v3178_v41 = vmul.f32 0.25, %v2895_v10  ;;  %v5305_v11 = vpop.f32.mrb[53].mxu1 }
 0xc73   : > { %v2898_v26 = vpop.f32.mrb[54].mxu1 }
 0xc74   : > { %v5306_v12 = vpop.f32.mrb[55].mxu1  ;;  %v3188_v13 = vsel %vm1103_vm13, -1e+30, %v3178_v41 }
 0xc75   : > { %v3198_v14 = vsel %vm1850_vm6, %v3188_v13, -inf }
 0xc76   : > { %3199 = vmax.xlane.f32.xlu1 %v3198_v14 }
 0xc79   : > { %v2941_v15 = vpop.f32.mrb[56].mxu1 }
 0xc7a   : > { %v3179_v54 = vmul.f32 0.25, %v2941_v15  ;;  %v5311_v17 = vpop.f32.mrb[57].mxu1 }
 0xc7b   : > { %v2944_v18 = vpop.f32.mrb[58].mxu1 }
 0xc7c   : > { %v5312_v16 = vpop.f32.mrb[59].mxu1  ;;  %v7426_v19 = vsel %vm1103_vm13, -1e+30, %v3179_v54 }
 0xc7d   : > { %v3201_v0 = vsel %vm1850_vm6, %v7426_v19, -inf }
 0xc7e   : > { %3202 = vmax.xlane.f32.xlu0 %v3201_v0 }
 0xc81   : > { %v2987_v20 = vpop.f32.mrb[60].mxu1  ;;  %v3033_v21 = vpop.f32.mrb[36].mxu0 }
 0xc82   : > { %v3180_v22 = vmul.f32 0.25, %v2987_v20  ;;  %v3181_v23 = vmul.f32 0.25, %v3033_v21  ;;  %v5317_v24 = vpop.f32.mrb[61].mxu1  ;;  %v5323_v27 = vpop.f32.mrb[37].mxu0 }
 0xc83   : > { %v2990_v29 = vpop.f32.mrb[62].mxu1  ;;  %v3036_v30 = vpop.f32.mrb[38].mxu0 }
 0xc84   : > { %v5318_v31 = vpop.f32.mrb[63].mxu1  ;;  %v5324_v32 = vpop.f32.mrb[39].mxu0  ;;  %v3191_v33 = vsel %vm1103_vm13, -1e+30, %v3181_v23  ;;  %v3190_v35 = vsel %vm1103_vm13, -1e+30, %v3180_v22 }
 0xc85   : > { %v3207_v36 = vsel %vm1850_vm6, %v3191_v33, -inf  ;;  %v3204_v38 = vsel %vm1850_vm6, %v3190_v35, -inf }
 0xc86   : > { %3208 = vmax.xlane.f32.xlu1 %v3207_v36  ;;  %3205 = vmax.xlane.f32.xlu0 %v3204_v38 }
 0xc89   : > { %v3079_v39 = vpop.f32.mrb[64].mxu1  ;;  %v3125_v40 = vpop.f32.mrb[40].mxu0 }
 0xc8a   : > { %v3182_v44 = vmul.f32 0.25, %v3079_v39  ;;  %v3183_v46 = vmul.f32 0.25, %v3125_v40  ;;  %v5329_v47 = vpop.f32.mrb[65].mxu1  ;;  %v5335_v48 = vpop.f32.mrb[41].mxu0 }
 0xc8b   : > { %v3082_v49 = vpop.f32.mrb[66].mxu1  ;;  %v3128_v50 = vpop.f32.mrb[42].mxu0 }
 0xc8c   : > { %v5330_v51 = vpop.f32.mrb[67].mxu1  ;;  %v5336_v52 = vpop.f32.mrb[43].mxu0  ;;  %v3193_v53 = vsel %vm1103_vm13, -1e+30, %v3183_v46  ;;  %v3192_v55 = vsel %vm1103_vm13, -1e+30, %v3182_v44 }
 0xc8d   : > { %v3213_v56 = vsel %vm1850_vm6, %v3193_v53, -inf  ;;  %v3210_v1 = vsel %vm1850_vm6, %v3192_v55, -inf }
 0xc8e   : > { %3214 = vmax.xlane.f32.xlu1 %v3213_v56  ;;  %3211 = vmax.xlane.f32.xlu0 %v3210_v1 }
 0xc91   : > { %v3171_v57 = vpop.f32.mrb[68].mxu1  ;;  %v3197_v4 = vpop.xlane.xlu0 %3196 }
 0xc92   : > { %v3184_v58 = vmul.f32 0.25, %v3171_v57  ;;  %v5341_v59 = vpop.f32.mrb[69].mxu1  ;;  %v3219_v5 = vsub.f32 %v7417_v8, %v3197_v4 }
 0xc93   : > { %v3174_v60 = vpop.f32.mrb[70].mxu1 }
 0xc94   : > { %v5342_v62 = vpop.f32.mrb[71].mxu1  ;;  %v3194_v63 = vsel %vm1103_vm13, -1e+30, %v3184_v58  ;;  %v3227_v6 = vmul.f32 1.442695, %v3219_v5 }
 0xc95   : > { %v3216_v37 = vsel %vm1850_vm6, %v3194_v63, -inf }
 0xc96   : > { %3217 = vmax.xlane.f32.xlu0 %v3216_v37  ;;  %5804 = vpow2.f32 %v3227_v6 }
 0xc9f   : > { %2799 = vrot.lane.b32.xlu1 %v7367_v34, %s6407_s0 }
 0xca0   : > { %v5805_v7 = vpop.eup %5804 }
 0xca1   : > { %v3243_v9 = vsel %vm1850_vm6, %v5805_v7, 0.0 }
 0xcac   : > { %2797 = vrot.lane.b32.xlu0 %v7367_v34, %s6403_s8 }
 0xcc3   : > { %3244 = vadd.xlane.f32.xlu1 %v3243_v9 }
 0xd03   : > { %v3200_v2 = vpop.xlane.xlu1 %3199 }
 0xd04   : > { %v3220_v10 = vsub.f32 %v3188_v13, %v3200_v2 }
 0xd06   : > { %v3229_v41 = vmul.f32 1.442695, %v3220_v10 }
 0xd08   : > { %5806 = vpow2.f32 %v3229_v41 }
 0xd0b   : > { %v3203_v11 = vpop.xlane.xlu0 %3202 }
 0xd0c   : > { %v3221_v12 = vsub.f32 %v7426_v19, %v3203_v11 }
 0xd0e   : > { %v3231_v18 = vmul.f32 1.442695, %v3221_v12 }
 0xd12   : > { %v7451_v26 = vpop.eup %5806 }
 0xd13   : > { %v3209_v14 = vpop.xlane.xlu1 %3208  ;;  %v3206_v15 = vpop.xlane.xlu0 %3205  ;;  %v3246_v8 = vsel %vm1850_vm6, %v7451_v26, 0.0 }
 0xd14   : > { %v3223_v54 = vsub.f32 %v3191_v33, %v3209_v14  ;;  %v3222_v17 = vsub.f32 %v3190_v35, %v3206_v15  ;;  %3247 = vadd.xlane.f32.xlu0 %v3246_v8 }
 0xd16   : > { %v3235_v16 = vmul.f32 1.442695, %v3223_v54  ;;  %v3233_v0 = vmul.f32 1.442695, %v3222_v17 }
 0xd18   : > { %5808 = vpow2.f32 %v3235_v16 }
 0xd19   : > { %5810 = vpow2.f32 %v3233_v0 }
 0xd1a   : > { %5812 = vpow2.f32 %v3231_v18 }
 0xd1b   : > { %v3212_v24 = vpop.xlane.xlu0 %3211  ;;  %v3215_v27 = vpop.xlane.xlu1 %3214 }
 0xd1c   : > { %v3224_v29 = vsub.f32 %v3192_v55, %v3212_v24  ;;  %v3225_v31 = vsub.f32 %v3193_v53, %v3215_v27 }
 0xd1e   : > { %v3237_v32 = vmul.f32 1.442695, %v3224_v29  ;;  %v3239_v35 = vmul.f32 1.442695, %v3225_v31 }
 0xd1f   : > { %v2800_v36 = vpop.permute.xlu1 %2799 }
 0xd20   : > { %5814 = vpow2.f32 %v3237_v32  ;;  %v3433_v59 = vsel %vm1950_vm2, %v2800_v36, 0 }
 0xd21   : > { %5816 = vpow2.f32 %v3239_v35 }
 0xd22   : > { %v7456_v13 = vpop.eup %5808 }
 0xd23   : > { %v5811_v20 = vpop.eup %5810  ;;  %v3255_v19 = vsel %vm1850_vm6, %v7456_v13, 0.0  ;;  %v3218_v30 = vpop.xlane.xlu0 %3217 }
 0xd24   : > { %v7460_v21 = vpop.eup %5812  ;;  %3256 = vadd.xlane.f32.xlu1 %v3255_v19  ;;  %v3252_v22 = vsel %vm1850_vm6, %v5811_v20, 0.0  ;;  %v3226_v33 = vsub.f32 %v3194_v63, %v3218_v30 }
 0xd25   : > { %3253 = vadd.xlane.f32.xlu0 %v3252_v22  ;;  %v3249_v23 = vsel %vm1850_vm6, %v7460_v21, 0.0 }
 0xd26   : > { %v3241_v38 = vmul.f32 1.442695, %v3226_v33 }
 0xd27   : > { %v2798_v51 = vpop.permute.xlu0 %2797 }
 0xd28   : > { %3250 = vadd.xlane.f32.xlu1 %v3249_v23  ;;  %5818 = vpow2.f32 %v3241_v38  ;;  %v3387_v55 = vsel %vm1950_vm2, %v2798_v51, 0 }
 0xd2a   : > { %v7469_v40 = vpop.eup %5814 }
 0xd2b   : > { %v7471_v44 = vpop.eup %5816  ;;  %v3258_v46 = vsel %vm1850_vm6, %v7469_v40, 0.0 }
 0xd2c   : > { %v3261_v50 = vsel %vm1850_vm6, %v7471_v44, 0.0 }
 0xd32   : > { %v7475_v47 = vpop.eup %5818 }
 0xd33   : > { %v3264_v52 = vsel %vm1850_vm6, %v7475_v47, 0.0 }
 0xd39   : > { %2801 = vrot.lane.b32.xlu1 %v7367_v34, %s6408_s16 }
 0xd3b   : > { %2803 = vrot.lane.b32.xlu0 %v7367_v34, %s6409_s9 }
 0xd50   : > { %v3245_v39 = vpop.xlane.xlu1 %3244 }
 0xd51   : > { %5820 = vrcp.f32 %v3245_v39  ;;  %v5680_v39 = vld [vmem:[#allocation22] sm:$0xff]  }
 0xd5a   : > { %3259 = vadd.xlane.f32.xlu0 %v3258_v46  ;;  %v5681_v46 = vld [vmem:[#allocation22 + $0x8] sm:$0xff]  }
 0xd5b   : > { %v5821_v48 = vpop.eup %5820 }
 0xd5c   : > { %v3275_v49 = vmul.f32 %v5821_v48, %v5805_v7 }
 0xd5d   : > { %3262 = vadd.xlane.f32.xlu1 %v3261_v50 }
 0xd5e   : > { %3265 = vadd.xlane.f32.xlu0 %v3264_v52  ;;  %v3283_v53 = vpack.c.bf16 %v3275_v49, %v3275_v49  ;;  %v5682_v52 = vld [vmem:[#allocation22 + $0x10] sm:$0xff]  }
 0xd60   : > { %5346 = vmatmul.mubr.msk.bf16.vlgmr.msra.gmra.mrb[44].mxu0 %vm1850_vm6, %v3283_v53 }
 0xd61   : > { %5356 = vmatpush3.bf16.msra.mxu0 %v3387_v55  ;;  %5357 = vmatprep.mubr.msk.bf16.mxu0 %vm6402_vm0, %v6400_v3  ;;  %v5683_v55 = vld [vmem:[#allocation22 + $0x18] sm:$0xff]  }
 0xd62   : > { %5367 = vmatprep.subr.bf16.mxu0 %v6400_v3 }
 0xd6e   : > { %2805 = vrot.lane.b32.xlu1 %v7367_v34, %s6405_s18 }
 0xd74   : > { %2807 = vrot.lane.b32.xlu0 %v7367_v34, %s6406_s22 }
 0xda1   : > { %v3248_v56 = vpop.xlane.xlu0 %3247 }
 0xda2   : > { %5822 = vrcp.f32 %v3248_v56 }
 0xdac   : > { %v5823_v1 = vpop.eup %5822 }
 0xdad   : > { %v3276_v57 = vmul.f32 %v5823_v1, %v7451_v26 }
 0xdaf   : > { %v3284_v58 = vpack.c.bf16 %v3276_v57, %v3276_v57 }
 0xdb1   : > { %v3257_v60 = vpop.xlane.xlu1 %3256  ;;  %5352 = vmatmul.mubr.msk.bf16.vlgmr.msra.gmra.mrb[72].mxu1 %vm1850_vm6, %v3284_v58  ;;  %v5684_v58 = vld [vmem:[#allocation22 + $0x20] sm:$0xff]  }
 0xdb2   : > { %5362 = vmatpush3.bf16.msra.mxu1 %v3433_v59  ;;  %v3254_v62 = vpop.xlane.xlu0 %3253  ;;  %5363 = vmatprep.mubr.msk.bf16.mxu1 %vm6402_vm0, %v6400_v3 }
 0xdb3   : > { %5824 = vrcp.f32 %v3254_v62  ;;  %5373 = vmatprep.subr.bf16.mxu1 %v6400_v3  ;;  %v5686_v62 = vld [vmem:[#allocation22 + $0x30] sm:$0xff]  }
 0xdb5   : > { %v3251_v34 = vpop.xlane.xlu1 %3250 }
 0xdb6   : > { %5826 = vrcp.f32 %v3251_v34  ;;  %v2804_v4 = vpop.permute.xlu0 %2803  ;;  %v5687_v34 = vld [vmem:[#allocation22 + $0x38] sm:$0xff]  }
 0xdb7   : > { %5828 = vrcp.f32 %v3257_v60  ;;  %v3525_v9 = vsel %vm1950_vm2, %v2804_v4, 0  ;;  %v5685_v60 = vld [vmem:[#allocation22 + $0x28] sm:$0xff]  }
 0xdb9   : > { %v2802_v2 = vpop.permute.xlu1 %2801 }
 0xdba   : > { %v3479_v11 = vsel %vm1950_vm2, %v2802_v2, 0 }
 0xdbd   : > { %v5825_v63 = vpop.eup %5824 }
 0xdbe   : > { %v3278_v37 = vmul.f32 %v5825_v63, %v5811_v20 }
 0xdc0   : > { %v5827_v5 = vpop.eup %5826  ;;  %v3286_v6 = vpack.c.bf16 %v3278_v37, %v3278_v37 }
 0xdc1   : > { %v3277_v7 = vmul.f32 %v5827_v5, %v7460_v21  ;;  %v5829_v41 = vpop.eup %5828 }
 0xdc2   : > { %5364 = vmatmul.mubr.msk.bf16.vlgmr.msra.gmra.mrb[76].mxu1 %vm1850_vm6, %v3286_v6  ;;  %v3279_v26 = vmul.f32 %v5829_v41, %v7456_v13 }
 0xdc3   : > { %5374 = vmatpush3.bf16.msra.mxu1 %v3525_v9  ;;  %v3285_v10 = vpack.c.bf16 %v3277_v7, %v3277_v7  ;;  %5375 = vmatprep.mubr.msk.bf16.mxu1 %vm6402_vm0, %v6400_v3 }
 0xdc4   : > { %5385 = vmatprep.subr.bf16.mxu1 %v6400_v3  ;;  %v3287_v12 = vpack.c.bf16 %v3279_v26, %v3279_v26 }
 0xdc5   : > { %5358 = vmatmul.mubr.msk.bf16.vlgmr.msra.gmra.mrb[48].mxu0 %vm1850_vm6, %v3285_v10 }
 0xdc6   : > { %5368 = vmatpush3.bf16.msra.mxu0 %v3479_v11  ;;  %5369 = vmatprep.mubr.msk.bf16.mxu0 %vm6402_vm0, %v6400_v3 }
 0xdc7   : > { %5379 = vmatprep.subr.bf16.mxu0 %v6400_v3 }
 0xdcd   : > { %5370 = vmatmul.mubr.msk.bf16.vlgmr.msra.gmra.mrb[52].mxu0 %vm1850_vm6, %v3287_v12 }
 0xdce   : > { %5381 = vmatprep.mubr.msk.bf16.mxu0 %vm6402_vm0, %v6400_v3 }
 0xde7   : > { %v3260_v14 = vpop.xlane.xlu0 %3259 }
 0xde8   : > { %5830 = vrcp.f32 %v3260_v14 }
 0xdea   : > { %v3263_v15 = vpop.xlane.xlu1 %3262 }
 0xdeb   : > { %5832 = vrcp.f32 %v3263_v15  ;;  %v3266_v8 = vpop.xlane.xlu0 %3265 }
 0xdec   : > { %5834 = vrcp.f32 %v3266_v8 }
 0xdee   : > { %v2806_v54 = vpop.permute.xlu1 %2805 }
 0xdef   : > { %v3571_v17 = vsel %vm1950_vm2, %v2806_v54, 0  ;;  %v2808_v0 = vpop.permute.xlu0 %2807 }
 0xdf0   : > { %5380 = vmatpush3.bf16.msra.mxu0 %v3571_v17  ;;  %v3617_v22 = vsel %vm1950_vm2, %v2808_v0, 0 }
 0xdf1   : > { %5391 = vmatprep.subr.bf16.mxu0 %v6400_v3 }
 0xdf2   : > { %v5831_v18 = vpop.eup %5830 }
 0xdf3   : > { %v3280_v16 = vmul.f32 %v5831_v18, %v7469_v40 }
 0xdf5   : > { %v5833_v13 = vpop.eup %5832  ;;  %v3288_v20 = vpack.c.bf16 %v3280_v16, %v3280_v16 }
 0xdf6   : > { %v5835_v19 = vpop.eup %5834  ;;  %v3281_v21 = vmul.f32 %v5833_v13, %v7471_v44 }
 0xdf7   : > { %5376 = vmatmul.mubr.msk.bf16.vlgmr.msra.gmra.mrb[80].mxu1 %vm1850_vm6, %v3288_v20  ;;  %v3282_v24 = vmul.f32 %v5835_v19, %v7475_v47 }
 0xdf8   : > { %5386 = vmatpush3.bf16.msra.mxu1 %v3617_v22  ;;  %v3289_v23 = vpack.c.bf16 %v3281_v21, %v3281_v21  ;;  %5387 = vmatprep.mubr.msk.bf16.mxu1 %vm6402_vm0, %v6400_v3 }
 0xdf9   : > { %v3290_v27 = vpack.c.bf16 %v3282_v24, %v3282_v24 }
 0xdfa   : > { %5382 = vmatmul.mubr.msk.bf16.vlgmr.msra.gmra.mrb[56].mxu0 %vm1850_vm6, %v3289_v23 }
 0xdfb   : > { %5407 = vmatprep.mubr.msk.bf16.mxu0 %vm6402_vm0, %v6400_v3  ;;  %5392 = vmatpush3.bf16.msra.mxu0 %v5680_v39  ;;  %v5696_v39 = vld [vmem:[#allocation23 + $0x24] ss:$16 sps:$4 sm:$0xff]  }
 0xdfc   : > { %5393 = vmatprep.subr.bf16.mxu0 %v6400_v3 }
 0xdff   : > { %5388 = vmatmul.mubr.msk.bf16.vlgmr.msra.gmra.mrb[84].mxu1 %vm1850_vm6, %v3290_v27  ;;  %5394 = vmatpush3.bf16.msra.mxu0 %v5681_v46  ;;  %v5705_v46 = vld [vmem:[#allocation23 + $0x4c] ss:$16 sps:$4 sm:$0xff]  }
 0xe00   : > { %4082 = vmatprep.mubr.bf16.mxu1 %v6401_v25  ;;  %5395 = vmatprep.subr.bf16.mxu0 %v6400_v3 }
 0xe03   : > { %5396 = vmatpush3.bf16.msra.mxu0 %v5682_v52 }
 0xe04   : > { %5397 = vmatprep.subr.bf16.mxu0 %v6400_v3 }
 0xe07   : > { %5398 = vmatpush3.bf16.msra.mxu0 %v5683_v55  ;;  %v5711_v55 = vld [vmem:[#allocation23 + $0x6c] ss:$16 sps:$4 sm:$0xff]  }
 0xe08   : > { %5399 = vmatprep.subr.bf16.mxu0 %v6400_v3 }
 0xe0b   : > { %5400 = vmatpush3.bf16.msra.mxu0 %v5684_v58  ;;  %v5717_v58 = vld [vmem:[#allocation23 + $0x8c] ss:$16 sps:$4 sm:$0xff]  }
 0xe0c   : > { %5401 = vmatprep.subr.bf16.mxu0 %v6400_v3 }
 0xe0f   : > { %5402 = vmatpush3.bf16.msra.mxu0 %v5685_v60  ;;  %v5715_v60 = vld [vmem:[#allocation23 + $0x88] ss:$16 sps:$4 sm:$0xff]  }
 0xe10   : > { %5403 = vmatprep.subr.bf16.mxu0 %v6400_v3 }
 0xe13   : > { %5404 = vmatpush3.bf16.msra.mxu0 %v5686_v62  ;;  %v5720_v62 = vld [vmem:[#allocation23 + $0xa4] ss:$16 sps:$4 sm:$0xff]  }
 0xe14   : > { %5405 = vmatprep.subr.bf16.mxu0 %v6400_v3 }
 0xe17   : > { %5406 = vmatpush3.bf16.msra.mxu0 %v5687_v34  ;;  %v5723_v34 = vld [vmem:[#allocation23 + $0xac] ss:$16 sps:$4 sm:$0xff]  }
 0xe33   : > { %v7525_v29 = vpop.f32.mrb[44].mxu0 }
 0xe34   : > { %v5347_v30 = vpop.f32.mrb[45].mxu0 }
 0xe35   : > { %v3334_v31 = vpop.f32.mrb[46].mxu0 }
 0xe36   : > { %v5348_v32 = vpop.f32.mrb[47].mxu0 }
 0xe84   : > { %v3377_v33 = vpop.f32.mrb[72].mxu1 }
 0xe85   : > { %3660 = vrot.lane.b32.xlu1 %v3377_v33, %s6406_s22  ;;  %v5353_v35 = vpop.f32.mrb[73].mxu1  ;;  %v5688_v33 = vld [vmem:[#allocation23] ss:$16 sps:$4 sm:$0xff]  }
 0xe86   : > { %v3380_v36 = vpop.f32.mrb[74].mxu1  ;;  %v5690_v35 = vld [vmem:[#allocation23 + $0x4] ss:$16 sps:$4 sm:$0xff]  }
 0xe87   : > { %v5354_v38 = vpop.f32.mrb[75].mxu1  ;;  %v5691_v36 = vld [vmem:[#allocation23 + $0x8] ss:$16 sps:$4 sm:$0xff]   ;;  %4050 = vmatprep.subr.bf16.mxu1 %v5690_v35 }
 0xe88   : > { %v5693_v38 = vld [vmem:[#allocation23 + $0xc] ss:$16 sps:$4 sm:$0xff]   ;;  %4051 = vmatpush1.bf16.msra.mxu1 %v5688_v33 }
 0xe89   : > { %4091 = vmatprep.subr.bf16.mxu0 %v5693_v38  ;;  %4052 = vmatprep.subr.bf16.mxu1 %v5696_v39  ;;  %v5749_v33 = vld [vmem:[#allocation25 + $0xd8] sm:$0xff]   ;;  %v5752_v38 = vld [vmem:[#allocation25 + $0x60] sm:$0xff]  }
 0xe8a   : > { %v5750_v35 = vld [vmem:[#allocation25 + $0x18] sm:$0xff]   ;;  %v5753_v39 = vld [vmem:[#allocation25 + $0xe0] sm:$0xff]  }
 0xe95   : > { %v3469_v40 = vpop.f32.mrb[76].mxu1 }
 0xe96   : > { %3668 = vrot.lane.b32.xlu1 %v3469_v40, %s6409_s9  ;;  %v5365_v44 = vpop.f32.mrb[77].mxu1  ;;  %v5694_v40 = vld [vmem:[#allocation23 + $0x20] ss:$16 sps:$4 sm:$0xff]   ;;  %s7773_s9 = sld [smem:[#allocation65_spill]] }
 0xe97   : > { %v3472_v47 = vpop.f32.mrb[78].mxu1  ;;  %v5702_v44 = vld [vmem:[#allocation23 + $0x44] ss:$16 sps:$4 sm:$0xff]   ;;  %4053 = vmatpush1.bf16.msra.mxu1 %v5694_v40 }
 0xe98   : > { %v5366_v48 = vpop.f32.mrb[79].mxu1  ;;  %v3423_v49 = vpop.f32.mrb[48].mxu0  ;;  %v5700_v47 = vld [vmem:[#allocation23 + $0x40] ss:$16 sps:$4 sm:$0xff]   ;;  %4054 = vmatprep.subr.bf16.mxu1 %v5702_v44  ;;  %v5757_v44 = vld [vmem:[#allocation25 + $0xe8] sm:$0xff]  }
 0xe99   : > { %3664 = vrot.lane.b32.xlu0 %v3423_v49, %s6405_s18  ;;  %v5359_v50 = vpop.f32.mrb[49].mxu0  ;;  %s7768_s18 = sld [smem:[#allocation59_spill]]  ;;  %v5703_v48 = vld [vmem:[#allocation23 + $0x48] ss:$16 sps:$4 sm:$0xff]   ;;  %v5755_v40 = vld [vmem:[#allocation25 + $0xa0] sm:$0xff]  }
 0xe9a   : > { %v3426_v51 = vpop.f32.mrb[50].mxu0 }
 0xe9b   : > { %v5360_v53 = vpop.f32.mrb[51].mxu0  ;;  %4055 = vmatpush1.bf16.msra.mxu1 %v5700_v47  ;;  %v5759_v47 = vld [vmem:[#allocation25 + $0xa8] sm:$0xff]  }
 0xe9c   : > { %v5708_v53 = vld [vmem:[#allocation23 + $0x64] ss:$16 sps:$4 sm:$0xff]  }
 0xe9d   : > { %4056 = vmatprep.subr.bf16.mxu1 %v5708_v53  ;;  %v5765_v53 = vld [vmem:[#allocation25 + $0xf8] sm:$0xff]  }
 0xe9f   : > { %v4904_v24 = vld [vmem:[%s7768_s18] ss:$0 sm:$0xff]  ;;  %s1064_s18 = scalar_lea.vmem [#allocation26], %s6983_s2  ;;  %s6410_s2 = smov [#allocation26]  }
 0xea0   : > { %v3515_v56 = vpop.f32.mrb[52].mxu0  ;;  %s4516_s22 = sshll.u32 %s1064_s18, 4  ;;  %s7583_s22 = int_to_ptr.vmem [resolvable:$true] %s4516_s22 }
 0xea1   : > { %3672 = vrot.lane.b32.xlu0 %v3515_v56, %s6408_s16  ;;  %v5371_v1 = vpop.f32.mrb[53].mxu0  ;;  %v5706_v56 = vld [vmem:[#allocation23 + $0x60] ss:$16 sps:$4 sm:$0xff]   ;;  %s7769_s16 = sld [smem:[#allocation60_spill]]  ;;  %s6273_s21 = scalar_lea.vmem %s7583_s22, 128 }
 0xea2   : > { %v3518_v57 = vpop.f32.mrb[54].mxu0  ;;  %v5709_v1 = vld [vmem:[#allocation23 + $0x68] ss:$16 sps:$4 sm:$0xff]   ;;  %4057 = vmatpush1.bf16.msra.mxu1 %v5706_v56  ;;  %p6274_p12 = scmp.ne.s32.totalorder %s7583_s22, %s6273_s21 }
 0xea3   : > { %v5372_v59 = vpop.f32.mrb[55].mxu0  ;;  %v5714_v57 = vld [vmem:[#allocation23 + $0x84] ss:$16 sps:$4 sm:$0xff]   ;;  %v5767_v56 = vld [vmem:[#allocation25 + $0xb8] sm:$0xff]  }
 0xea4   : > { %v5712_v59 = vld [vmem:[#allocation23 + $0x80] ss:$16 sps:$4 sm:$0xff]   ;;  %4058 = vmatprep.subr.bf16.mxu1 %v5714_v57  ;;  %v3884_v57 = vsub.s32 3, %v7055_v42  ;;  %p6275_p13 = pnand %p6274_p12, %p7774_p1 }
 0xea6   : > { %4059 = vmatpush1.bf16.msra.mxu1 %v5712_v59  ;;  %p6276_p0 = pneg %p6275_p13 }
 0xea7   : > { %4060 = vmatprep.subr.bf16.mxu1 %v5720_v62 }
 0xeca   : > { %v3561_v63 = vpop.f32.mrb[80].mxu1 }
 0xecb   : > { %3676 = vrot.lane.b32.xlu1 %v3561_v63, %s6407_s0  ;;  %v5377_v37 = vpop.f32.mrb[81].mxu1  ;;  %v5718_v63 = vld [vmem:[#allocation23 + $0xa0] ss:$16 sps:$4 sm:$0xff]  }
 0xecc   : > { %v3564_v4 = vpop.f32.mrb[82].mxu1  ;;  %v5721_v37 = vld [vmem:[#allocation23 + $0xa8] ss:$16 sps:$4 sm:$0xff]   ;;  %4061 = vmatpush1.bf16.msra.mxu1 %v5718_v63 }
 0xecd   : > { %v5378_v5 = vpop.f32.mrb[83].mxu1  ;;  %v3607_v6 = vpop.f32.mrb[56].mxu0  ;;  %v5726_v4 = vld [vmem:[#allocation23 + $0xc4] ss:$16 sps:$4 sm:$0xff]  }
 0xece   : > { %3680 = vrot.lane.b32.xlu0 %v3607_v6, %s6403_s8  ;;  %v5383_v7 = vpop.f32.mrb[57].mxu0  ;;  %v5729_v5 = vld [vmem:[#allocation23 + $0xcc] ss:$16 sps:$4 sm:$0xff]   ;;  %v5724_v6 = vld [vmem:[#allocation23 + $0xc0] ss:$16 sps:$4 sm:$0xff]   ;;  %4062 = vmatprep.subr.bf16.mxu1 %v5726_v4  ;;  %s7772_s8 = sld [smem:[#allocation64_spill]] }
 0xecf   : > { %v3610_v9 = vpop.f32.mrb[58].mxu0  ;;  %v5727_v7 = vld [vmem:[#allocation23 + $0xc8] ss:$16 sps:$4 sm:$0xff]  }
 0xed0   : > { %v5384_v2 = vpop.f32.mrb[59].mxu0  ;;  %v5732_v9 = vld [vmem:[#allocation23 + $0xe4] ss:$16 sps:$4 sm:$0xff]   ;;  %4063 = vmatpush1.bf16.msra.mxu1 %v5724_v6 }
 0xed1   : > { %v5735_v2 = vld [vmem:[#allocation23 + $0xec] ss:$16 sps:$4 sm:$0xff]   ;;  %4064 = vmatprep.subr.bf16.mxu1 %v5732_v9 }
 0xed2   : > { %v3653_v10 = vpop.f32.mrb[84].mxu1 }
 0xed3   : > { %3684 = vrot.lane.b32.xlu1 %v3653_v10, %s6404_s13  ;;  %v5389_v41 = vpop.f32.mrb[85].mxu1  ;;  %v5730_v10 = vld [vmem:[#allocation23 + $0xe0] ss:$16 sps:$4 sm:$0xff]   ;;  %s4973_s13 = sshll.u32 %s7744_s30, 7  ;;  %s6277_s30 = sshll.u32 %s6410_s2, 4  ;;  %s6278_s30 = int_to_ptr.vmem [resolvable:$false] %s6277_s30 }
 0xed4   : > { %v3656_v11 = vpop.f32.mrb[86].mxu1  ;;  %v5733_v41 = vld [vmem:[#allocation23 + $0xe8] ss:$16 sps:$4 sm:$0xff]   ;;  %4065 = vmatpush1.bf16.msra.mxu1 %v5730_v10  ;;  %s7581_s4 = scalar_lea.hbm %s7773_s9, %s4973_s13  ;;  %s6279_s12 = scalar_lea.vmem %s6278_s30, 256 }
 0xed5   : > { %v5390_v3 = vpop.f32.mrb[87].mxu1  ;;  %v5736_v11 = vld [vmem:[#allocation25 + $0x40] sm:$0xff]   ;;  %p6280_p6 = scmp.lt.s32.totalorder %s7583_s22, %s6278_s30  ;;  %p6281_p4 = scmp.lt.s32.totalorder %s6279_s12, %s6273_s21 }
 0xed6   : > { %v5737_v3 = vld [vmem:[#allocation25 + $0xc0] sm:$0xff]   ;;  %5095 = vmatprep.subr.bf16.mxu1 %v5736_v11 }
 0xed7   : > { %p6282_p2 = por %p6281_p4, %p6280_p6 }
 0xed9   : > { %p6283_p11 = pnand %p6282_p2, %p6276_p0 }
 0xef7   : > { %v3661_v26 = vpop.permute.xlu1 %3660 }
 0xef8   : > { %v3687_v15 = vsel %vm1455_vm1, %v7525_v29, %v3661_v26 }
 0xf08   : > { %v3669_v14 = vpop.permute.xlu1 %3668 }
 0xf0b   : > { %v3665_v12 = vpop.permute.xlu0 %3664 }
 0xf0c   : > { %v3688_v54 = vsel %vm2345_vm7, %v3687_v15, %v3665_v12 }
 0xf0d   : > { %v3689_v18 = vsel %vm2347_vm8, %v3688_v54, %v3669_v14 }
 0xf13   : > { %v3673_v8 = vpop.permute.xlu0 %3672 }
 0xf14   : > { %v3690_v0 = vsel %vm2349_vm9, %v3689_v18, %v3673_v8  ;;  %v4905_v8 = vld [vmem:[%s7769_s16] ss:$0 sm:$0xff] }
 0xf3d   : > { %v3677_v17 = vpop.permute.xlu1 %3676 }
 0xf3e   : > { %v3691_v13 = vsel %vm2351_vm10, %v3690_v0, %v3677_v17  ;;  %v4906_v17 = vld [vmem:[%s7770_s20] ss:$0 sm:$0xff]  ;;  %v5738_v0 = vld [vmem:[#allocation25] sm:$0xff]   ;;  %s4503_s20 = scalar_lea.sflag [#allocation4], %s6980_s5 }
 0xf40   : > { %v3681_v16 = vpop.permute.xlu0 %3680 }
 0xf41   : > { %v3692_v20 = vsel %vm2353_vm11, %v3691_v13, %v3681_v16  ;;  %v5739_v13 = vld [vmem:[#allocation25 + $0x80] sm:$0xff]  }
 0xf45   : > { %v3685_v19 = vpop.permute.xlu1 %3684 }
 0xf46   : > { %v3693_v21 = vsel %vm2355_vm12, %v3692_v20, %v3685_v19  ;;  %v5740_v19 = vld [vmem:[#allocation25 + $0x48] sm:$0xff]  }
 0xf47   : > { %v3694_v22 = vpack.c.bf16 %v3693_v21, %v3693_v21  ;;  %v5741_v21 = vld [vmem:[#allocation25 + $0xc8] sm:$0xff]  }
 0xf49   : > { %5408 = vmatmul.mubr.bf16.vlgmr.msra.gmra.mrb[60].mxu0 %v3694_v22  ;;  %v5742_v22 = vld [vmem:[#allocation25 + $0x8] sm:$0xff]  }
 0xf4a   : > { %4123 = vmatprep.mubr.bf16.mxu0 %v6401_v25  ;;  %v5699_v25 = vld [vmem:[#allocation23 + $0x2c] ss:$16 sps:$4 sm:$0xff]   ;;  %4092 = vmatpush1.bf16.msra.mxu0 %v5691_v36 }
 0xf4b   : > { %4093 = vmatprep.subr.bf16.mxu0 %v5699_v25  ;;  %v5751_v36 = vld [vmem:[#allocation25 + $0x98] sm:$0xff]   ;;  %v5754_v25 = vld [vmem:[#allocation25 + $0x20] sm:$0xff]  }
0x101c   : > { %v3793_v23 = vpop.f32.mrb[60].mxu0 }
0x101d   : > { %v3799_v27 = vadd.f32 %v3793_v23, %v7295_v28  ;;  %v5409_v29 = vpop.f32.mrb[61].mxu0  ;;  %v5697_v28 = vld [vmem:[#allocation23 + $0x28] ss:$16 sps:$4 sm:$0xff]  }
0x101e   : > { %v3796_v30 = vpop.f32.mrb[62].mxu0  ;;  %4094 = vmatpush1.bf16.msra.mxu0 %v5697_v28  ;;  %v5743_v23 = vld [vmem:[#allocation25 + $0x88] sm:$0xff]   ;;  %v5746_v29 = vld [vmem:[#allocation25 + $0x10] sm:$0xff]  }
0x101f   : > { %v7554_v31 = vadd.f32 %v4904_v24, %v3799_v27  ;;  %v5410_v32 = vpop.f32.mrb[63].mxu0  ;;  %4095 = vmatprep.subr.bf16.mxu0 %v5705_v46  ;;  %v5744_v24 = vld [vmem:[#allocation25 + $0x50] sm:$0xff]   ;;  %v5756_v28 = vld [vmem:[#allocation25 + $0x68] sm:$0xff]  }
0x1020   : > { %v5745_v27 = vld [vmem:[#allocation25 + $0xd0] sm:$0xff]   ;;  %v5748_v32 = vld [vmem:[#allocation25 + $0x58] sm:$0xff]   ;;  %v5758_v46 = vld [vmem:[#allocation25 + $0x28] sm:$0xff]  }
0x1021   : > { %3810 = vadd.xlane.f32.xlu0 %v7554_v31  ;;  %v5747_v30 = vld [vmem:[#allocation25 + $0x90] sm:$0xff]  }
0x1022   : > { %4096 = vmatpush1.bf16.msra.mxu0 %v5703_v48  ;;  %v5760_v48 = vld [vmem:[#allocation25 + $0x70] sm:$0xff]  }
0x1023   : > { %4097 = vmatprep.subr.bf16.mxu0 %v5711_v55  ;;  %v5766_v55 = vld [vmem:[#allocation25 + $0x38] sm:$0xff]  }
0x1026   : > { %4098 = vmatpush1.bf16.msra.mxu0 %v5709_v1  ;;  %v3868_v1 = vld [vmem:[%s7771_s26] sm:$0xf] }
0x1027   : > { %4099 = vmatprep.subr.bf16.mxu0 %v5717_v58  ;;  %v3873_v58 = vrot.slane %v3868_v1, %v7061_v45  ;;  %v3881_v59 = vrot.slane %v3868_v1, %v1177_v61  ;;  %v3885_v62 = vrot.slane %v3868_v1, %v3884_v57 }
0x102a   : > { %4100 = vmatpush1.bf16.msra.mxu0 %v5715_v60  ;;  %v3877_v60 = vrot.slane %v3868_v1, %v7058_v43 }
0x102b   : > { %4101 = vmatprep.subr.bf16.mxu0 %v5723_v34 }
0x102e   : > { %4102 = vmatpush1.bf16.msra.mxu0 %v5721_v37 }
0x102f   : > { %4103 = vmatprep.subr.bf16.mxu0 %v5729_v5 }
0x1032   : > { %4104 = vmatpush1.bf16.msra.mxu0 %v5727_v7 }
0x1033   : > { %4105 = vmatprep.subr.bf16.mxu0 %v5735_v2 }
0x1036   : > { %4106 = vmatpush1.bf16.msra.mxu0 %v5733_v41 }
0x1037   : > { %5117 = vmatprep.subr.bf16.mxu0 %v5737_v3 }
0x10ae   : > { %v3811_v49 = vpop.xlane.xlu0 %3810 }
0x10af   : > { %v3812_v50 = vmul.f32 0.0078125, %v3811_v49  ;;  %v5761_v49 = vld [vmem:[#allocation25 + $0xf0] sm:$0xff]  }
0x10b1   : > { %v3813_v51 = vsub.f32 %v7554_v31, %v3812_v50  ;;  %v5762_v50 = vld [vmem:[#allocation25 + $0x30] sm:$0xff]  }
0x10b3   : > { %v3814_v52 = vmul.f32 %v3813_v51, %v3813_v51 }
0x10b5   : > { %3815 = vadd.xlane.f32.xlu1 %v3814_v52  ;;  %v5764_v52 = vld [vmem:[#allocation25 + $0x78] sm:$0xff]  }
0x1142   : > { %v3816_v26 = vpop.xlane.xlu1 %3815 }
0x1143   : > { %v3817_v12 = vmul.f32 0.0078125, %v3816_v26 }
0x1145   : > { %v3818_v14 = vadd.f32 1e-05, %v3817_v12 }
0x1147   : > { %5836 = vrsqrt.f32 %v3818_v14 }
0x1151   : > { %v5837_v15 = vpop.eup %5836 }
0x1152   : > { %v3820_v54 = vmul.f32 %v5837_v15, %v3813_v51  ;;  %v5763_v51 = vld [vmem:[#allocation25 + $0xb0] sm:$0xff]  }
0x1154   : > { %v3827_v18 = vmul.f32 %v4905_v8, %v3820_v54 }
0x1156   : > { %v3834_v16 = vadd.f32 %v4906_v17, %v3827_v18 }
0x1158   : > { %v3835_v20 = vpack.c.bf16 %v3834_v16, %v3834_v16 }
0x115a   : > { %4083 = vmatmul.mubr.bf16.vlgmr.msra.gmra.mrb[88].mxu1 %v3835_v20  ;;  %4124 = vmatmul.mubr.bf16.vlgmr.msra.gmra.mrb[64].mxu0 %v3835_v20 }
0x115b   : > { %5096 = vmatpush3.bf16.msra.mxu1 %v5738_v0  ;;  %5118 = vmatpush3.bf16.msra.mxu0 %v5739_v13 }
0x115c   : > { %5097 = vmatprep.subr.bf16.mxu1 %v5740_v19  ;;  %5119 = vmatprep.subr.bf16.mxu0 %v5741_v21 }
0x115f   : > { %5098 = vmatpush3.bf16.msra.mxu1 %v5742_v22  ;;  %5120 = vmatpush3.bf16.msra.mxu0 %v5743_v23 }
0x1160   : > { %5099 = vmatprep.subr.bf16.mxu1 %v5744_v24  ;;  %5121 = vmatprep.subr.bf16.mxu0 %v5745_v27 }
0x1163   : > { %5100 = vmatpush3.bf16.msra.mxu1 %v5746_v29  ;;  %5122 = vmatpush3.bf16.msra.mxu0 %v5747_v30 }
0x1164   : > { %5101 = vmatprep.subr.bf16.mxu1 %v5748_v32  ;;  %5123 = vmatprep.subr.bf16.mxu0 %v5749_v33 }
0x1167   : > { %5102 = vmatpush3.bf16.msra.mxu1 %v5750_v35  ;;  %5124 = vmatpush3.bf16.msra.mxu0 %v5751_v36 }
0x1168   : > { %5103 = vmatprep.subr.bf16.mxu1 %v5752_v38  ;;  %5125 = vmatprep.subr.bf16.mxu0 %v5753_v39 }
0x116b   : > { %5104 = vmatpush3.bf16.msra.mxu1 %v5754_v25  ;;  %5126 = vmatpush3.bf16.msra.mxu0 %v5755_v40 }
0x116c   : > { %5105 = vmatprep.subr.bf16.mxu1 %v5756_v28  ;;  %5127 = vmatprep.subr.bf16.mxu0 %v5757_v44 }
0x116f   : > { %5106 = vmatpush3.bf16.msra.mxu1 %v5758_v46  ;;  %5128 = vmatpush3.bf16.msra.mxu0 %v5759_v47  ;;  %v4971_v46 = vld [vmem:[%s7772_s8] ss:$0 sm:$0xff] }
0x1170   : > { %5107 = vmatprep.subr.bf16.mxu1 %v5760_v48  ;;  %5129 = vmatprep.subr.bf16.mxu0 %v5761_v49 }
0x1173   : > { %5108 = vmatpush3.bf16.msra.mxu1 %v5762_v50  ;;  %5130 = vmatpush3.bf16.msra.mxu0 %v5763_v51 }
0x1174   : > { %5109 = vmatprep.subr.bf16.mxu1 %v5764_v52  ;;  %5131 = vmatprep.subr.bf16.mxu0 %v5765_v53 }
0x1177   : > { %5110 = vmatpush3.bf16.msra.mxu1 %v5766_v55  ;;  %5132 = vmatpush3.bf16.msra.mxu0 %v5767_v56 }
0x122d   : > { %v4084_v34 = vpop.f32.mrb[88].mxu1  ;;  %v4125_v63 = vpop.f32.mrb[64].mxu0 }
0x122e   : > { %v4085_v37 = vadd.f32 %v4084_v34, %v3873_v58  ;;  %v4126_v4 = vadd.f32 %v4125_v63, %v3881_v59  ;;  %v4086_v5 = vpop.f32.mrb[89].mxu1  ;;  %v4127_v6 = vpop.f32.mrb[65].mxu0 }
0x122f   : > { %v4087_v7 = vadd.f32 %v4086_v5, %v3877_v60  ;;  %v4128_v9 = vadd.f32 %v4127_v6, %v3885_v62  ;;  %v4088_v2 = vpop.f32.mrb[90].mxu1  ;;  %v4129_v10 = vpop.f32.mrb[66].mxu0 }
0x1230   : > { %v4136_v41 = vmul.f32 0.70710677, %v4085_v37  ;;  %v4138_v11 = vmul.f32 0.70710677, %v4126_v4  ;;  %v4089_v42 = vpop.f32.mrb[91].mxu1  ;;  %v4130_v61 = vpop.f32.mrb[67].mxu0 }
0x1231   : > { %v4137_v3 = vmul.f32 0.70710677, %v4087_v7  ;;  %v4139_v45 = vmul.f32 0.70710677, %v4128_v9  ;;  %v4132_v15 = vmul.f32 0.5, %v4085_v37  ;;  %v4134_v17 = vmul.f32 0.5, %v4126_v4 }
0x1232   : > { %5838 = verf.f32 %v4136_v41  ;;  %v4133_v18 = vmul.f32 0.5, %v4087_v7  ;;  %v4135_v13 = vmul.f32 0.5, %v4128_v9 }
0x1233   : > { %5840 = verf.f32 %v4138_v11 }
0x1234   : > { %5842 = verf.f32 %v4137_v3 }
0x1235   : > { %5844 = verf.f32 %v4139_v45 }
0x123c   : > { %v5839_v43 = vpop.eup %5838 }
0x123d   : > { %v5841_v26 = vpop.eup %5840  ;;  %v4144_v12 = vadd.f32 1.0, %v5839_v43 }
0x123e   : > { %v5843_v14 = vpop.eup %5842  ;;  %v4146_v8 = vadd.f32 1.0, %v5841_v26 }
0x123f   : > { %v5845_v54 = vpop.eup %5844  ;;  %v4145_v16 = vadd.f32 1.0, %v5843_v14  ;;  %v4148_v0 = vmul.f32 %v4144_v12, %v4132_v15 }
0x1240   : > { %v4147_v20 = vadd.f32 1.0, %v5845_v54  ;;  %v4150_v19 = vmul.f32 %v4146_v8, %v4134_v17 }
0x1241   : > { %v4149_v21 = vmul.f32 %v4145_v16, %v4133_v18  ;;  %v4152_v24 = vpack.c.bf16 %v4148_v0, %v4148_v0 }
0x1242   : > { %v4151_v22 = vmul.f32 %v4147_v20, %v4135_v13  ;;  %v4154_v29 = vpack.c.bf16 %v4150_v19, %v4150_v19 }
0x1243   : > { %v4153_v23 = vpack.c.bf16 %v4149_v21, %v4149_v21 }
0x1244   : > { %v4155_v27 = vpack.c.bf16 %v4151_v22, %v4151_v22 }
0x1245   : > { %4444 = vmatprep.mubr.bf16.mxu1 %v4153_v23 }
0x1246   : > { %4484 = vmatprep.mubr.bf16.mxu0 %v4155_v27  ;;  %4445 = vmatmul.mubr.bf16.vlgmr.msra.gmra.mrb[92].mxu1 %v4152_v24 }
0x1247   : > { %4485 = vmatmul.mubr.bf16.vlgmr.msra.gmra.mrb[68].mxu0 %v4154_v29 }
0x1319   : > { %v5111_v30 = vpop.f32.mrb[92].mxu1 }
0x131a   : > { %v5133_v32 = vpop.f32.mrb[68].mxu0  ;;  %v5112_v33 = vpop.f32.mrb[93].mxu1 }
0x131b   : > { %v5113_v35 = vadd.f32 %v5112_v33, %v5111_v30  ;;  %v5134_v36 = vpop.f32.mrb[69].mxu0  ;;  %v5114_v38 = vpop.f32.mrb[94].mxu1 }
0x131c   : > { %v5135_v39 = vadd.f32 %v5134_v36, %v5133_v32  ;;  %v5136_v25 = vpop.f32.mrb[70].mxu0  ;;  %v5115_v40 = vpop.f32.mrb[95].mxu1 }
0x131d   : > { %v5137_v28 = vpop.f32.mrb[71].mxu0 }
0x131e   : > { %v4487_v44 = vadd.f32 %v5135_v39, %v5113_v35 }
0x1320   : > { %v4492_v47 = vadd.f32 %v4487_v44, %v7554_v31 }
0x1322   : > { %v4500_v48 = vadd.f32 %v4971_v46, %v4492_v47 }
0x1324   : > { %4501 = vst [vmem:[%s1064_s18] sm:$0xff] %v4500_v48 }
0x1325   : > { %6286 = shalt.err (!%p6283_p11)
}
0x1326   : > { %s6287_s5 = scalar_lea.hbm %s7581_s4, 128  ;;  %s6291_s15 = scalar_lea.hbm %s7773_s9, 256 }
0x1327   : > { %p6288_p10 = scmp.ne.s32.totalorder %s7581_s4, %s6287_s5  ;;  %p6292_p5 = scmp.lt.u32.totalorder %s7581_s4, %s7773_s9 }
0x1328   : > { %p6293_p8 = scmp.lt.u32.totalorder %s6291_s15, %s6287_s5  ;;  %p6295_p12 = scmp.lt.u32.totalorder %s6287_s5, %s7581_s4 }
0x1329   : > { %p6289_p7 = pnand %p6288_p10, %p7774_p1 }
0x132a   : > { %p6294_p3 = por %p6293_p8, %p6292_p5 }
0x132b   : > { %p6290_p9 = pneg %p6289_p7 }
0x132c   : > { %p6296_p13 = por %p6295_p12, %p6294_p3 }
0x132e   : > { %p6297_p0 = pnand %p6296_p13, %p6290_p9 }
0x1330   : > { %6300 = shalt.err (!%p6297_p0)
}
0x1331   : > { %5465 = dma.vmem_to_hbm [thread:$0]  (%p7774_p1), %s7583_s22, 128, %s7581_s4, %s4503_s20  }
0x1332 PF: > { %s4528_s18 = sand.u32 1, %s6363_s27   ;;  %p7775_p6 = scmp.ne.s32.totalorder %s7730_s1, 0 }
0x1333   : > { %p7776_p4 = scmp.ge.s32.totalorder %s6375_s28, 2  ;;  %s4529_s0 = scalar_lea.sflag [#allocation4], %s4528_s18 }
0x1335   : > { %p5515_p2 = pnand %p7776_p4, %p7775_p6 }
0x1337   : > { %6358 = dma.done.wait (!%p5515_p2), %s4529_s0, 128  }
0x1338   : > { %6360 = vsyncadd (!%p5515_p2), %s4529_s0, 4294967168  ;;  %p50_p11 = scmp.ge.s32.totalorder %s6843_s10, 4   ;;  %s7777_s27 = smov %s6367_s3 }
0x1339   : > { %s7778_s3 = smov %s6371_s7  ;;  %s7779_s7 = smov %s6854_s17 }
0x133a   : > { %s7780_s28 = smov %s6843_s10  ;;  %52 = sbr.rel (!%p50_p11) target bundleno = 41 (0x29), region = 249 }
0x1341   :  { %4534 = vsyncpa [#allocation3], 1 }
0x1342   :  { %4536 = vsyncpa [#allocation3 + $0x1], 1 }
0x1343   :  { %4537 = vsyncpa [#allocation6], 1 }
0x1344   :  { %4539 = vsyncpa [#allocation6 + $0x1], 1 }
0x1345   :  { %4540 = vsyncpa [#allocation9], 1 }
0x1346   :  { %4542 = vsyncpa [#allocation9 + $0x1], 1 }
0x1347   :  { %4543 = vsyncpa [#allocation12], 1 }
0x1348   :  { %4544 = vsyncpa [#allocation15], 1 }
0x1349   :  { %4545 = vsyncpa [#allocation18], 1 }
0x134a   :  { %4546 = vsyncpa [#allocation21], 1 }
0x134b   :  { %4547 = vsyncpa [#allocation24], 1 }
0x134c   :  { %4548 = vsyncpa [#allocation4], 1 }
0x134d   :  { %4550 = vsyncpa [#allocation4 + $0x1], 1 }

</bundles_post_ra>
